<compile_context>
chip_gen: v5e
topology: v5e:2x2
jax: 0.10.0
libtpu: 0.0.40
codegen_flags: <defaults>
</compile_context>

<pallas_src>
import functools

import numpy as np

import jax
import jax.numpy as jnp
from jax import lax
from jax.experimental import pallas as pl
from jax.experimental.pallas import tpu as pltpu

_LANES = 128


def _extrema2d_kernel(flat_ref, x_ref, o_ref, *, d0, d1, shift):
    """Processes one batch block.  Layout: (H, W, bn), batch on the lane axis."""
    H, W, B = x_ref.shape
    w_p2 = 1 << shift
    x = x_ref[...]                                    # (H, W, B)
    flat = flat_ref[...]                              # (H, W, 1) row-major cell ids

    # ---- elementwise extrema detection (one-time cost per block) ----
    # dy runs along H = untiled leading dim -> tile-aligned slices/concat.
    zrow = jnp.zeros((1, W, B), x.dtype)
    dy = x[1:] - x[:-1]                               # (H-1, W, B)
    dy_rg = jnp.concatenate([dy, zrow], axis=0) > 0   # pad bottom, > 0
    dy_ll = jnp.concatenate([zrow, dy], axis=0) <= 0  # pad top  , <= 0
    # dx runs along W (sublane dim).
    # TODO(synk): the (W-1) slice + concat costs a sublane relayout; a
    # pltpu.roll(x, {1, W-1}, axis=1) + boundary-mask variant would avoid it,
    # but detection is a one-off per block so the win is small.
    zcol = jnp.zeros((H, 1, B), x.dtype)
    dx = x[:, 1:, :] - x[:, :-1, :]                   # (H, W-1, B)
    dx_rg = jnp.concatenate([dx, zcol], axis=1) > 0   # pad right, > 0
    dx_ll = jnp.concatenate([zcol, dx], axis=1) <= 0  # pad left , <= 0
    sign = x <= 0                                     # == (1 - sign(x)).bool()
    valleys = dx_rg & dx_ll & dy_rg & dy_ll & sign
    peaks = ~(dx_rg | dx_ll | dy_rg | dy_ll | sign)
    extrema = peaks | valleys

    # ---- batched greedy NMS: carry only (vals, out) ----
    vals0 = jnp.where(extrema, jnp.abs(x), -jnp.inf)  # -inf = inactive/suppressed
    out0 = jnp.zeros_like(x)
    # Sentinel decodes to a row > H-1+d0 -> empty box and no is_best match.
    sentinel = jnp.int32((H + d0 + 1) * w_p2)
    # Any two cells of one (d0+1)x(d1+1) tile mutually suppress, so this is a
    # tight static bound on the number of primaries per sample.
    max_iters = (-(-H // (d0 + 1))) * (-(-W // (d1 + 1)))

    def cond(carry):
        it, cont, _, _ = carry
        return jnp.logical_and(cont, it < max_iters)

    def body(carry):
        it, _, vals, out = carry
        # Per-sample max over the two leading (spatial) dims -> (1, 1, B) lane
        # vector; broadcasting it back against (H, W, B) is cheap vreg reuse.
        m = jnp.max(jnp.max(vals, axis=0, keepdims=True), axis=1, keepdims=True)
        alive = m > -jnp.inf                          # (1, 1, B)
        cand = vals >= m
        # Row-major tie-break: min flat id among candidates.
        best = jnp.where(cand, flat, sentinel)
        best = jnp.min(jnp.min(best, axis=0, keepdims=True), axis=1, keepdims=True)
        best = jnp.where(alive, best, sentinel)       # dead lanes -> no winner
        is_best = flat == best                        # (H, W, B), unique per lane
        bh = best >> shift                            # (1, 1, B)
        bw = best & (w_p2 - 1)
        rows = flat >> shift                          # re-derived per iteration so
        cols = flat & (w_p2 - 1)                      # only `flat` stays resident
        box = ((rows >= bh - d0) & (rows <= bh + d0)
               & (cols >= bw - d1) & (cols <= bw + d1))
        out = jnp.where(is_best, x, out)
        vals = jnp.where(box, -jnp.inf, vals)
        # Continue while any lane is still alive.  NaN lanes read as dead (only
        # their own primaries are dropped); they no longer stall other lanes.
        cont = jnp.max(jnp.where(alive, 1.0, 0.0)) > 0.0
        return it + 1, cont, vals, out

    carry0 = (jnp.int32(0), jnp.bool_(True), vals0, out0)
    _, _, _, out = lax.while_loop(cond, body, carry0)
    o_ref[...] = out                                  # lane-dense unmasked store


def _choose_block(n, h, w, itemsize):
    """Lane-samples per block + scoped-VMEM limit from the (8,128)-tiled footprint."""
    try:
        phys_vmem = int(pltpu.get_tpu_info().vmem_capacity_bytes)
    except Exception:
        phys_vmem = 64 << 20                 # v7x-safe fallback if the query fails
    w_pad = -(-w // 8) * 8                   # sublane padding of the W axis
    bytes_per_lane = h * w_pad * itemsize    # one lane-sample of one full-size array
    LIVE = 14                                # full-size arrays live at NMS-loop peak
    IO = 4                                   # double-buffered input + output blocks
    # Per-block budget: ~half of physical VMEM, capped (v5e/v6e 128 MiB -> 64 MiB,
    # v7x 64 MiB -> 32 MiB).
    budget = min(phys_vmem // 2, 64 << 20)
    cap = (budget // ((LIVE + IO) * bytes_per_lane)) // _LANES * _LANES
    cap = max(cap, _LANES)                   # lane axis cannot go below 128
    # Keep >= ~8 grid blocks once there is enough work so the v7x megacore
    # load-balances despite data-dependent trip counts; on single-TC v5e/v6e
    # the extra grid steps only cost ~0.35 us each.
    n_lanes = -(-n // _LANES) * _LANES
    want = max(_LANES, (n_lanes // 8) // _LANES * _LANES)
    bn = int(min(cap, want))
    est = (LIVE + IO) * bytes_per_lane * bn
    vmem_limit = int(min(max(2 * est, 32 << 20), max(phys_vmem - (8 << 20), 32 << 20)))
    return bn, vmem_limit


def extrema_2d_pallas(x, minimum_extrema_distance):
    """x: (N, 1, H, W) NCHW single-channel.  Returns (N, 1, H, W)."""
    N, C, H, W = x.shape
    assert C == 1, "the torch reference only supports a single channel"
    d0 = int(minimum_extrema_distance[0])
    d1 = int(minimum_extrema_distance[1])

    shift = max((W - 1).bit_length(), 1)     # row stride = next pow2(W)
    w_p2 = 1 << shift
    assert (H + d0 + 2) * w_p2 < 2 ** 31, "flat cell index would overflow int32"

    bn, vmem_limit = _choose_block(N, H, W, np.dtype(x.dtype).itemsize)
    n_pad = -(-N // bn) * bn

    # Batch onto the lane axis: (N, 1, H, W) -> (H, W, N).  Zero-padded samples
    # have no extrema, so they are inert inside the kernel.
    x3 = jnp.transpose(x[:, 0], (1, 2, 0))
    if n_pad != N:
        x3 = jnp.pad(x3, ((0, 0), (0, 0), (0, n_pad - N)))

    # Row-major cell ids, precomputed so the kernel needs no iota along the
    # untiled leading dim; rows/cols are re-derived in-kernel by shift/mask.
    flat = (jnp.arange(H, dtype=jnp.int32)[:, None] * w_p2
            + jnp.arange(W, dtype=jnp.int32)[None, :])[:, :, None]   # (H, W, 1)

    kernel = functools.partial(_extrema2d_kernel, d0=d0, d1=d1, shift=shift)
    out3 = pl.pallas_call(
        kernel,
        out_shape=jax.ShapeDtypeStruct((H, W, n_pad), x.dtype),
        grid=(n_pad // bn,),
        in_specs=[pl.BlockSpec((H, W, 1), lambda n: (0, 0, 0)),
                  pl.BlockSpec((H, W, bn), lambda n: (0, 0, n))],
        out_specs=pl.BlockSpec((H, W, bn), lambda n: (0, 0, n)),
        compiler_params=pltpu.CompilerParams(
            dimension_semantics=("parallel",),
            vmem_limit_bytes=vmem_limit),
    )(flat, x3)

    return jnp.transpose(out3[:, :, :N], (2, 0, 1))[:, None, :, :]


class Extrema2D:
    """JAX/Pallas counterpart of the torch module (no parameters)."""

    def __init__(self, minimum_extrema_distance):
        self.minimum_extrema_distance = minimum_extrema_distance

    def __call__(self, x):
        return extrema_2d_pallas(x, self.minimum_extrema_distance)


def _reference(xnp, d0, d1):
    """Pure-numpy replica of the torch greedy (row-major tie-break)."""
    n_, _, h_, w_ = xnp.shape
    res = np.zeros_like(xnp)
    for n in range(n_):
        x2 = xnp[n, 0]
        dx = x2[:, 1:] - x2[:, :-1]
        dy = x2[1:, :] - x2[:-1, :]
        dx_rg = np.pad(dx, ((0, 0), (0, 1))) > 0
        dx_ll = np.pad(dx, ((0, 0), (1, 0))) <= 0
        dy_rg = np.pad(dy, ((0, 1), (0, 0))) > 0
        dy_ll = np.pad(dy, ((1, 0), (0, 0))) <= 0
        sign = x2 <= 0
        ext = (dx_rg & dx_ll & dy_rg & dy_ll & sign) | (
            ~dx_rg & ~dx_ll & ~dy_rg & ~dy_ll & ~sign)
        active = ext.copy()
        while active.any():
            vals = np.where(active, np.abs(x2), -np.inf)
            r, c = np.unravel_index(np.argmax(vals), vals.shape)
            res[n, 0, r, c] = x2[r, c]
            active[max(0, r - d0):r + d0 + 1, max(0, c - d1):c + d1 + 1] = False
    return res


if __name__ == "__main__":
    key = jax.random.PRNGKey(0)
    N, C, H, W = 4, 1, 16, 16
    x = jax.random.normal(key, (N, C, H, W), dtype=jnp.float32)
    dist = [2, 2]

    module = Extrema2D(dist)
    out = jax.block_until_ready(module(x))

    assert out.shape == (N, C, H, W)
    assert out.dtype == x.dtype

    ref = _reference(np.asarray(x), dist[0], dist[1])
    assert np.array_equal(np.asarray(out), ref)
    print("KERNEL_OK")
</pallas_src>

<mosaic_0001>
module attributes {stable_mosaic.version = 11 : i64} {
  func.func @_extrema2d_kernel(%arg0: i32, %arg1: memref<16x16x1xi32, #tpu.memory_space<vmem>>, %arg2: memref<16x16x128xf32, #tpu.memory_space<vmem>>, %arg3: memref<16x16x128xf32, #tpu.memory_space<vmem>>) attributes {dimension_semantics = [#tpu.dimension_semantics<parallel>], iteration_bounds = array<i64: 1>, scalar_prefetch = 0 : i64, scratch_operands = 0 : i64, tpu.core_type = #tpu.core_type<tc>, window_params = [{pipeline_mode = #tpu.pipeline_mode<synchronous>, transform_indices = @transform_0, window_bounds = array<i64: 16, 16, 1>}, {transform_indices = @transform_1, window_bounds = array<i64: 16, 16, 128>}, {transform_indices = @transform_2, window_bounds = array<i64: 16, 16, 128>}]} {
    %c0 = arith.constant 0 : index
    %c0_0 = arith.constant 0 : index
    %c0_1 = arith.constant 0 : index
    %0 = vector.load %arg2[%c0, %c0_0, %c0_1] : memref<16x16x128xf32, #tpu.memory_space<vmem>>, vector<16x16x128xf32>
    %c0_2 = arith.constant 0 : index
    %c0_3 = arith.constant 0 : index
    %c0_4 = arith.constant 0 : index
    %1 = vector.load %arg1[%c0_2, %c0_3, %c0_4] : memref<16x16x1xi32, #tpu.memory_space<vmem>>, vector<16x16x1xi32>
    %cst = arith.constant 0.000000e+00 : f32
    %2 = vector.broadcast %cst : f32 to vector<1x16x128xf32>
    %3 = vector.extract_strided_slice %0 {offsets = [1, 0, 0], sizes = [15, 16, 128], strides = [1, 1, 1]} : vector<16x16x128xf32> to vector<15x16x128xf32>
    %4 = vector.extract_strided_slice %0 {offsets = [0, 0, 0], sizes = [15, 16, 128], strides = [1, 1, 1]} : vector<16x16x128xf32> to vector<15x16x128xf32>
    %5 = arith.subf %3, %4 : vector<15x16x128xf32>
    %6 = tpu.concatenate %5, %2 in 0 : vector<15x16x128xf32>, vector<1x16x128xf32> -> vector<16x16x128xf32>
    %cst_5 = arith.constant 0.000000e+00 : f32
    %7 = vector.broadcast %cst_5 : f32 to vector<16x16x128xf32>
    %8 = arith.cmpf ogt, %6, %7 : vector<16x16x128xf32>
    %9 = tpu.concatenate %2, %5 in 0 : vector<1x16x128xf32>, vector<15x16x128xf32> -> vector<16x16x128xf32>
    %cst_6 = arith.constant 0.000000e+00 : f32
    %10 = vector.broadcast %cst_6 : f32 to vector<16x16x128xf32>
    %11 = arith.cmpf ole, %9, %10 : vector<16x16x128xf32>
    %cst_7 = arith.constant 0.000000e+00 : f32
    %12 = vector.broadcast %cst_7 : f32 to vector<16x1x128xf32>
    %13 = vector.extract_strided_slice %0 {offsets = [0, 1, 0], sizes = [16, 15, 128], strides = [1, 1, 1]} : vector<16x16x128xf32> to vector<16x15x128xf32>
    %14 = vector.extract_strided_slice %0 {offsets = [0, 0, 0], sizes = [16, 15, 128], strides = [1, 1, 1]} : vector<16x16x128xf32> to vector<16x15x128xf32>
    %15 = arith.subf %13, %14 : vector<16x15x128xf32>
    %16 = tpu.concatenate %15, %12 in 1 : vector<16x15x128xf32>, vector<16x1x128xf32> -> vector<16x16x128xf32>
    %cst_8 = arith.constant 0.000000e+00 : f32
    %17 = vector.broadcast %cst_8 : f32 to vector<16x16x128xf32>
    %18 = arith.cmpf ogt, %16, %17 : vector<16x16x128xf32>
    %19 = tpu.concatenate %12, %15 in 1 : vector<16x1x128xf32>, vector<16x15x128xf32> -> vector<16x16x128xf32>
    %cst_9 = arith.constant 0.000000e+00 : f32
    %20 = vector.broadcast %cst_9 : f32 to vector<16x16x128xf32>
    %21 = arith.cmpf ole, %19, %20 : vector<16x16x128xf32>
    %cst_10 = arith.constant 0.000000e+00 : f32
    %22 = vector.broadcast %cst_10 : f32 to vector<16x16x128xf32>
    %23 = arith.cmpf ole, %0, %22 : vector<16x16x128xf32>
    %24 = arith.andi %18, %21 : vector<16x16x128xi1>
    %25 = arith.andi %24, %8 : vector<16x16x128xi1>
    %26 = arith.andi %25, %11 : vector<16x16x128xi1>
    %27 = arith.andi %26, %23 : vector<16x16x128xi1>
    %28 = arith.ori %18, %21 : vector<16x16x128xi1>
    %29 = arith.ori %28, %8 : vector<16x16x128xi1>
    %30 = arith.ori %29, %11 : vector<16x16x128xi1>
    %31 = arith.ori %30, %23 : vector<16x16x128xi1>
    %cst_11 = arith.constant dense<true> : vector<16x16x128xi1>
    %32 = arith.xori %31, %cst_11 : vector<16x16x128xi1>
    %33 = arith.ori %32, %27 : vector<16x16x128xi1>
    %34 = math.absf %0 : vector<16x16x128xf32>
    %cst_12 = arith.constant 0xFF800000 : f32
    %35 = vector.broadcast %cst_12 : f32 to vector<16x16x128xf32>
    %36 = arith.select %33, %34, %35 : vector<16x16x128xi1>, vector<16x16x128xf32>
    %cst_13 = arith.constant 0.000000e+00 : f32
    %37 = vector.broadcast %cst_13 : f32 to vector<16x16x128xf32>
    %c304_i32 = arith.constant 304 : i32
    %c0_i32 = arith.constant 0 : i32
    %true = arith.constant true
    %38:4 = scf.while (%arg4 = %c0_i32, %arg5 = %true, %arg6 = %36, %arg7 = %37) : (i32, i1, vector<16x16x128xf32>, vector<16x16x128xf32>) -> (i32, i1, vector<16x16x128xf32>, vector<16x16x128xf32>) {
      %c36_i32 = arith.constant 36 : i32
      %40 = arith.cmpi slt, %arg4, %c36_i32 : i32
      %41 = arith.andi %arg5, %40 : i1
      scf.condition(%41) %arg4, %arg5, %arg6, %arg7 : i32, i1, vector<16x16x128xf32>, vector<16x16x128xf32>
    } do {
    ^bb0(%arg4: i32, %arg5: i1, %arg6: vector<16x16x128xf32>, %arg7: vector<16x16x128xf32>):
      %cst_17 = arith.constant dense<0xFF800000> : vector<16x128xf32>
      %40 = vector.multi_reduction <maximumf>, %arg6, %cst_17 [0] : vector<16x16x128xf32> to vector<16x128xf32>
      %41 = vector.shape_cast %40 : vector<16x128xf32> to vector<1x16x128xf32>
      %cst_18 = arith.constant dense<0xFF800000> : vector<1x128xf32>
      %42 = vector.multi_reduction <maximumf>, %41, %cst_18 [1] : vector<1x16x128xf32> to vector<1x128xf32>
      %43 = vector.shape_cast %42 : vector<1x128xf32> to vector<1x1x128xf32>
      %cst_19 = arith.constant 0xFF800000 : f32
      %44 = vector.broadcast %cst_19 : f32 to vector<1x1x128xf32>
      %45 = arith.cmpf ogt, %43, %44 : vector<1x1x128xf32>
      %46 = vector.broadcast %43 : vector<1x1x128xf32> to vector<16x16x128xf32>
      %47 = arith.cmpf oge, %arg6, %46 : vector<16x16x128xf32>
      %48 = vector.shape_cast %1 : vector<16x16x1xi32> to vector<16x16x1xi32>
      %49 = vector.broadcast %48 : vector<16x16x1xi32> to vector<16x16x128xi32>
      %50 = vector.broadcast %c304_i32 : i32 to vector<16x16x128xi32>
      %51 = arith.select %47, %49, %50 : vector<16x16x128xi1>, vector<16x16x128xi32>
      %cst_20 = arith.constant dense<2147483647> : vector<16x128xi32>
      %52 = vector.multi_reduction <minsi>, %51, %cst_20 [0] : vector<16x16x128xi32> to vector<16x128xi32>
      %53 = vector.shape_cast %52 : vector<16x128xi32> to vector<1x16x128xi32>
      %cst_21 = arith.constant dense<2147483647> : vector<1x128xi32>
      %54 = vector.multi_reduction <minsi>, %53, %cst_21 [1] : vector<1x16x128xi32> to vector<1x128xi32>
      %55 = vector.shape_cast %54 : vector<1x128xi32> to vector<1x1x128xi32>
      %56 = vector.broadcast %c304_i32 : i32 to vector<1x1x128xi32>
      %57 = arith.select %45, %55, %56 : vector<1x1x128xi1>, vector<1x1x128xi32>
      %58 = vector.broadcast %1 : vector<16x16x1xi32> to vector<16x16x128xi32>
      %59 = vector.broadcast %57 : vector<1x1x128xi32> to vector<16x16x128xi32>
      %60 = arith.cmpi eq, %58, %59 : vector<16x16x128xi32>
      %c4_i32 = arith.constant 4 : i32
      %61 = vector.broadcast %c4_i32 : i32 to vector<1x1x128xi32>
      %62 = arith.shrsi %57, %61 : vector<1x1x128xi32>
      %c15_i32 = arith.constant 15 : i32
      %63 = vector.broadcast %c15_i32 : i32 to vector<1x1x128xi32>
      %64 = arith.andi %57, %63 : vector<1x1x128xi32>
      %c4_i32_22 = arith.constant 4 : i32
      %65 = vector.broadcast %c4_i32_22 : i32 to vector<16x16x1xi32>
      %66 = arith.shrsi %1, %65 : vector<16x16x1xi32>
      %c15_i32_23 = arith.constant 15 : i32
      %67 = vector.broadcast %c15_i32_23 : i32 to vector<16x16x1xi32>
      %68 = arith.andi %1, %67 : vector<16x16x1xi32>
      %c2_i32 = arith.constant 2 : i32
      %69 = vector.broadcast %c2_i32 : i32 to vector<1x1x128xi32>
      %70 = arith.subi %62, %69 : vector<1x1x128xi32>
      %71 = vector.broadcast %66 : vector<16x16x1xi32> to vector<16x16x128xi32>
      %72 = vector.broadcast %70 : vector<1x1x128xi32> to vector<16x16x128xi32>
      %73 = arith.cmpi sge, %71, %72 : vector<16x16x128xi32>
      %c2_i32_24 = arith.constant 2 : i32
      %74 = vector.broadcast %c2_i32_24 : i32 to vector<1x1x128xi32>
      %75 = arith.addi %62, %74 : vector<1x1x128xi32>
      %76 = vector.broadcast %66 : vector<16x16x1xi32> to vector<16x16x128xi32>
      %77 = vector.broadcast %75 : vector<1x1x128xi32> to vector<16x16x128xi32>
      %78 = arith.cmpi sle, %76, %77 : vector<16x16x128xi32>
      %79 = arith.andi %73, %78 : vector<16x16x128xi1>
      %c2_i32_25 = arith.constant 2 : i32
      %80 = vector.broadcast %c2_i32_25 : i32 to vector<1x1x128xi32>
      %81 = arith.subi %64, %80 : vector<1x1x128xi32>
      %82 = vector.broadcast %68 : vector<16x16x1xi32> to vector<16x16x128xi32>
      %83 = vector.broadcast %81 : vector<1x1x128xi32> to vector<16x16x128xi32>
      %84 = arith.cmpi sge, %82, %83 : vector<16x16x128xi32>
      %85 = arith.andi %79, %84 : vector<16x16x128xi1>
      %c2_i32_26 = arith.constant 2 : i32
      %86 = vector.broadcast %c2_i32_26 : i32 to vector<1x1x128xi32>
      %87 = arith.addi %64, %86 : vector<1x1x128xi32>
      %88 = vector.broadcast %68 : vector<16x16x1xi32> to vector<16x16x128xi32>
      %89 = vector.broadcast %87 : vector<1x1x128xi32> to vector<16x16x128xi32>
      %90 = arith.cmpi sle, %88, %89 : vector<16x16x128xi32>
      %91 = arith.andi %85, %90 : vector<16x16x128xi1>
      %92 = arith.select %60, %0, %arg7 : vector<16x16x128xi1>, vector<16x16x128xf32>
      %cst_27 = arith.constant 0xFF800000 : f32
      %93 = vector.broadcast %cst_27 : f32 to vector<16x16x128xf32>
      %94 = arith.select %91, %93, %arg6 : vector<16x16x128xi1>, vector<16x16x128xf32>
      %cst_28 = arith.constant 1.000000e+00 : f32
      %cst_29 = arith.constant 0.000000e+00 : f32
      %95 = vector.broadcast %cst_28 : f32 to vector<1x1x128xf32>
      %96 = vector.broadcast %cst_29 : f32 to vector<1x1x128xf32>
      %97 = arith.select %45, %95, %96 : vector<1x1x128xi1>, vector<1x1x128xf32>
      %98 = vector.shape_cast %97 : vector<1x1x128xf32> to vector<1x1x1x128xf32>
      %cst_30 = arith.constant dense<0xFF800000> : vector<1xf32>
      %99 = vector.multi_reduction <maximumf>, %98, %cst_30 [1, 2, 3] : vector<1x1x1x128xf32> to vector<1xf32>
      %100 = vector.shape_cast %99 : vector<1xf32> to vector<1x1x1x1xf32>
      %101 = vector.extract %100[0, 0, 0, 0] : f32 from vector<1x1x1x1xf32>
      %cst_31 = arith.constant 0.000000e+00 : f32
      %102 = arith.cmpf ogt, %101, %cst_31 : f32
      %c1_i32 = arith.constant 1 : i32
      %103 = arith.addi %arg4, %c1_i32 : i32
      scf.yield %103, %102, %94, %92 : i32, i1, vector<16x16x128xf32>, vector<16x16x128xf32>
    }
    %c0_14 = arith.constant 0 : index
    %c0_15 = arith.constant 0 : index
    %c0_16 = arith.constant 0 : index
    %39 = vector.load %arg3[%c0_14, %c0_15, %c0_16] : memref<16x16x128xf32, #tpu.memory_space<vmem>>, vector<16x16x128xf32>
    tpu.vector_store %arg3[%c0_14, %c0_15, %c0_16], %38#3 {strides = array<i32>} : memref<16x16x128xf32, #tpu.memory_space<vmem>>, vector<16x16x128xf32>,
    return
  }
  func.func @transform_0(%arg0: i32) -> (i32, i32, i32) {
    %c0_i32 = arith.constant 0 : i32
    %c0_i32_0 = arith.constant 0 : i32
    %c0_i32_1 = arith.constant 0 : i32
    %c0_i32_2 = arith.constant 0 : i32
    return %c0_i32, %c0_i32_0, %c0_i32_1 : i32, i32, i32
  }
  func.func @transform_1(%arg0: i32) -> (i32, i32, i32) {
    %c0_i32 = arith.constant 0 : i32
    %c0_i32_0 = arith.constant 0 : i32
    %c0_i32_1 = arith.constant 0 : i32
    return %c0_i32, %c0_i32_0, %arg0 : i32, i32, i32
  }
  func.func @transform_2(%arg0: i32) -> (i32, i32, i32) {
    %c0_i32 = arith.constant 0 : i32
    %c0_i32_0 = arith.constant 0 : i32
    %c0_i32_1 = arith.constant 0 : i32
    return %c0_i32, %c0_i32_0, %arg0 : i32, i32, i32
  }
}

</mosaic_0001>

<bundles_post_ra>
// kernel: tpu_custom_call.1
= control target key start
LH: loop header
LB: loop body
LE: loop exit
PB: predicated region body
PF: predicated region fallthrough
CT: control target
= control target key end

     0   :  { %7 = vsyncpa [#allocation3], 0  ;;  %vm8776_vm0 = vcmask 1040384   ;;  %vm8769_vm1 = vcmask 1046528   ;;  %s8631_s0 = inlined_call_operand.vmem [shape: s32[16,16,1], index: 0, kind: input, shape index: {}]   ;;  %s8632_s1 = inlined_call_operand.vmem [shape: f32[16,16,128], index: 1, kind: input, shape index: {}]   ;;  %s8633_s2 = inlined_call_operand.hbm [shape: f32[16,16,128], index: 2, kind: output, shape index: {}]  }
   0x1   :  { %v3252_v0 = vld [vmem:[%s8631_s0] sm:$0xff]  ;;  %v3257_v1 = vld [vmem:[%s8631_s0 + $0x8] sm:$0xff]  ;;  %v3262_v2 = vld [vmem:[%s8631_s0 + $0x10] sm:$0xff] }
   0x2   :  { %9055 = vst [vmem:[#allocation5_spill] sm:$0xff] %v3252_v0  ;;  %v3267_v3 = vld [vmem:[%s8631_s0 + $0x18] sm:$0xff]  ;;  %v3272_v4 = vld [vmem:[%s8631_s0 + $0x20] sm:$0xff]  ;;  %v3277_v5 = vld [vmem:[%s8631_s0 + $0x28] sm:$0xff] }
   0x3   :  { %9056 = vst [vmem:[#allocation6_spill] sm:$0xff] %v3257_v1  ;;  %v3282_v6 = vld [vmem:[%s8631_s0 + $0x30] sm:$0xff]  ;;  %v3287_v7 = vld [vmem:[%s8631_s0 + $0x38] sm:$0xff]  ;;  %v3292_v8 = vld [vmem:[%s8631_s0 + $0x40] sm:$0xff] }
   0x4   :  { %9057 = vst [vmem:[#allocation7_spill] sm:$0xff] %v3262_v2  ;;  %v3297_v9 = vld [vmem:[%s8631_s0 + $0x48] sm:$0xff]  ;;  %v3302_v10 = vld [vmem:[%s8631_s0 + $0x50] sm:$0xff]  ;;  %v3307_v11 = vld [vmem:[%s8631_s0 + $0x58] sm:$0xff] }
   0x5   :  { %9058 = vst [vmem:[#allocation8_spill] sm:$0xff] %v3267_v3  ;;  %v3312_v12 = vld [vmem:[%s8631_s0 + $0x60] sm:$0xff]  ;;  %v3317_v13 = vld [vmem:[%s8631_s0 + $0x68] sm:$0xff]  ;;  %v3322_v14 = vld [vmem:[%s8631_s0 + $0x70] sm:$0xff] }
   0x6   :  { %9059 = vst [vmem:[#allocation9_spill] sm:$0xff] %v3272_v4  ;;  %v3327_v15 = vld [vmem:[%s8631_s0 + $0x78] sm:$0xff]  ;;  %v3332_v16 = vld [vmem:[%s8631_s0 + $0x80] sm:$0xff]  ;;  %v3337_v17 = vld [vmem:[%s8631_s0 + $0x88] sm:$0xff] }
   0x7   :  { %9060 = vst [vmem:[#allocation10_spill] sm:$0xff] %v3277_v5  ;;  %v3342_v18 = vld [vmem:[%s8631_s0 + $0x90] sm:$0xff]  ;;  %v3347_v19 = vld [vmem:[%s8631_s0 + $0x98] sm:$0xff]  ;;  %v3352_v20 = vld [vmem:[%s8631_s0 + $0xa0] sm:$0xff] }
   0x8   :  { %9061 = vst [vmem:[#allocation11_spill] sm:$0xff] %v3282_v6  ;;  %v3357_v21 = vld [vmem:[%s8631_s0 + $0xa8] sm:$0xff]  ;;  %v3362_v22 = vld [vmem:[%s8631_s0 + $0xb0] sm:$0xff]  ;;  %v3367_v23 = vld [vmem:[%s8631_s0 + $0xb8] sm:$0xff] }
   0x9   :  { %9062 = vst [vmem:[#allocation12_spill] sm:$0xff] %v3287_v7  ;;  %v3372_v24 = vld [vmem:[%s8631_s0 + $0xc0] sm:$0xff]  ;;  %v3377_v25 = vld [vmem:[%s8631_s0 + $0xc8] sm:$0xff]  ;;  %v3382_v26 = vld [vmem:[%s8631_s0 + $0xd0] sm:$0xff] }
   0xa   :  { %9063 = vst [vmem:[#allocation13_spill] sm:$0xff] %v3292_v8  ;;  %v3387_v27 = vld [vmem:[%s8631_s0 + $0xd8] sm:$0xff]  ;;  %v3392_v28 = vld [vmem:[%s8631_s0 + $0xe0] sm:$0xff]  ;;  %v3397_v29 = vld [vmem:[%s8631_s0 + $0xe8] sm:$0xff] }
   0xb   :  { %9064 = vst [vmem:[#allocation14_spill] sm:$0xff] %v3297_v9  ;;  %v3402_v30 = vld [vmem:[%s8631_s0 + $0xf0] sm:$0xff]  ;;  %v3407_v31 = vld [vmem:[%s8631_s0 + $0xf8] sm:$0xff]  ;;  %v3412_v32 = vld [vmem:[%s8632_s1] sm:$0xff] }
   0xc   :  { %9065 = vst [vmem:[#allocation15_spill] sm:$0xff] %v3302_v10  ;;  %v3417_v33 = vld [vmem:[%s8632_s1 + $0x8] sm:$0xff]  ;;  %v3422_v34 = vld [vmem:[%s8632_s1 + $0x10] sm:$0xff]  ;;  %v201_v35 = vrot.slane %v3412_v32, 7  ;;  %v3429_v37 = vld [vmem:[%s8632_s1 + $0x18] sm:$0xff] }
   0xd   :  { %9066 = vst [vmem:[#allocation16_spill] sm:$0xff] %v3307_v11  ;;  %v202_v36 = vrot.slane %v3417_v33, 7  ;;  %v3434_v38 = vld [vmem:[%s8632_s1 + $0x20] sm:$0xff]  ;;  %v3439_v39 = vld [vmem:[%s8632_s1 + $0x28] sm:$0xff]  ;;  %v3444_v40 = vld [vmem:[%s8632_s1 + $0x30] sm:$0xff]  ;;  %v3453_v42 = vsub.f32 %v3422_v34, %v3412_v32  ;;  %v3472_v46 = vsub.f32 %v3429_v37, %v3417_v33  ;;  %v204_v49 = vrot.slane %v3422_v34, 7 }
   0xe   :  { %9067 = vst [vmem:[#allocation17_spill] sm:$0xff] %v3312_v12  ;;  %v3449_v41 = vld [vmem:[%s8632_s1 + $0x38] sm:$0xff]  ;;  %v3458_v43 = vld [vmem:[%s8632_s1 + $0x40] sm:$0xff]  ;;  %v3463_v44 = vld [vmem:[%s8632_s1 + $0x48] sm:$0xff]  ;;  %v3476_v47 = vsub.f32 %v3434_v38, %v3422_v34  ;;  %v3480_v48 = vsub.f32 %v3439_v39, %v3429_v37  ;;  %v3500_v53 = vsub.f32 %v3444_v40, %v3434_v38  ;;  %v3634_v10 = vsub.f32 %v3412_v32, %v201_v35 }
   0xf   :  { %9068 = vst [vmem:[#allocation18_spill] sm:$0xff] %v3317_v13  ;;  %v3468_v45 = vld [vmem:[%s8632_s1 + $0x50] sm:$0xff]  ;;  %v3486_v50 = vld [vmem:[%s8632_s1 + $0x58] sm:$0xff]  ;;  %v3491_v51 = vld [vmem:[%s8632_s1 + $0x60] sm:$0xff]  ;;  %v3504_v54 = vsub.f32 %v3449_v41, %v3439_v39  ;;  %v3508_v55 = vsub.f32 %v3458_v43, %v3444_v40  ;;  %v203_v56 = vsel %vm8776_vm0, %v201_v35, %v202_v36  ;;  %v3528_v60 = vsub.f32 %v3463_v44, %v3449_v41 }
  0x10   :  { %9069 = vst [vmem:[#allocation19_spill] sm:$0xff] %v3322_v14  ;;  %v3496_v52 = vld [vmem:[%s8632_s1 + $0x68] sm:$0xff]  ;;  %v3514_v57 = vld [vmem:[%s8632_s1 + $0x70] sm:$0xff]  ;;  %v3519_v58 = vld [vmem:[%s8632_s1 + $0x78] sm:$0xff]  ;;  %v3532_v61 = vsub.f32 %v3468_v45, %v3458_v43  ;;  %v3536_v62 = vsub.f32 %v3486_v50, %v3463_v44  ;;  %v3540_v63 = vsub.f32 %v3491_v51, %v3468_v45  ;;  %v210_v11 = vrot.slane %v3444_v40, 7 }
  0x11   :  { %9070 = vst [vmem:[#allocation20_spill] sm:$0xff] %v3327_v15  ;;  %v3524_v59 = vld [vmem:[%s8632_s1 + $0x80] sm:$0xff]  ;;  %v3545_v36 = vld [vmem:[%s8632_s1 + $0x88] sm:$0xff]  ;;  %v211_v6 = vrot.slane %v3449_v41, 7  ;;  %v3639_v7 = vsub.f32 %v3417_v33, %v203_v56  ;;  %v3642_v8 = vsub.f32 %v3422_v34, %v204_v49  ;;  %v9139_v35 = vrot.slane %v3434_v38, 7  ;;  %v3658_v56 = vld [vmem:[%s8632_s1 + $0xd0] sm:$0xff] }
  0x12   :  { %9071 = vst [vmem:[#allocation21_spill] sm:$0xff] %v3332_v16  ;;  %v3603_v15 = vld [vmem:[%s8632_s1 + $0xc0] sm:$0xff]  ;;  %v3647_v1 = vld [vmem:[%s8632_s1 + $0xc8] sm:$0xff]  ;;  %v213_v5 = vrot.slane %v3458_v43, 7  ;;  %v214_v0 = vrot.slane %v3463_v44, 7 }
  0x13   :  { %9072 = vst [vmem:[#allocation22_spill] sm:$0xff] %v3337_v17  ;;  %v3672_v2 = vld [vmem:[%s8632_s1 + $0xe0] sm:$0xff]  ;;  %v3677_v4 = vld [vmem:[%s8632_s1 + $0xe8] sm:$0xff] }
  0x14   :  { %9073 = vst [vmem:[#allocation23_spill] sm:$0xff] %v3342_v18  ;;  %v208_v18 = vrot.slane %v3439_v39, 7 }
  0x15   :  { %9074 = vst [vmem:[#allocation24_spill] sm:$0xff] %v3347_v19  ;;  %v3593_v19 = vld [vmem:[%s8632_s1 + $0xb0] sm:$0xff] }
  0x16   :  { %9075 = vst [vmem:[#allocation25_spill] sm:$0xff] %v3352_v20  ;;  %v3598_v20 = vld [vmem:[%s8632_s1 + $0xb8] sm:$0xff]  ;;  %v3631_v9 = vsub.f32 %v3603_v15, %v3593_v19 }
  0x17   :  { %9076 = vst [vmem:[#allocation26_spill] sm:$0xff] %v3357_v21  ;;  %v3585_v21 = vsub.f32 %v3545_v36, %v3519_v58 }
  0x18   :  { %9077 = vst [vmem:[#allocation27_spill] sm:$0xff] %v3362_v22  ;;  %v205_v22 = vrot.slane %v3429_v37, 7 }
  0x19   :  { %9078 = vst [vmem:[#allocation28_spill] sm:$0xff] %v3367_v23 }
  0x1a   :  { %9079 = vst [vmem:[#allocation29_spill] sm:$0xff] %v3372_v24  ;;  %v3571_v24 = vld [vmem:[%s8632_s1 + $0x98] sm:$0xff]  ;;  %v206_v3 = vsel %vm8776_vm0, %v204_v49, %v205_v22  ;;  %v216_v22 = vrot.slane %v3468_v45, 7  ;;  %v217_v49 = vrot.slane %v3486_v50, 7 }
  0x1b   :  { %9080 = vst [vmem:[#allocation30_spill] sm:$0xff] %v3377_v25  ;;  %v3576_v25 = vld [vmem:[%s8632_s1 + $0xa0] sm:$0xff]  ;;  %v3611_v16 = vsub.f32 %v3571_v24, %v3545_v36 }
  0x1c   :  { %9081 = vst [vmem:[#allocation31_spill] sm:$0xff] %v3382_v26  ;;  %v3581_v26 = vld [vmem:[%s8632_s1 + $0xa8] sm:$0xff]  ;;  %v3623_v13 = vsub.f32 %v3593_v19, %v3576_v25 }
  0x1d   :  { %9082 = vst [vmem:[#allocation32_spill] sm:$0xff] %v3387_v27  ;;  %v3558_v27 = vsub.f32 %v3514_v57, %v3491_v51  ;;  %v3619_v12 = vsub.f32 %v3581_v26, %v3571_v24  ;;  %v3627_v14 = vsub.f32 %v3598_v20, %v3581_v26 }
  0x1e   :  { %9083 = vst [vmem:[#allocation33_spill] sm:$0xff] %v3392_v28  ;;  %v3562_v28 = vsub.f32 %v3519_v58, %v3496_v52 }
  0x1f   :  { %9084 = vst [vmem:[#allocation34_spill] sm:$0xff] %v3397_v29  ;;  %v3566_v29 = vsub.f32 %v3524_v59, %v3514_v57 }
  0x20   :  { %9085 = vst [vmem:[#allocation35_spill] sm:$0xff] %v3402_v30  ;;  %v3550_v30 = vld [vmem:[%s8632_s1 + $0x90] sm:$0xff] }
  0x21   :  { %9086 = vst [vmem:[#allocation36_spill] sm:$0xff] %v3407_v31  ;;  %v3554_v31 = vsub.f32 %v3496_v52, %v3486_v50  ;;  %v3607_v23 = vsub.f32 %v3550_v30, %v3524_v59  ;;  %v3615_v17 = vsub.f32 %v3576_v25, %v3550_v30 }
  0x22   :  { %9087 = vst [vmem:[#allocation37_spill] sm:$0xff] %v3412_v32  ;;  %v209_v32 = vsel %vm8776_vm0, %v9139_v35, %v208_v18  ;;  %v219_v18 = vrot.slane %v3491_v51, 7  ;;  %v220_v35 = vrot.slane %v3496_v52, 7 }
  0x23   :  { %9088 = vst [vmem:[#allocation38_spill] sm:$0xff] %v3417_v33  ;;  %v3663_v33 = vld [vmem:[%s8632_s1 + $0xd8] sm:$0xff] }
  0x24   :  { %9089 = vst [vmem:[#allocation39_spill] sm:$0xff] %v3422_v34  ;;  %v222_v34 = vrot.slane %v3514_v57, 7 }
  0x25   :  { %9090 = vst [vmem:[#allocation40_spill] sm:$0xff] %v3429_v37 }
  0x26   :  { %9091 = vst [vmem:[#allocation41_spill] sm:$0xff] %v3434_v38 }
  0x27   :  { %9092 = vst [vmem:[#allocation42_spill] sm:$0xff] %v3439_v39 }
  0x28   :  { %9093 = vst [vmem:[#allocation43_spill] sm:$0xff] %v3444_v40 }
  0x29   :  { %9094 = vst [vmem:[#allocation44_spill] sm:$0xff] %v3449_v41 }
  0x2a   :  { %9095 = vst [vmem:[#allocation45_spill] sm:$0xff] %v3453_v42  ;;  %v235_v42 = vrot.slane %v3598_v20, 7 }
  0x2b   :  { %9096 = vst [vmem:[#allocation46_spill] sm:$0xff] %v3458_v43 }
  0x2c   :  { %9097 = vst [vmem:[#allocation47_spill] sm:$0xff] %v3463_v44 }
  0x2d   :  { %9098 = vst [vmem:[#allocation48_spill] sm:$0xff] %v3468_v45 }
  0x2e   :  { %9099 = vst [vmem:[#allocation49_spill] sm:$0xff] %v3472_v46  ;;  %v232_v46 = vrot.slane %v3581_v26, 7 }
  0x2f   :  { %9100 = vst [vmem:[#allocation50_spill] sm:$0xff] %v3476_v47  ;;  %v221_v47 = vsel %vm8776_vm0, %v219_v18, %v220_v35  ;;  %v9146_v35 = vrot.slane %v3434_v38, 7 }
  0x30   :  { %9101 = vst [vmem:[#allocation51_spill] sm:$0xff] %v3480_v48  ;;  %v218_v48 = vsel %vm8776_vm0, %v216_v22, %v217_v49  ;;  %v3720_v49 = vsub.f32 %v3429_v37, %v206_v3 }
  0x31   :  { %9102 = vst [vmem:[#allocation52_spill] sm:$0xff] %v3486_v50 }
  0x32   :  { %9103 = vst [vmem:[#allocation53_spill] sm:$0xff] %v3491_v51  ;;  %vm8747_vm5 = vcmp.le.f32.partialorder %v3720_v49, 0.0 }
  0x33   :  { %9104 = vst [vmem:[#allocation54_spill] sm:$0xff] %v3496_v52 }
  0x34   :  { %9105 = vst [vmem:[#allocation55_spill] sm:$0xff] %v3500_v53 }
  0x35   :  { %9106 = vst [vmem:[#allocation56_spill] sm:$0xff] %v3504_v54 }
  0x36   :  { %9107 = vst [vmem:[#allocation57_spill] sm:$0xff] %v3508_v55  ;;  %v215_v55 = vsel %vm8776_vm0, %v213_v5, %v214_v0 }
  0x37   :  { %9108 = vst [vmem:[#allocation58_spill] sm:$0xff] %v3514_v57  ;;  %v3741_v3 = vsub.f32 %v3463_v44, %v215_v55 }
  0x38   :  { %9109 = vst [vmem:[#allocation59_spill] sm:$0xff] %v3519_v58 }
  0x39   :  { %9110 = vst [vmem:[#allocation60_spill] sm:$0xff] %v3524_v59 }
  0x3a   :  { %9111 = vst [vmem:[#allocation61_spill] sm:$0xff] %v3528_v60  ;;  %v212_v60 = vsel %vm8776_vm0, %v210_v11, %v211_v6 }
  0x3b   :  { %9112 = vst [vmem:[#allocation62_spill] sm:$0xff] %v3532_v61  ;;  %v244_v61 = vrot.slane %v3677_v4, 7 }
  0x3c   :  { %9113 = vst [vmem:[#allocation63_spill] sm:$0xff] %v3536_v62  ;;  %v243_v62 = vrot.slane %v3672_v2, 7 }
  0x3d   :  { %9114 = vst [vmem:[#allocation64_spill] sm:$0xff] %v3540_v63  ;;  %v241_v63 = vrot.slane %v3663_v33, 7 }
  0x3e   :  { %9115 = vst [vmem:[#allocation65_spill] sm:$0xff] %v3545_v36 }
  0x3f   :  { %9116 = vst [vmem:[#allocation66_spill] sm:$0xff] %v3550_v30 }
  0x40   :  { %9117 = vst [vmem:[#allocation67_spill] sm:$0xff] %v3554_v31  ;;  %v240_v31 = vrot.slane %v3658_v56, 7 }
  0x41   :  { %9118 = vst [vmem:[#allocation68_spill] sm:$0xff] %v3558_v27  ;;  %v238_v27 = vrot.slane %v3647_v1, 7 }
  0x42   :  { %9119 = vst [vmem:[#allocation69_spill] sm:$0xff] %v3562_v28  ;;  %v237_v28 = vrot.slane %v3603_v15, 7 }
  0x43   :  { %9120 = vst [vmem:[#allocation70_spill] sm:$0xff] %v3566_v29  ;;  %v234_v29 = vrot.slane %v3593_v19, 7 }
  0x44   :  { %9121 = vst [vmem:[#allocation71_spill] sm:$0xff] %v3571_v24  ;;  %v239_v0 = vsel %vm8776_vm0, %v237_v28, %v238_v27  ;;  %v3735_v27 = vsub.f32 %v3449_v41, %v212_v60  ;;  %v3756_v60 = vsub.f32 %v3514_v57, %v222_v34 }
  0x45   :  { %9122 = vst [vmem:[#allocation72_spill] sm:$0xff] %v3576_v25  ;;  %v236_v6 = vsel %vm8776_vm0, %v234_v29, %v235_v42  ;;  %v3732_v42 = vsub.f32 %v3444_v40, %v210_v11  ;;  %v3753_v11 = vsub.f32 %v3496_v52, %v221_v47 }
  0x46   :  { %9123 = vst [vmem:[#allocation73_spill] sm:$0xff] %v3581_v26 }
  0x47   :  { %9124 = vst [vmem:[#allocation74_spill] sm:$0xff] %v3585_v21  ;;  %v231_v21 = vrot.slane %v3576_v25, 7 }
  0x48   :  { %9125 = vst [vmem:[#allocation75_spill] sm:$0xff] %v3593_v19 }
  0x49   :  { %9126 = vst [vmem:[#allocation76_spill] sm:$0xff] %v3598_v20  ;;  %v3774_v47 = vsub.f32 %v3576_v25, %v231_v21 }
  0x4a   :  { %9127 = vst [vmem:[#allocation77_spill] sm:$0xff] %v3603_v15 }
  0x4b   :  { %9128 = vst [vmem:[#allocation78_spill] sm:$0xff] %v3607_v23  ;;  %v229_v23 = vrot.slane %v3571_v24, 7 }
  0x4c   :  { %9129 = vst [vmem:[#allocation79_spill] sm:$0xff] %v3611_v16  ;;  %v228_v16 = vrot.slane %v3550_v30, 7 }
  0x4d   :  { %9130 = vst [vmem:[#allocation80_spill] sm:$0xff] %v3615_v17  ;;  %v3691_v17 = vld [vmem:[%s8632_s1 + $0xf8] sm:$0xff] }
  0x4e   :  { %9131 = vst [vmem:[#allocation81_spill] sm:$0xff] %v3619_v12  ;;  %v3686_v12 = vld [vmem:[%s8632_s1 + $0xf0] sm:$0xff]  ;;  %v247_v53 = vrot.slane %v3691_v17, 7 }
  0x4f   :  { %9132 = vst [vmem:[#allocation82_spill] sm:$0xff] %v3623_v13  ;;  %v226_v13 = vrot.slane %v3545_v36, 7  ;;  %v246_v54 = vrot.slane %v3686_v12, 7 }
  0x50   :  { %9133 = vst [vmem:[#allocation83_spill] sm:$0xff] %v3627_v14  ;;  %v225_v14 = vrot.slane %v3524_v59, 7 }
  0x51   :  { %9134 = vst [vmem:[#allocation84_spill] sm:$0xff] %v3631_v9  ;;  %v223_v9 = vrot.slane %v3519_v58, 7 }
  0x52   :  { %9135 = vst [vmem:[#allocation85_spill] sm:$0xff] %v3634_v10  ;;  %v230_v10 = vsel %vm8776_vm0, %v228_v16, %v229_v23  ;;  %v3729_v23 = vsub.f32 %v3439_v39, %v209_v32  ;;  %v3750_v32 = vsub.f32 %v3491_v51, %v219_v18  ;;  %v3762_v55 = vsub.f32 %v3524_v59, %v225_v14 }
  0x53   :  { %9136 = vst [vmem:[#allocation86_spill] sm:$0xff] %v3639_v7  ;;  %v227_v7 = vsel %vm8776_vm0, %v225_v14, %v226_v13  ;;  %v248_v13 = vsel %vm8776_vm0, %v246_v54, %v247_v53  ;;  %v3747_v53 = vsub.f32 %v3486_v50, %v218_v48  ;;  %v3768_v48 = vsub.f32 %v3550_v30, %v228_v16 }
  0x54   :  { %9137 = vst [vmem:[#allocation87_spill] sm:$0xff] %v3642_v8  ;;  %v224_v8 = vsel %vm8776_vm0, %v222_v34, %v223_v9  ;;  %v3725_v9 = vsub.f32 %v3434_v38, %v9146_v35  ;;  %v3783_v14 = vsub.f32 %v3598_v20, %v236_v6  ;;  %v3789_v16 = vsub.f32 %v3647_v1, %v239_v0  ;;  %v9187_v20 = vld [vmem:[#allocation61_spill] sm:$0xff] }
  0x55   :  { %9138 = vst [vmem:[#allocation88_spill] sm:$0xff] %v3647_v1  ;;  %v350_v0 = vrot.slane %v3720_v49, 1  ;;  %v364_v57 = vrot.slane %v3750_v32, 1  ;;  %v367_v51 = vrot.slane %v3756_v60, 1  ;;  %v370_v41 = vrot.slane %v3762_v55, 1  ;;  %v9184_v1 = vld [vmem:[#allocation57_spill] sm:$0xff] }
  0x56   :  { %9140 = vst [vmem:[#allocation89_spill] sm:$0xff] %v3658_v56  ;;  %vm8757_vm10 = vcmp.le.f32.partialorder %v3729_v23, 0.0 }
  0x57   :  { %9141 = vst [vmem:[#allocation90_spill] sm:$0xff] %v3663_v33  ;;  %v3865_v37 = vsel %vm8769_vm1, %v350_v0, 0.0 }
  0x58   :  { %9142 = vst [vmem:[#allocation91_spill] sm:$0xff] %v3672_v2  ;;  %vm8742_vm4 = vcmp.gt.f32.partialorder %v3865_v37, 0.0 }
  0x59   :  { %9143 = vst [vmem:[#allocation92_spill] sm:$0xff] %v3677_v4  ;;  %v233_v4 = vsel %vm8776_vm0, %v231_v21, %v232_v46  ;;  %v3738_v46 = vsub.f32 %v3458_v43, %v213_v5  ;;  %v3759_v5 = vsub.f32 %v3519_v58, %v224_v8  ;;  %v3780_v8 = vsub.f32 %v3593_v19, %v234_v29  ;;  %v9153_v6 = vld [vmem:[#allocation85_spill] sm:$0xff]  ;;  %vm3928_vm15 = vmor %vm8742_vm4, %vm8747_vm5 }
  0x5a   :  { %9144 = vst [vmem:[#allocation93_spill] sm:$0xff] %v3686_v12  ;;  %v242_v12 = vsel %vm8776_vm0, %v240_v31, %v241_v63  ;;  %v3765_v63 = vsub.f32 %v3545_v36, %v227_v7  ;;  %v3777_v34 = vsub.f32 %v3581_v26, %v233_v4  ;;  %v3786_v7 = vsub.f32 %v3603_v15, %v237_v28  ;;  %v9154_v19 = vld [vmem:[#allocation86_spill] sm:$0xff] }
  0x5b   :  { %9145 = vst [vmem:[#allocation94_spill] sm:$0xff] %v3691_v17  ;;  %v245_v17 = vsel %vm8776_vm0, %v243_v62, %v244_v61  ;;  %v3744_v61 = vsub.f32 %v3468_v45, %v216_v22  ;;  %v3771_v22 = vsub.f32 %v3571_v24, %v230_v10  ;;  %v3792_v10 = vsub.f32 %v3658_v56, %v240_v31  ;;  %v9155_v26 = vld [vmem:[#allocation87_spill] sm:$0xff]  ;;  %v9178_v56 = vld [vmem:[#allocation56_spill] sm:$0xff] }
  0x5c   :  { %9147 = vst [vmem:[#allocation95_spill] sm:$0xff] %v3741_v3  ;;  %v3795_v21 = vsub.f32 %v3663_v33, %v242_v12  ;;  %v3798_v4 = vsub.f32 %v3672_v2, %v243_v62  ;;  %v346_v35 = vrot.slane %v9153_v6, 1  ;;  %v349_v25 = vrot.slane %v9155_v26, 1 }
  0x5d   :  { %9148 = vst [vmem:[#allocation96_spill] sm:$0xff] %v3771_v22  ;;  %v352_v31 = vrot.slane %v3725_v9, 1  ;;  %v353_v24 = vrot.slane %v3729_v23, 1  ;;  %v355_v12 = vrot.slane %v3732_v42, 1  ;;  %v356_v62 = vrot.slane %v3735_v27, 1 }
  0x5e   :  { %9149 = vst [vmem:[#allocation97_spill] sm:$0xff] %v3792_v10  ;;  %v358_v30 = vrot.slane %v3738_v46, 1  ;;  %v361_v28 = vrot.slane %v3744_v61, 1  ;;  %v362_v58 = vrot.slane %v3747_v53, 1  ;;  %v9159_v43 = vrot.slane %v9154_v19, 1 }
  0x5f   :  { %9150 = vst [vmem:[#allocation98_spill] sm:$0xff] %v3795_v21  ;;  %v3833_v39 = vsel %vm8769_vm1, %v349_v25, %v350_v0  ;;  %v3836_v52 = vsel %vm8769_vm1, %v352_v31, %v353_v24  ;;  %v3839_v50 = vsel %vm8769_vm1, %v355_v12, %v356_v62  ;;  %v3851_v25 = vsel %vm8776_vm0, 0.0, %v9155_v26 }
  0x60   :  { %9151 = vst [vmem:[#allocation99_spill] sm:$0xff] %v3798_v4  ;;  %v9152_v29 = vld [vmem:[#allocation92_spill] sm:$0xff]  ;;  %v3845_v38 = vsel %vm8769_vm1, %v361_v28, %v362_v58  ;;  %v9161_v31 = vrot.slane %v3753_v11, 1  ;;  %v9162_v12 = vrot.slane %v3759_v5, 1  ;;  %v376_v28 = vrot.slane %v3774_v47, 1 }
  0x61   :  { %v3801_v18 = vsub.f32 %v9152_v29, %v245_v17  ;;  %v359_v17 = vrot.slane %v3741_v3, 1  ;;  %v9156_v36 = vld [vmem:[#allocation93_spill] sm:$0xff]  ;;  %vm8741_vm2 = vcmp.gt.f32.partialorder %v3833_v39, 0.0  ;;  %vm8748_vm3 = vcmp.le.f32.partialorder %v3851_v25, 0.0  ;;  %v9173_v29 = vld [vmem:[#allocation55_spill] sm:$0xff] }
  0x62   :  { %v3814_v59 = vsub.f32 %v9156_v36, %v246_v54  ;;  %v9157_v45 = vld [vmem:[#allocation94_spill] sm:$0xff]  ;;  %v3828_v54 = vsel %vm8769_vm1, %v346_v35, %v9159_v43  ;;  %v373_v43 = vrot.slane %v3768_v48, 1  ;;  %v3856_v40 = vsel %vm8769_vm1, %v364_v57, %v9161_v31  ;;  %vm3913_vm11 = vmor %vm8741_vm2, %vm8748_vm3 }
  0x63   :  { %v3823_v44 = vsub.f32 %v9157_v45, %v248_v13  ;;  %9160 = vst [vmem:[#allocation100_spill] sm:$0xff] %v3828_v54  ;;  %v3842_v13 = vsel %vm8769_vm1, %v358_v30, %v359_v17  ;;  %v3861_v30 = vsel %vm8769_vm1, %v367_v51, %v9162_v12  ;;  %v9163_v35 = vrot.slane %v3765_v63, 1  ;;  %v9166_v51 = vld [vmem:[#allocation50_spill] sm:$0xff] }
  0x64   :  { %v379_v57 = vrot.slane %v3780_v8, 1  ;;  %v3876_v31 = vsel %vm8776_vm0, 0.0, %v3725_v9  ;;  %v3880_v12 = vsel %vm8769_vm1, %v353_v24, 0.0  ;;  %v3892_v9 = vsel %vm8776_vm0, 0.0, %v3732_v42 }
  0x65   :  { %9158 = vst [vmem:[#allocation87_spill] sm:$0xff] %v3823_v44  ;;  %v3870_v26 = vsel %vm8769_vm1, %v370_v41, %v9163_v35  ;;  %v9164_v41 = vrot.slane %v3771_v22, 1  ;;  %v382_v24 = vrot.slane %v3786_v7, 1  ;;  %v3897_v35 = vsel %vm8769_vm1, %v356_v62, 0.0  ;;  %v9481_v62 = vld [vmem:[#allocation49_spill] sm:$0xff] }
  0x66   :  { %vm8749_vm6 = vcmp.gt.f32.partialorder %v3836_v52, 0.0  ;;  %vm8753_vm7 = vcmp.le.f32.partialorder %v3876_v31, 0.0  ;;  %vm8754_vm9 = vcmp.gt.f32.partialorder %v3880_v12, 0.0  ;;  %v3906_v42 = vsel %vm8776_vm0, 0.0, %v3738_v46 }
  0x67   :  { %v3887_v0 = vsel %vm8769_vm1, %v373_v43, %v9164_v41  ;;  %v9169_v41 = vld [vmem:[#allocation51_spill] sm:$0xff]  ;;  %v385_v43 = vrot.slane %v3792_v10, 1  ;;  %v3920_v45 = vsel %vm8769_vm1, %v359_v17, 0.0  ;;  %vm8758_vm13 = vcmp.gt.f32.partialorder %v3839_v50, 0.0  ;;  %vm3948_vm4 = vmor %vm8749_vm6, %vm8753_vm7 }
  0x68   :  { %9165 = vst [vmem:[#allocation101_spill] sm:$0xff] %v3887_v0  ;;  %vm8762_vm14 = vcmp.le.f32.partialorder %v3892_v9, 0.0  ;;  %v9174_v33 = vrot.slane %v3777_v34, 1  ;;  %vm8763_vm12 = vcmp.gt.f32.partialorder %v3897_v35, 0.0  ;;  %v3941_v17 = vsel %vm8776_vm0, 0.0, %v3744_v61  ;;  %vm3967_vm6 = vmor %vm8754_vm9, %vm8757_vm10 }
  0x69   :  { %9170 = vst [vmem:[#allocation50_spill] sm:$0xff] %v3920_v45  ;;  %vm8764_vm2 = vcmp.le.f32.partialorder %v3735_v27, 0.0  ;;  %v3959_v61 = vsel %vm8769_vm1, %v362_v58, 0.0  ;;  %vm8767_vm3 = vcmp.le.f32.partialorder %v3906_v42, 0.0  ;;  %v3976_v58 = vsel %vm8776_vm0, 0.0, %v3750_v32  ;;  %vm3983_vm9 = vmor %vm8758_vm13, %vm8762_vm14 }
  0x6a   :  { %v3936_v36 = vsel %vm8769_vm1, %v376_v28, %v9174_v33  ;;  %v9179_v33 = vrot.slane %v3783_v14, 1  ;;  %9181 = vst [vmem:[#allocation102_spill] sm:$0xff] %v3959_v61  ;;  %vm8773_vm5 = vcmp.le.f32.partialorder %v3741_v3, 0.0  ;;  %v9188_v54 = vrot.slane %v3753_v11, 1  ;;  %vm4000_vm13 = vmor %vm8763_vm12, %vm8764_vm2 }
  0x6b   :  { %9175 = vst [vmem:[#allocation51_spill] sm:$0xff] %v3936_v36  ;;  %v9189_v32 = vmov 0  ;;  %vm9195_vm12 = vcmp.gt.f32.partialorder %v3842_v13, 0.0  ;;  %vm9206_vm10 = vcmp.le.f32.partialorder %v3941_v17, 0.0  ;;  %v9212_v3 = vrot.slane %v3765_v63, 1 }
  0x6c   :  { %v3956_v28 = vsel %vm8769_vm1, %v379_v57, %v9179_v33  ;;  %v3992_v6 = vsel %vm8769_vm1, %v9188_v54, 0.0  ;;  %v9190_v32 = vsel %vm4000_vm13, 4294967295, %v9189_v32  ;;  %v9193_v57 = vrot.slane %v3789_v16, 1  ;;  %vm4020_vm2 = vmor %vm9195_vm12, %vm8767_vm3 }
  0x6d   :  { %9180 = vst [vmem:[#allocation56_spill] sm:$0xff] %v3956_v28  ;;  %v4013_v54 = vsel %vm8776_vm0, 0.0, %v3756_v60  ;;  %vm9201_vm12 = vcmp.gt.f32.partialorder %v3920_v45, 0.0  ;;  %v9202_v60 = vmov 0  ;;  %v9208_v45 = vmov 0 }
  0x6e   :  { %9191 = vst [vmem:[#allocation57_spill] sm:$0xff] %v9190_v32  ;;  %v4008_v4 = vsel %vm8769_vm1, %v382_v24, %v9193_v57  ;;  %v9196_v32 = vmov 0  ;;  %v391_v24 = vrot.slane %v3814_v59, 1  ;;  %v9200_v57 = vrot.slane %v3759_v5, 1  ;;  %vm4037_vm3 = vmor %vm9201_vm12, %vm8773_vm5 }
  0x6f   :  { %9194 = vst [vmem:[#allocation61_spill] sm:$0xff] %v4008_v4  ;;  %v9197_v32 = vsel %vm4020_vm2, 4294967295, %v9196_v32  ;;  %v9203_v60 = vsel %vm4037_vm3, 4294967295, %v9202_v60  ;;  %vm9213_vm5 = vcmask 1046528   ;;  %v9220_v10 = vrot.slane %v3795_v21, 1 }
  0x70   :  { %9198 = vst [vmem:[#allocation103_spill] sm:$0xff] %v9197_v32  ;;  %v4029_v4 = vsel %vm8769_vm1, %v9200_v57, 0.0  ;;  %v392_v32 = vrot.slane %v3823_v44, 1  ;;  %v4046_v57 = vsel %vm8776_vm0, 0.0, %v3762_v55  ;;  %vm9207_vm1 = vcmp.gt.f32.partialorder %v3845_v38, 0.0 }
  0x71   :  { %9204 = vst [vmem:[#allocation104_spill] sm:$0xff] %v9203_v60  ;;  %vm4053_vm12 = vmor %vm9207_vm1, %vm9206_vm10  ;;  %v4062_v44 = vsel %vm9213_vm5, %v9212_v3, 0.0  ;;  %vm9214_vm0 = vcmp.le.f32.partialorder %v3747_v53, 0.0  ;;  %vm9215_vm1 = vcmp.gt.f32.partialorder %v3959_v61, 0.0  ;;  %v9216_v55 = vmov 0  ;;  %v9229_v60 = vld [vmem:[#allocation69_spill] sm:$0xff] }
  0x72   :  { %v9209_v45 = vsel %vm4053_vm12, 4294967295, %v9208_v45  ;;  %vm4070_vm10 = vmor %vm9215_vm1, %vm9214_vm0  ;;  %vm9223_vm7 = vcmask 1040384   ;;  %vm9225_vm0 = vcmp.le.f32.partialorder %v3976_v58, 0.0  ;;  %vm9226_vm1 = vcmp.gt.f32.partialorder %v3856_v40, 0.0 }
  0x73   :  { %9210 = vst [vmem:[#allocation105_spill] sm:$0xff] %v9209_v45  ;;  %v9217_v55 = vsel %vm4070_vm10, 4294967295, %v9216_v55  ;;  %vm9221_vm12 = vmmov %vm9213_vm5  ;;  %v4083_v3 = vsel %vm9223_vm7, 0.0, %v3768_v48  ;;  %v9232_v48 = vrot.slane %v3771_v22, 1  ;;  %vm9236_vm8 = vcmp.gt.f32.partialorder %v3833_v39, 0.0 }
  0x74   :  { %9218 = vst [vmem:[#allocation106_spill] sm:$0xff] %v9217_v55  ;;  %v4078_v45 = vsel %vm9221_vm12, %v385_v43, %v9220_v10  ;;  %vm4090_vm10 = vmor %vm9226_vm1, %vm9225_vm0  ;;  %v9227_v55 = vmov 0  ;;  %v9231_v43 = vrot.slane %v9154_v19, 1  ;;  %vm9235_vm1 = vcmp.le.f32.partialorder %v3851_v25, 0.0  ;;  %v9455_v10 = vld [vmem:[#allocation45_spill] sm:$0xff] }
  0x75   :  { %9222 = vst [vmem:[#allocation107_spill] sm:$0xff] %v4078_v45  ;;  %v9228_v55 = vsel %vm4090_vm10, 4294967295, %v9227_v55  ;;  %vm9233_vm7 = vmmov %vm9213_vm5  ;;  %vm9240_vm12 = vcmp.gt.f32.partialorder %v3992_v6, 0.0  ;;  %v9245_v25 = vmov 0  ;;  %vm9249_vm0 = vcmask 1046528  }
  0x76   :  { %9224 = vst [vmem:[#allocation108_spill] sm:$0xff] %v4083_v3  ;;  %v4099_v45 = vsel %vm9213_vm5, %v9231_v43, 0.0  ;;  %v4104_v61 = vsel %vm9233_vm7, %v9232_v48, 0.0  ;;  %vm4112_vm10 = vmand %vm9236_vm8, %vm9235_vm1  ;;  %vm9239_vm5 = vcmp.le.f32.partialorder %v3753_v11, 0.0  ;;  %v9241_v43 = vmov 0 }
  0x77   :  { %9234 = vst [vmem:[#allocation69_spill] sm:$0xff] %v4104_v61  ;;  %vm4120_vm3 = vmor %vm9240_vm12, %vm9239_vm5  ;;  %vm9244_vm7 = vcmp.gt.f32.partialorder %v9166_v51, 0.0  ;;  %v4135_v19 = vsel %vm9249_vm0, %v391_v24, %v392_v32  ;;  %vm9250_vm5 = vcmask 1040384   ;;  %vm9256_vm1 = vcmp.le.f32.partialorder %v4013_v54, 0.0 }
  0x78   :  { %v9242_v43 = vsel %vm4120_vm3, 4294967295, %v9241_v43  ;;  %vm4128_vm14 = vmor %vm3913_vm11, %vm9244_vm7  ;;  %vm9252_vm11 = vcmp.le.f32.partialorder %v3720_v49, 0.0  ;;  %vm9253_vm7 = vcmp.gt.f32.partialorder %v3865_v37, 0.0  ;;  %vm9257_vm0 = vcmp.gt.f32.partialorder %v3861_v30, 0.0  ;;  %v9264_v37 = vld [vmem:[#allocation74_spill] sm:$0xff] }
  0x79   :  { %9243 = vst [vmem:[#allocation109_spill] sm:$0xff] %v9242_v43  ;;  %v9246_v25 = vsel %vm4128_vm14, 4294967295, %v9245_v25  ;;  %v4140_v43 = vsel %vm9250_vm5, 0.0, %v3774_v47  ;;  %vm4147_vm14 = vmand %vm9253_vm7, %vm9252_vm11  ;;  %v9258_v24 = vmov 0  ;;  %vm9261_vm5 = vcmp.gt.f32.partialorder %v9169_v41, 0.0 }
  0x7a   :  { %9251 = vst [vmem:[#allocation110_spill] sm:$0xff] %v4140_v43  ;;  %vm4155_vm8 = vmor %vm9257_vm0, %vm9256_vm1  ;;  %v9262_v49 = vmov 0  ;;  %v9265_v47 = vrot.slane %v3777_v34, 1  ;;  %vm9266_vm3 = vcmask 1046528   ;;  %v9268_v39 = vrot.slane %v3783_v14, 1 }
  0x7b   :  { %v9259_v24 = vsel %vm4155_vm8, 4294967295, %v9258_v24  ;;  %vm4163_vm12 = vmor %vm3928_vm15, %vm9261_vm5  ;;  %vm9270_vm5 = vcmp.le.f32.partialorder %v3876_v31, 0.0  ;;  %vm9271_vm11 = vcmp.gt.f32.partialorder %v3836_v52, 0.0  ;;  %v9272_v46 = vmov 0 }
  0x7c   :  { %9260 = vst [vmem:[#allocation111_spill] sm:$0xff] %v9259_v24  ;;  %v9263_v49 = vsel %vm4163_vm12, 4294967295, %v9262_v49  ;;  %v4172_v48 = vsel %vm9266_vm3, %v9265_v47, 0.0  ;;  %vm9269_vm1 = vmmov %vm9266_vm3  ;;  %vm9274_vm3 = vcmp.le.f32.partialorder %v3759_v5, 0.0  ;;  %vm9275_vm7 = vcmp.gt.f32.partialorder %v4029_v4, 0.0 }
  0x7d   :  { %9267 = vst [vmem:[#allocation74_spill] sm:$0xff] %v4172_v48  ;;  %v4177_v24 = vsel %vm9269_vm1, %v9268_v39, 0.0  ;;  %vm4185_vm12 = vmand %vm9271_vm11, %vm9270_vm5  ;;  %v9276_v47 = vmov 0  ;;  %vm9279_vm1 = vcmp.gt.f32.partialorder %v9173_v29, 0.0  ;;  %v9280_v31 = vmov 0 }
  0x7e   :  { %v9273_v46 = vsel %vm4185_vm12, 4294967295, %v9272_v46  ;;  %vm4193_vm8 = vmor %vm9275_vm7, %vm9274_vm3  ;;  %vm9283_vm12 = vcmask 1040384   ;;  %v9287_v2 = vmov 0  ;;  %vm9290_vm5 = vcmp.le.f32.partialorder %v4046_v57, 0.0 }
  0x7f   :  { %v9277_v47 = vsel %vm4193_vm8, 4294967295, %v9276_v47  ;;  %vm4201_vm0 = vmor %vm3948_vm4, %vm9279_vm1  ;;  %v4210_v39 = vsel %vm9283_vm12, 0.0, %v3780_v8  ;;  %vm9285_vm4 = vcmp.le.f32.partialorder %v3729_v23, 0.0  ;;  %vm9286_vm1 = vcmp.gt.f32.partialorder %v3880_v12, 0.0  ;;  %v9297_v23 = vld [vmem:[#allocation79_spill] sm:$0xff] }
  0x80   :  { %9278 = vst [vmem:[#allocation112_spill] sm:$0xff] %v9277_v47  ;;  %v9281_v31 = vsel %vm4201_vm0, 4294967295, %v9280_v31  ;;  %vm9284_vm7 = vmmov %vm9283_vm12  ;;  %vm9291_vm11 = vcmp.gt.f32.partialorder %v3870_v26, 0.0  ;;  %v9292_v8 = vmov 0  ;;  %vm9294_vm12 = vcmp.gt.f32.partialorder %v9178_v56, 0.0 }
  0x81   :  { %v489_v47 = vsel %vm9284_vm7, 0.0, %v3814_v59  ;;  %vm4219_vm0 = vmand %vm9286_vm1, %vm9285_vm4  ;;  %v9295_v59 = vmov 0  ;;  %v9298_v12 = vrot.slane %v3789_v16, 1  ;;  %vm9299_vm1 = vcmask 1046528  }
  0x82   :  { %v9288_v2 = vsel %vm4219_vm0, 4294967295, %v9287_v2  ;;  %vm4227_vm15 = vmor %vm9291_vm11, %vm9290_vm5  ;;  %v9304_v15 = vmov 0  ;;  %vm9306_vm4 = vcmp.le.f32.partialorder %v3765_v63, 0.0  ;;  %vm9313_vm5 = vcmask 1040384  }
  0x83   :  { %9289 = vst [vmem:[#allocation113_spill] sm:$0xff] %v9288_v2  ;;  %v9293_v8 = vsel %vm4227_vm15, 4294967295, %v9292_v8  ;;  %vm4235_vm7 = vmor %vm3967_vm6, %vm9294_vm12  ;;  %v4243_v52 = vsel %vm9299_vm1, %v9298_v12, 0.0  ;;  %vm9302_vm15 = vcmp.le.f32.partialorder %v3892_v9, 0.0  ;;  %vm9303_vm6 = vcmp.gt.f32.partialorder %v3839_v50, 0.0 }
  0x84   :  { %v9296_v59 = vsel %vm4235_vm7, 4294967295, %v9295_v59  ;;  %9300 = vst [vmem:[#allocation79_spill] sm:$0xff] %v4243_v52  ;;  %vm9301_vm3 = vmmov %vm9299_vm1  ;;  %vm9307_vm7 = vcmp.gt.f32.partialorder %v4062_v44, 0.0  ;;  %v9308_v12 = vmov 0  ;;  %v4276_v50 = vsel %vm9313_vm5, 0.0, %v3786_v7 }
  0x85   :  { %v441_v2 = vsel %vm9301_vm3, %v392_v32, 0.0  ;;  %vm4252_vm12 = vmand %vm9303_vm6, %vm9302_vm15  ;;  %vm9310_vm3 = vcmp.gt.f32.partialorder %v9184_v1, 0.0  ;;  %v9316_v33 = vmov 0  ;;  %v9321_v32 = vmov 0 }
  0x86   :  { %v9305_v15 = vsel %vm4252_vm12, 4294967295, %v9304_v15  ;;  %vm4260_vm1 = vmor %vm9307_vm7, %vm9306_vm4  ;;  %vm9314_vm4 = vcmp.le.f32.partialorder %v3735_v27, 0.0  ;;  %vm9324_vm5 = vcmp.gt.f32.partialorder %v9187_v20, 0.0  ;;  %v9326_v27 = vmov 0 }
  0x87   :  { %v9309_v12 = vsel %vm4260_vm1, 4294967295, %v9308_v12  ;;  %vm4268_vm11 = vmor %vm3983_vm9, %vm9310_vm3  ;;  %vm9315_vm1 = vcmp.gt.f32.partialorder %v3897_v35, 0.0  ;;  %vm9319_vm9 = vcmp.le.f32.partialorder %v4083_v3, 0.0  ;;  %vm9320_vm3 = vcmp.gt.f32.partialorder %v3887_v0, 0.0  ;;  %v9368_v0 = vld [vmem:[#allocation99_spill] sm:$0xff] }
  0x88   :  { %vm4283_vm12 = vmand %vm9315_vm1, %vm9314_vm4  ;;  %v9331_v35 = vmov 0  ;;  %v9336_v7 = vmov 0  ;;  %v9583_v9 = vmov 0 }
  0x89   :  { %v9317_v33 = vsel %vm4283_vm12, 4294967295, %v9316_v33  ;;  %vm4291_vm15 = vmor %vm9320_vm3, %vm9319_vm9  ;;  %vm9329_vm9 = vcmp.le.f32.partialorder %v3906_v42, 0.0  ;;  %vm9330_vm3 = vcmp.gt.f32.partialorder %v3842_v13, 0.0  ;;  %v9342_v42 = vmov 0  ;;  %v9345_v13 = vld [vmem:[#allocation97_spill] sm:$0xff] }
  0x8a   :  { %9318 = vst [vmem:[#allocation114_spill] sm:$0xff] %v9317_v33  ;;  %v9322_v32 = vsel %vm4291_vm15, 4294967295, %v9321_v32  ;;  %vm4299_vm6 = vmor %vm4000_vm13, %vm9324_vm5  ;;  %vm9334_vm13 = vcmp.le.f32.partialorder %v3771_v22, 0.0  ;;  %vm9335_vm5 = vcmp.gt.f32.partialorder %v4104_v61, 0.0  ;;  %v9348_v61 = vld [vmem:[#allocation87_spill] sm:$0xff]  ;;  %v9353_v33 = vmov 0 }
  0x8b   :  { %9323 = vst [vmem:[#allocation115_spill] sm:$0xff] %v9322_v32  ;;  %v9327_v27 = vsel %vm4299_vm6, 4294967295, %v9326_v27  ;;  %vm4310_vm15 = vmand %vm9330_vm3, %vm9329_vm9  ;;  %vm9346_vm3 = vcmask 1040384   ;;  %v9349_v22 = vld [vmem:[#allocation95_spill] sm:$0xff]  ;;  %v9358_v32 = vmov 0 }
  0x8c   :  { %9328 = vst [vmem:[#allocation57_spill] sm:$0xff] %v9327_v27  ;;  %v9332_v35 = vsel %vm4310_vm15, 4294967295, %v9331_v35  ;;  %vm4318_vm6 = vmor %vm9335_vm5, %vm9334_vm13  ;;  %v9339_v27 = vld [vmem:[#allocation62_spill] sm:$0xff]  ;;  %vm9350_vm5 = vcmp.le.f32.partialorder %v9349_v22, 0.0  ;;  %v9365_v22 = vmov 0 }
  0x8d   :  { %9333 = vst [vmem:[#allocation116_spill] sm:$0xff] %v9332_v35  ;;  %v9337_v7 = vsel %vm4318_vm6, 4294967295, %v9336_v7  ;;  %vm9340_vm1 = vcmp.gt.f32.partialorder %v9339_v27, 0.0  ;;  %v4332_v35 = vsel %vm9346_vm3, 0.0, %v9345_v13  ;;  %v9361_v13 = vld [vmem:[#allocation63_spill] sm:$0xff] }
  0x8e   :  { %9338 = vst [vmem:[#allocation117_spill] sm:$0xff] %v9337_v7  ;;  %vm4326_vm4 = vmor %vm4020_vm2, %vm9340_vm1  ;;  %v9351_v7 = vld [vmem:[#allocation50_spill] sm:$0xff]  ;;  %vm9356_vm2 = vcmp.le.f32.partialorder %v4140_v43, 0.0  ;;  %vm9357_vm1 = vcmp.gt.f32.partialorder %v3936_v36, 0.0  ;;  %vm9362_vm3 = vcmp.gt.f32.partialorder %v9361_v13, 0.0  ;;  %v9371_v36 = vrot.slane %v3795_v21, 1 }
  0x8f   :  { %v9343_v42 = vsel %vm4326_vm4, 4294967295, %v9342_v42  ;;  %9347 = vst [vmem:[#allocation103_spill] sm:$0xff] %v4332_v35  ;;  %vm9352_vm7 = vcmp.gt.f32.partialorder %v9351_v7, 0.0  ;;  %vm4348_vm9 = vmor %vm9357_vm1, %vm9356_vm2  ;;  %v9367_v7 = vrot.slane %v3801_v18, 1 }
  0x90   :  { %9344 = vst [vmem:[#allocation62_spill] sm:$0xff] %v9343_v42  ;;  %vm4340_vm6 = vmand %vm9352_vm7, %vm9350_vm5  ;;  %v9359_v32 = vsel %vm4348_vm9, 4294967295, %v9358_v32  ;;  %v9363_v42 = vld [vmem:[#allocation104_spill] sm:$0xff]  ;;  %vm9370_vm7 = vcmask 1046528   ;;  %vm9381_vm9 = vcmp.gt.f32.partialorder %v4172_v48, 0.0 }
  0x91   :  { %v9354_v33 = vsel %vm4340_vm6, 4294967295, %v9353_v33  ;;  %9360 = vst [vmem:[#allocation87_spill] sm:$0xff] %v9359_v32  ;;  %vm9364_vm13 = vnez %v9363_v42  ;;  %vm9372_vm5 = vmmov %vm9370_vm7  ;;  %v9374_v32 = vld [vmem:[#allocation61_spill] sm:$0xff]  ;;  %v9377_v42 = vmov 0 }
  0x92   :  { %9355 = vst [vmem:[#allocation97_spill] sm:$0xff] %v9354_v33  ;;  %vm4356_vm12 = vmor %vm9364_vm13, %vm9362_vm3  ;;  %v9369_v33 = vrot.slane %v9368_v0, 1  ;;  %v4370_v3 = vsel %vm9372_vm5, %v9371_v36, 0.0  ;;  %vm9375_vm13 = vcmp.le.f32.partialorder %v3941_v17, 0.0  ;;  %vm9376_vm3 = vcmp.gt.f32.partialorder %v3845_v38, 0.0  ;;  %v9385_v36 = vld [vmem:[#allocation64_spill] sm:$0xff] }
  0x93   :  { %v9366_v22 = vsel %vm4356_vm12, 4294967295, %v9365_v22  ;;  %9373 = vst [vmem:[#allocation95_spill] sm:$0xff] %v4370_v3  ;;  %vm4378_vm12 = vmand %vm9376_vm3, %vm9375_vm13  ;;  %vm9386_vm5 = vcmp.gt.f32.partialorder %v9385_v36, 0.0  ;;  %v9389_v17 = vmov 0  ;;  %v9391_v38 = vld [vmem:[#allocation85_spill] sm:$0xff]  ;;  %vm9392_vm3 = vcmask 1040384  }
  0x94   :  { %v4365_v43 = vsel %vm9370_vm7, %v9369_v33, %v9367_v7  ;;  %v9378_v42 = vsel %vm4378_vm12, 4294967295, %v9377_v42  ;;  %vm9380_vm7 = vcmp.le.f32.partialorder %v3777_v34, 0.0  ;;  %v9382_v33 = vmov 0  ;;  %v9387_v7 = vld [vmem:[#allocation105_spill] sm:$0xff]  ;;  %vm9393_vm12 = vmmov %vm9392_vm3 }
  0x95   :  { %9379 = vst [vmem:[#allocation50_spill] sm:$0xff] %v9378_v42  ;;  %vm4386_vm6 = vmor %vm9381_vm9, %vm9380_vm7  ;;  %vm9388_vm2 = vnez %v9387_v7  ;;  %v474_v42 = vsel %vm9392_vm3, 0.0, %v9391_v38  ;;  %v4403_v48 = vsel %vm9393_vm12, 0.0, %v9368_v0  ;;  %vm9394_vm7 = vcmp.le.f32.partialorder %v3747_v53, 0.0  ;;  %v9409_v53 = vld [vmem:[#allocation67_spill] sm:$0xff] }
  0x96   :  { %v9383_v33 = vsel %vm4386_vm6, 4294967295, %v9382_v33  ;;  %vm4394_vm1 = vmor %vm9388_vm2, %vm9386_vm5  ;;  %v9397_v7 = vmov 0  ;;  %vm9400_vm2 = vcmp.le.f32.partialorder %v4210_v39, 0.0  ;;  %vm9401_vm5 = vcmp.gt.f32.partialorder %v3956_v28, 0.0 }
  0x97   :  { %9384 = vst [vmem:[#allocation63_spill] sm:$0xff] %v9383_v33  ;;  %v9390_v17 = vsel %vm4394_vm1, 4294967295, %v9389_v17  ;;  %v9395_v33 = vld [vmem:[#allocation102_spill] sm:$0xff]  ;;  %vm4418_vm13 = vmor %vm9401_vm5, %vm9400_vm2  ;;  %v9402_v38 = vmov 0  ;;  %vm9404_vm12 = vcmp.le.f32.partialorder %v489_v47, 0.0  ;;  %vm9405_vm3 = vcmp.gt.f32.partialorder %v4135_v19, 0.0 }
  0x98   :  { %vm9396_vm6 = vcmp.gt.f32.partialorder %v9395_v33, 0.0  ;;  %v9403_v38 = vsel %vm4418_vm13, 4294967295, %v9402_v38  ;;  %vm4425_vm9 = vmor %vm9405_vm3, %vm9404_vm12  ;;  %v9406_v0 = vmov 0  ;;  %v9411_v33 = vld [vmem:[#allocation106_spill] sm:$0xff]  ;;  %v9415_v28 = vrot.slane %v3801_v18, 1  ;;  %v9417_v19 = vld [vmem:[#allocation107_spill] sm:$0xff] }
  0x99   :  { %vm4410_vm4 = vmand %vm9396_vm6, %vm9394_vm7  ;;  %v9407_v0 = vsel %vm4425_vm9, 4294967295, %v9406_v0  ;;  %vm9410_vm6 = vcmp.gt.f32.partialorder %v9409_v53, 0.0  ;;  %vm9412_vm7 = vnez %v9411_v33  ;;  %vm9416_vm5 = vcmask 1046528  }
  0x9a   :  { %v9398_v7 = vsel %vm4410_vm4, 4294967295, %v9397_v7  ;;  %9408 = vst [vmem:[#allocation99_spill] sm:$0xff] %v9407_v0  ;;  %vm4433_vm4 = vmor %vm9412_vm7, %vm9410_vm6  ;;  %v4441_v47 = vsel %vm9416_vm5, %v9415_v28, 0.0  ;;  %vm9418_vm9 = vcmp.le.f32.partialorder %v3976_v58, 0.0  ;;  %vm9419_vm13 = vcmp.gt.f32.partialorder %v3856_v40, 0.0  ;;  %v9431_v40 = vld [vmem:[#allocation68_spill] sm:$0xff] }
  0x9b   :  { %9399 = vst [vmem:[#allocation104_spill] sm:$0xff] %v9398_v7  ;;  %v9413_v7 = vmov 0  ;;  %vm4449_vm1 = vmand %vm9419_vm13, %vm9418_vm9  ;;  %v9420_v33 = vmov 0  ;;  %vm9423_vm6 = vcmp.le.f32.partialorder %v3783_v14, 0.0  ;;  %vm9424_vm7 = vcmp.gt.f32.partialorder %v4177_v24, 0.0 }
  0x9c   :  { %v9414_v7 = vsel %vm4433_vm4, 4294967295, %v9413_v7  ;;  %v9421_v33 = vsel %vm4449_vm1, 4294967295, %v9420_v33  ;;  %vm4457_vm2 = vmor %vm9424_vm7, %vm9423_vm6  ;;  %v9425_v0 = vmov 0  ;;  %vm9427_vm5 = vcmp.le.f32.partialorder %v9348_v61, 0.0 }
  0x9d   :  { %9422 = vst [vmem:[#allocation61_spill] sm:$0xff] %v9421_v33  ;;  %v9426_v0 = vsel %vm4457_vm2, 4294967295, %v9425_v0  ;;  %vm9428_vm12 = vcmp.gt.f32.partialorder %v441_v2, 0.0  ;;  %v9429_v28 = vmov 0  ;;  %vm9432_vm13 = vcmp.gt.f32.partialorder %v9431_v40, 0.0  ;;  %v9436_v33 = vld [vmem:[#allocation100_spill] sm:$0xff] }
  0x9e   :  { %vm4464_vm3 = vmor %vm9428_vm12, %vm9427_vm5  ;;  %vm9433_vm9 = vnez %v9228_v55  ;;  %vm9437_vm12 = vcmp.le.f32.partialorder %v3753_v11, 0.0  ;;  %vm9438_vm5 = vcmp.gt.f32.partialorder %v3992_v6, 0.0  ;;  %v9439_v61 = vmov 0  ;;  %v9451_v6 = vld [vmem:[#allocation109_spill] sm:$0xff] }
  0x9f   :  { %v9430_v28 = vsel %vm4464_vm3, 4294967295, %v9429_v28  ;;  %vm4472_vm1 = vmor %vm9433_vm9, %vm9432_vm13  ;;  %vm9441_vm13 = vcmp.gt.f32.partialorder %v9166_v51, 0.0  ;;  %v9442_v55 = vmov 0  ;;  %vm9445_vm7 = vcmp.le.f32.partialorder %v4276_v50, 0.0 }
  0xa0   :  { %vm4484_vm3 = vmand %vm9438_vm5, %vm9437_vm12  ;;  %vm9446_vm6 = vcmp.gt.f32.partialorder %v9374_v32, 0.0  ;;  %v9447_v11 = vmov 0  ;;  %vm9450_vm12 = vcmp.gt.f32.partialorder %v9229_v60, 0.0  ;;  %vm9452_vm5 = vnez %v9451_v6 }
  0xa1   :  { %v9440_v61 = vsel %vm4484_vm3, 4294967295, %v9439_v61  ;;  %vm4492_vm9 = vmand %vm4112_vm10, %vm9441_vm13  ;;  %v9453_v2 = vmov 0  ;;  %vm9456_vm10 = vcmp.le.f32.partialorder %v9455_v10, 0.0  ;;  %vm9457_vm13 = vnez %v9246_v25 }
  0xa2   :  { %v9443_v55 = vsel %vm4492_vm9, 4294967295, %v9442_v55  ;;  %vm4500_vm2 = vmor %vm9446_vm6, %vm9445_vm7  ;;  %v9464_v6 = vmov 0  ;;  %v9468_v25 = vmov 0  ;;  %vm9471_vm6 = vcmp.le.f32.partialorder %v3789_v16, 0.0 }
  0xa3   :  { %9444 = vst [vmem:[#allocation64_spill] sm:$0xff] %v9443_v55  ;;  %v9448_v11 = vsel %vm4500_vm2, 4294967295, %v9447_v11  ;;  %vm4508_vm4 = vmor %vm9452_vm5, %vm9450_vm12  ;;  %v9458_v55 = vmov 0  ;;  %vm9462_vm12 = vcmp.le.f32.partialorder %v4013_v54, 0.0  ;;  %vm9463_vm5 = vcmp.gt.f32.partialorder %v3861_v30, 0.0  ;;  %v9475_v30 = vld [vmem:[#allocation70_spill] sm:$0xff] }
  0xa4   :  { %9449 = vst [vmem:[#allocation105_spill] sm:$0xff] %v9448_v11  ;;  %v9454_v2 = vsel %vm4508_vm4, 4294967295, %v9453_v2  ;;  %vm4516_vm9 = vmor %vm9457_vm13, %vm9456_vm10  ;;  %v9461_v11 = vld [vmem:[#allocation86_spill] sm:$0xff]  ;;  %vm9467_vm10 = vcmp.gt.f32.partialorder %v9169_v41, 0.0  ;;  %vm9472_vm3 = vcmp.gt.f32.partialorder %v4243_v52, 0.0  ;;  %v9473_v54 = vmov 0 }
  0xa5   :  { %v9459_v55 = vsel %vm4516_vm9, 4294967295, %v9458_v55  ;;  %vm4527_vm4 = vmand %vm9463_vm5, %vm9462_vm12  ;;  %vm9476_vm12 = vcmp.gt.f32.partialorder %v9475_v30, 0.0  ;;  %v9486_v52 = vld [vmem:[#allocation80_spill] sm:$0xff]  ;;  %v9729_v58 = vmov 0 }
  0xa6   :  { %9460 = vst [vmem:[#allocation85_spill] sm:$0xff] %v9459_v55  ;;  %v9465_v6 = vsel %vm4527_vm4, 4294967295, %v9464_v6  ;;  %vm4535_vm13 = vmand %vm4147_vm14, %vm9467_vm10  ;;  %v9477_v55 = vld [vmem:[#allocation111_spill] sm:$0xff]  ;;  %vm9482_vm14 = vcmp.le.f32.partialorder %v9481_v62, 0.0  ;;  %vm9483_vm10 = vnez %v9263_v49  ;;  %v9494_v49 = vmov 0 }
  0xa7   :  { %9466 = vst [vmem:[#allocation102_spill] sm:$0xff] %v9465_v6  ;;  %v9469_v25 = vsel %vm4535_vm13, 4294967295, %v9468_v25  ;;  %vm4543_vm2 = vmor %vm9472_vm3, %vm9471_vm6  ;;  %vm9478_vm5 = vnez %v9477_v55  ;;  %v9479_v6 = vmov 0  ;;  %v9489_v55 = vmov 0 }
  0xa8   :  { %9470 = vst [vmem:[#allocation67_spill] sm:$0xff] %v9469_v25  ;;  %v9474_v54 = vsel %vm4543_vm2, 4294967295, %v9473_v54  ;;  %vm4551_vm7 = vmor %vm9478_vm5, %vm9476_vm12  ;;  %v9484_v25 = vmov 0  ;;  %vm9487_vm12 = vcmp.le.f32.partialorder %v3759_v5, 0.0  ;;  %vm9488_vm5 = vcmp.gt.f32.partialorder %v4029_v4, 0.0 }
  0xa9   :  { %v9480_v6 = vsel %vm4551_vm7, 4294967295, %v9479_v6  ;;  %vm4559_vm13 = vmor %vm9483_vm10, %vm9482_vm14  ;;  %vm9492_vm14 = vcmp.gt.f32.partialorder %v9173_v29, 0.0  ;;  %vm9493_vm10 = vnez %v9273_v46  ;;  %vm9497_vm6 = vcmp.le.f32.partialorder %v4332_v35, 0.0 }
  0xaa   :  { %v9485_v25 = vsel %vm4559_vm13, 4294967295, %v9484_v25  ;;  %vm4571_vm7 = vmand %vm9488_vm5, %vm9487_vm12  ;;  %vm9498_vm3 = vcmp.gt.f32.partialorder %v9417_v19, 0.0  ;;  %v9499_v5 = vmov 0  ;;  %vm9502_vm12 = vcmp.gt.f32.partialorder %v9264_v37, 0.0  ;;  %v9513_v19 = vld [vmem:[#allocation88_spill] sm:$0xff] }
  0xab   :  { %v9490_v55 = vsel %vm4571_vm7, 4294967295, %v9489_v55  ;;  %vm4579_vm13 = vmand %vm9493_vm10, %vm9492_vm14  ;;  %vm9507_vm14 = vcmp.le.f32.partialorder %v9166_v51, 0.0  ;;  %vm9508_vm10 = vnez %v9281_v31  ;;  %v9509_v46 = vmov 0 }
  0xac   :  { %9491 = vst [vmem:[#allocation106_spill] sm:$0xff] %v9490_v55  ;;  %v9495_v49 = vsel %vm4579_vm13, 4294967295, %v9494_v49  ;;  %vm4587_vm2 = vmor %vm9498_vm3, %vm9497_vm6  ;;  %v9504_v55 = vmov 0  ;;  %v9517_v4 = vmov 0  ;;  %vm9525_vm3 = vcmp.le.f32.partialorder %v3795_v21, 0.0  ;;  %v9542_v21 = vld [vmem:[#allocation93_spill] sm:$0xff] }
  0xad   :  { %9496 = vst [vmem:[#allocation68_spill] sm:$0xff] %v9495_v49  ;;  %v9500_v5 = vsel %vm4587_vm2, 4294967295, %v9499_v5  ;;  %vm4595_vm5 = vmor %vm4193_vm8, %vm9502_vm12  ;;  %v9512_v49 = vld [vmem:[#allocation76_spill] sm:$0xff]  ;;  %vm9515_vm8 = vcmp.le.f32.partialorder %v4046_v57, 0.0  ;;  %vm9516_vm12 = vcmp.gt.f32.partialorder %v3870_v26, 0.0  ;;  %vm9526_vm6 = vcmp.gt.f32.partialorder %v4370_v3, 0.0 }
  0xae   :  { %9501 = vst [vmem:[#allocation100_spill] sm:$0xff] %v9500_v5  ;;  %v9505_v55 = vsel %vm4595_vm5, 4294967295, %v9504_v55  ;;  %vm4603_vm4 = vmor %vm9508_vm10, %vm9507_vm14  ;;  %v4609_v35 = vsub.f32 %v9513_v19, %v9512_v49  ;;  %v9514_v5 = vld [vmem:[#allocation81_spill] sm:$0xff]  ;;  %vm9520_vm14 = vcmp.gt.f32.partialorder %v9178_v56, 0.0  ;;  %v9527_v57 = vmov 0  ;;  %v9530_v26 = vld [vmem:[#allocation78_spill] sm:$0xff] }
  0xaf   :  { %9506 = vst [vmem:[#allocation109_spill] sm:$0xff] %v9505_v55  ;;  %v9510_v46 = vsel %vm4603_vm4, 4294967295, %v9509_v46  ;;  %vm4617_vm5 = vmand %vm9516_vm12, %vm9515_vm8  ;;  %vm9531_vm8 = vcmp.gt.f32.partialorder %v9530_v26, 0.0  ;;  %vm9532_vm12 = vnez %v9293_v8  ;;  %v9533_v49 = vmov 0  ;;  %v9543_v8 = vld [vmem:[#allocation82_spill] sm:$0xff] }
  0xb0   :  { %9511 = vst [vmem:[#allocation45_spill] sm:$0xff] %v9510_v46  ;;  %v9518_v4 = vsel %vm4617_vm5, 4294967295, %v9517_v4  ;;  %vm4625_vm10 = vmand %vm4219_vm0, %vm9520_vm14  ;;  %v9522_v46 = vmov 0  ;;  %vm9535_vm0 = vcmp.le.f32.partialorder %v9169_v41, 0.0  ;;  %vm9536_vm14 = vnez %v9296_v59 }
  0xb1   :  { %9519 = vst [vmem:[#allocation86_spill] sm:$0xff] %v9518_v4  ;;  %v9523_v46 = vsel %vm4625_vm10, 4294967295, %v9522_v46  ;;  %vm4633_vm4 = vmor %vm9526_vm6, %vm9525_vm3  ;;  %v9537_v31 = vmov 0  ;;  %v9540_v4 = vld [vmem:[#allocation89_spill] sm:$0xff]  ;;  %v9546_v59 = vmov 0  ;;  %vm9553_vm3 = vcmp.gt.f32.partialorder %v4062_v44, 0.0 }
  0xb2   :  { %9524 = vst [vmem:[#allocation70_spill] sm:$0xff] %v9523_v46  ;;  %v9528_v57 = vsel %vm4633_vm4, 4294967295, %v9527_v57  ;;  %vm4641_vm5 = vmor %vm9532_vm12, %vm9531_vm8  ;;  %v9539_v46 = vld [vmem:[#allocation77_spill] sm:$0xff]  ;;  %vm9544_vm8 = vcmp.le.f32.partialorder %v474_v42, 0.0  ;;  %vm9545_vm12 = vcmp.gt.f32.partialorder %v9436_v33, 0.0  ;;  %vm9552_vm4 = vcmp.le.f32.partialorder %v3765_v63, 0.0 }
  0xb3   :  { %9529 = vst [vmem:[#allocation111_spill] sm:$0xff] %v9528_v57  ;;  %v9534_v49 = vsel %vm4641_vm5, 4294967295, %v9533_v49  ;;  %vm4649_vm10 = vmor %vm9536_vm14, %vm9535_vm0  ;;  %v4655_v3 = vsub.f32 %v9540_v4, %v9539_v46  ;;  %v9541_v57 = vld [vmem:[#allocation91_spill] sm:$0xff]  ;;  %vm9548_vm0 = vcmp.le.f32.partialorder %v9461_v11, 0.0  ;;  %vm9549_vm14 = vcmp.gt.f32.partialorder %v4099_v45, 0.0 }
  0xb4   :  { %v9538_v31 = vsel %vm4649_vm10, 4294967295, %v9537_v31  ;;  %v4659_v55 = vsub.f32 %v9542_v21, %v9541_v57  ;;  %vm4666_vm5 = vmand %vm9545_vm12, %vm9544_vm8  ;;  %v9550_v46 = vmov 0  ;;  %v9554_v42 = vmov 0  ;;  %v9576_v21 = vld [vmem:[#allocation92_spill] sm:$0xff] }
  0xb5   :  { %v9547_v59 = vsel %vm4666_vm5, 4294967295, %v9546_v59  ;;  %vm4674_vm10 = vmand %vm9549_vm14, %vm9548_vm0  ;;  %vm9556_vm8 = vcmp.gt.f32.partialorder %v9184_v1, 0.0  ;;  %vm9557_vm12 = vnez %v9305_v15  ;;  %v9558_v33 = vmov 0  ;;  %v9575_v15 = vld [vmem:[#allocation90_spill] sm:$0xff] }
  0xb6   :  { %v9551_v46 = vsel %vm4674_vm10, 4294967295, %v9550_v46  ;;  %vm4682_vm6 = vmand %vm9553_vm3, %vm9552_vm4  ;;  %vm9561_vm0 = vcmp.le.f32.partialorder %v4403_v48, 0.0  ;;  %vm9562_vm14 = vcmp.gt.f32.partialorder %v4365_v43, 0.0  ;;  %v9563_v45 = vmov 0 }
  0xb7   :  { %v9555_v42 = vsel %vm4682_vm6, 4294967295, %v9554_v42  ;;  %vm4690_vm5 = vmand %vm9557_vm12, %vm9556_vm8  ;;  %vm9566_vm4 = vcmp.gt.f32.partialorder %v9297_v23, 0.0  ;;  %vm9567_vm3 = vnez %v9309_v12  ;;  %v9568_v44 = vmov 0  ;;  %v9578_v12 = vld [vmem:[#allocation83_spill] sm:$0xff] }
  0xb8   :  { %v9559_v33 = vsel %vm4690_vm5, 4294967295, %v9558_v33  ;;  %vm4698_vm10 = vmor %vm9562_vm14, %vm9561_vm0  ;;  %vm9571_vm8 = vcmp.le.f32.partialorder %v9173_v29, 0.0  ;;  %v9572_v63 = vmov 0  ;;  %v4720_v11 = vsub.f32 %v9575_v15, %v9513_v19  ;;  %v9581_v29 = vld [vmem:[#allocation101_spill] sm:$0xff]  ;;  %v9587_v19 = vld [vmem:[#allocation114_spill] sm:$0xff] }
  0xb9   :  { %9560 = vst [vmem:[#allocation49_spill] sm:$0xff] %v9559_v33  ;;  %v9564_v45 = vsel %vm4698_vm10, 4294967295, %v9563_v45  ;;  %vm4706_vm6 = vmor %vm9567_vm3, %vm9566_vm4  ;;  %vm9582_vm3 = vcmp.gt.f32.partialorder %v9581_v29, 0.0  ;;  %vm9592_vm0 = vcmp.le.f32.partialorder %v3801_v18, 0.0  ;;  %vm9593_vm14 = vcmp.gt.f32.partialorder %v4441_v47, 0.0  ;;  %v9598_v29 = vld [vmem:[#allocation115_spill] sm:$0xff] }
  0xba   :  { %9565 = vst [vmem:[#allocation80_spill] sm:$0xff] %v9564_v45  ;;  %v9569_v44 = vsel %vm4706_vm6, 4294967295, %v9568_v44  ;;  %vm4714_vm12 = vmor %vm4268_vm11, %vm9571_vm8  ;;  %v9577_v45 = vld [vmem:[#allocation94_spill] sm:$0xff]  ;;  %vm9586_vm8 = vcmp.gt.f32.partialorder %v9187_v20, 0.0 }
  0xbb   :  { %9570 = vst [vmem:[#allocation112_spill] sm:$0xff] %v9569_v44  ;;  %v9573_v63 = vsel %vm4714_vm12, 4294967295, %v9572_v63  ;;  %v4724_v33 = vsub.f32 %v9577_v45, %v9576_v21  ;;  %v9579_v44 = vld [vmem:[#allocation108_spill] sm:$0xff]  ;;  %vm9588_vm12 = vnez %v9587_v19  ;;  %vm4748_vm10 = vmor %vm9593_vm14, %vm9592_vm0  ;;  %v9600_v45 = vmov 0  ;;  %v9604_v19 = vld [vmem:[#allocation57_spill] sm:$0xff] }
  0xbc   :  { %9574 = vst [vmem:[#allocation81_spill] sm:$0xff] %v9573_v63  ;;  %vm9580_vm4 = vcmp.le.f32.partialorder %v9579_v44, 0.0  ;;  %vm4740_vm6 = vmand %vm9588_vm12, %vm9586_vm8  ;;  %v9589_v63 = vmov 0  ;;  %v9594_v44 = vmov 0  ;;  %vm9603_vm12 = vcmp.le.f32.partialorder %v9178_v56, 0.0 }
  0xbd   :  { %vm4732_vm11 = vmand %vm9582_vm3, %vm9580_vm4  ;;  %v9590_v63 = vsel %vm4740_vm6, 4294967295, %v9589_v63  ;;  %v9595_v44 = vsel %vm4748_vm10, 4294967295, %v9594_v44  ;;  %vm9597_vm4 = vcmp.gt.f32.partialorder %v9486_v52, 0.0  ;;  %vm9599_vm3 = vnez %v9598_v29  ;;  %v9610_v29 = vld [vmem:[#allocation96_spill] sm:$0xff] }
  0xbe   :  { %v9584_v9 = vsel %vm4732_vm11, 4294967295, %v9583_v9  ;;  %9591 = vst [vmem:[#allocation78_spill] sm:$0xff] %v9590_v63  ;;  %vm4756_vm11 = vmor %vm9599_vm3, %vm9597_vm4  ;;  %vm9605_vm8 = vnez %v9604_v19  ;;  %v9606_v63 = vmov 0  ;;  %vm9611_vm3 = vcmp.le.f32.partialorder %v9610_v29, 0.0 }
  0xbf   :  { %9585 = vst [vmem:[#allocation113_spill] sm:$0xff] %v9584_v9  ;;  %v9601_v45 = vsel %vm4756_vm11, 4294967295, %v9600_v45  ;;  %vm4764_vm6 = vmor %vm9605_vm8, %vm9603_vm12  ;;  %v4770_v9 = vsub.f32 %v9541_v57, %v9540_v4  ;;  %v9614_v19 = vmov 0  ;;  %vm9617_vm12 = vcmp.gt.f32.partialorder %v9339_v27, 0.0  ;;  %v9622_v57 = vld [vmem:[#allocation117_spill] sm:$0xff] }
  0xc0   :  { %9596 = vst [vmem:[#allocation82_spill] sm:$0xff] %v9595_v44  ;;  %v9607_v63 = vsel %vm4764_vm6, 4294967295, %v9606_v63  ;;  %v9609_v44 = vld [vmem:[#allocation84_spill] sm:$0xff]  ;;  %vm4787_vm8 = vmand %vm4310_vm15, %vm9617_vm12  ;;  %v9619_v4 = vmov 0  ;;  %vm9621_vm14 = vcmp.gt.f32.partialorder %v9514_v5, 0.0  ;;  %vm9623_vm4 = vnez %v9622_v57  ;;  %v9633_v57 = vld [vmem:[#allocation110_spill] sm:$0xff] }
  0xc1   :  { %9602 = vst [vmem:[#allocation83_spill] sm:$0xff] %v9601_v45  ;;  %v9612_v45 = vld [vmem:[#allocation69_spill] sm:$0xff]  ;;  %v9620_v4 = vsel %vm4787_vm8, 4294967295, %v9619_v4  ;;  %vm4795_vm0 = vmor %vm9623_vm4, %vm9621_vm14  ;;  %v9624_v29 = vmov 0  ;;  %vm9634_vm4 = vcmp.le.f32.partialorder %v9633_v57, 0.0  ;;  %vm9645_vm12 = vcmp.gt.f32.partialorder %v9543_v8, 0.0 }
  0xc2   :  { %9608 = vst [vmem:[#allocation108_spill] sm:$0xff] %v9607_v63  ;;  %vm9613_vm11 = vcmp.gt.f32.partialorder %v9612_v45, 0.0  ;;  %v9625_v29 = vsel %vm4795_vm0, 4294967295, %v9624_v29  ;;  %v9628_v45 = vld [vmem:[#allocation62_spill] sm:$0xff]  ;;  %v4809_v63 = vsub.f32 %v9576_v21, %v9575_v15  ;;  %v9642_v21 = vmov 0  ;;  %v9646_v15 = vld [vmem:[#allocation87_spill] sm:$0xff] }
  0xc3   :  { %vm4779_vm10 = vmand %vm9613_vm11, %vm9611_vm3  ;;  %9626 = vst [vmem:[#allocation114_spill] sm:$0xff] %v9625_v29  ;;  %vm9627_vm11 = vcmp.le.f32.partialorder %v9184_v1, 0.0  ;;  %vm9629_vm3 = vnez %v9628_v45  ;;  %v9635_v29 = vld [vmem:[#allocation51_spill] sm:$0xff]  ;;  %v9637_v45 = vmov 0  ;;  %vm9647_vm14 = vnez %v9646_v15  ;;  %v9658_v15 = vld [vmem:[#allocation74_spill] sm:$0xff] }
  0xc4   :  { %v9615_v19 = vsel %vm4779_vm10, 4294967295, %v9614_v19  ;;  %vm4803_vm10 = vmor %vm9629_vm3, %vm9627_vm11  ;;  %vm9636_vm0 = vcmp.gt.f32.partialorder %v9635_v29, 0.0  ;;  %vm9639_vm11 = vcmp.gt.f32.partialorder %v9361_v13, 0.0  ;;  %v9648_v57 = vmov 0 }
  0xc5   :  { %9616 = vst [vmem:[#allocation101_spill] sm:$0xff] %v9615_v19  ;;  %v9630_v19 = vmov 0  ;;  %vm4818_vm8 = vmand %vm9636_vm0, %vm9634_vm4  ;;  %vm9651_vm0 = vcmp.le.f32.partialorder %v9187_v20, 0.0  ;;  %vm9652_vm4 = vnez %v9366_v22  ;;  %v9653_v29 = vmov 0  ;;  %v9663_v22 = vld [vmem:[#allocation50_spill] sm:$0xff] }
  0xc6   :  { %v9631_v19 = vsel %vm4803_vm10, 4294967295, %v9630_v19  ;;  %v9638_v45 = vsel %vm4818_vm8, 4294967295, %v9637_v45  ;;  %vm4834_vm15 = vmor %vm9647_vm14, %vm9645_vm12  ;;  %vm9657_vm6 = vcmp.le.f32.partialorder %v3777_v34, 0.0  ;;  %vm9659_vm12 = vcmp.gt.f32.partialorder %v9658_v15, 0.0 }
  0xc7   :  { %9632 = vst [vmem:[#allocation115_spill] sm:$0xff] %v9631_v19  ;;  %v9640_v19 = vld [vmem:[#allocation97_spill] sm:$0xff]  ;;  %v9649_v57 = vsel %vm4834_vm15, 4294967295, %v9648_v57  ;;  %vm4842_vm8 = vmor %vm9652_vm4, %vm9651_vm0  ;;  %vm9662_vm15 = vcmp.gt.f32.partialorder %v9385_v36, 0.0  ;;  %vm9664_vm0 = vnez %v9663_v22  ;;  %v9670_v34 = vmov 0  ;;  %v9678_v22 = vld [vmem:[#allocation40_spill] sm:$0xff] }
  0xc8   :  { %vm9641_vm3 = vnez %v9640_v19  ;;  %9650 = vst [vmem:[#allocation84_spill] sm:$0xff] %v9649_v57  ;;  %v9654_v29 = vsel %vm4842_vm8, 4294967295, %v9653_v29  ;;  %v9656_v19 = vld [vmem:[#allocation39_spill] sm:$0xff]  ;;  %vm4853_vm14 = vmand %vm9659_vm12, %vm9657_vm6  ;;  %v9660_v57 = vmov 0  ;;  %vm9673_vm6 = vcmp.le.f32.partialorder %v9339_v27, 0.0 }
  0xc9   :  { %vm4826_vm10 = vmand %vm9641_vm3, %vm9639_vm11  ;;  %9655 = vst [vmem:[#allocation96_spill] sm:$0xff] %v9654_v29  ;;  %v9661_v57 = vsel %vm4853_vm14, 4294967295, %v9660_v57  ;;  %v9665_v29 = vmov 0  ;;  %vm9667_vm3 = vcmp.gt.f32.partialorder %v9578_v12, 0.0  ;;  %vm9674_vm12 = vnez %v9390_v17  ;;  %v9685_v17 = vld [vmem:[#allocation104_spill] sm:$0xff] }
  0xca   :  { %v9643_v21 = vsel %vm4826_vm10, 4294967295, %v9642_v21  ;;  %vm4861_vm4 = vmand %vm9664_vm0, %vm9662_vm15  ;;  %v9675_v15 = vmov 0  ;;  %vm9679_vm8 = vcmp.le.f32.partialorder %v4210_v39, 0.0  ;;  %vm9690_vm0 = vcmp.gt.f32.partialorder %v9609_v44, 0.0 }
  0xcb   :  { %9644 = vst [vmem:[#allocation57_spill] sm:$0xff] %v9643_v21  ;;  %v9666_v29 = vsel %vm4861_vm4, 4294967295, %v9665_v29  ;;  %v9668_v21 = vld [vmem:[#allocation63_spill] sm:$0xff]  ;;  %vm4877_vm14 = vmor %vm9674_vm12, %vm9673_vm6  ;;  %vm9686_vm6 = vnez %v9685_v17  ;;  %vm9691_vm4 = vnez %v9403_v38  ;;  %v9692_v39 = vmov 0  ;;  %v9704_v38 = vld [vmem:[#allocation41_spill] sm:$0xff] }
  0xcc   :  { %vm9669_vm10 = vnez %v9668_v21  ;;  %v9676_v15 = vsel %vm4877_vm14, 4294967295, %v9675_v15  ;;  %v9680_v21 = vld [vmem:[#allocation56_spill] sm:$0xff]  ;;  %vm4904_vm15 = vmor %vm9691_vm4, %vm9690_vm0  ;;  %v9699_v17 = vld [vmem:[#allocation99_spill] sm:$0xff]  ;;  %vm9705_vm14 = vcmp.le.f32.partialorder %v3783_v14, 0.0  ;;  %vm9714_vm0 = vcmp.gt.f32.partialorder %v4609_v35, 0.0 }
  0xcd   :  { %vm4869_vm11 = vmor %vm9669_vm10, %vm9667_vm3  ;;  %9677 = vst [vmem:[#allocation116_spill] sm:$0xff] %v9676_v15  ;;  %vm9681_vm10 = vcmp.gt.f32.partialorder %v9680_v21, 0.0  ;;  %v9687_v15 = vmov 0  ;;  %v9693_v39 = vsel %vm4904_vm15, 4294967295, %v9692_v39  ;;  %v9696_v21 = vmov 0 }
  0xce   :  { %v9671_v34 = vsel %vm4869_vm11, 4294967295, %v9670_v34  ;;  %vm4888_vm3 = vmand %vm9681_vm10, %vm9679_vm8  ;;  %vm9684_vm11 = vcmp.gt.f32.partialorder %v9409_v53, 0.0  ;;  %vm9694_vm8 = vcmp.le.f32.partialorder %v9361_v13, 0.0  ;;  %vm9695_vm10 = vnez %v9414_v7 }
  0xcf   :  { %9672 = vst [vmem:[#allocation69_spill] sm:$0xff] %v9671_v34  ;;  %v9682_v34 = vmov 0  ;;  %vm4896_vm12 = vmand %vm9686_vm6, %vm9684_vm11  ;;  %vm9698_vm11 = vcmp.le.f32.partialorder %v4659_v55, 0.0  ;;  %vm9700_vm6 = vnez %v9699_v17  ;;  %v9707_v7 = vmov 0  ;;  %v9710_v17 = vld [vmem:[#allocation61_spill] sm:$0xff] }
  0xd0   :  { %v9683_v34 = vsel %vm4888_vm3, 4294967295, %v9682_v34  ;;  %v9688_v15 = vsel %vm4896_vm12, 4294967295, %v9687_v15  ;;  %vm4912_vm3 = vmor %vm9695_vm10, %vm9694_vm8  ;;  %vm9706_vm8 = vcmp.gt.f32.partialorder %v4177_v24, 0.0  ;;  %vm9715_vm15 = vnez %v9426_v0  ;;  %v9726_v0 = vld [vmem:[#allocation42_spill] sm:$0xff] }
  0xd1   :  { %9689 = vst [vmem:[#allocation117_spill] sm:$0xff] %v9688_v15  ;;  %v9697_v21 = vsel %vm4912_vm3, 4294967295, %v9696_v21  ;;  %vm4920_vm12 = vmor %vm9700_vm6, %vm9698_vm11  ;;  %v9701_v15 = vmov 0  ;;  %vm9709_vm3 = vcmp.gt.f32.partialorder %v9431_v40, 0.0  ;;  %vm9711_vm11 = vnez %v9710_v17 }
  0xd2   :  { %v9702_v15 = vsel %vm4920_vm12, 4294967295, %v9701_v15  ;;  %vm4931_vm10 = vmand %vm9706_vm8, %vm9705_vm14  ;;  %v9716_v14 = vmov 0  ;;  %vm9718_vm14 = vcmp.le.f32.partialorder %v9385_v36, 0.0  ;;  %v9719_v24 = vmov 0 }
  0xd3   :  { %9703 = vst [vmem:[#allocation62_spill] sm:$0xff] %v9702_v15  ;;  %v9708_v7 = vsel %vm4931_vm10, 4294967295, %v9707_v7  ;;  %vm4939_vm6 = vmand %vm9711_vm11, %vm9709_vm3  ;;  %v9712_v15 = vmov 0  ;;  %vm9721_vm3 = vcmp.le.f32.partialorder %v4724_v33, 0.0  ;;  %vm9722_vm11 = vnez %v9430_v28 }
  0xd4   :  { %v9713_v15 = vsel %vm4939_vm6, 4294967295, %v9712_v15  ;;  %vm4947_vm4 = vmor %vm9715_vm15, %vm9714_vm0  ;;  %v9723_v17 = vmov 0  ;;  %v9734_v28 = vmov 0  ;;  %vm9736_vm15 = vcmp.le.f32.partialorder %v9455_v10, 0.0 }
  0xd5   :  { %v9717_v14 = vsel %vm4947_vm4, 4294967295, %v9716_v14  ;;  %vm4955_vm8 = vmor %vm4472_vm1, %vm9718_vm14  ;;  %vm9727_vm1 = vcmp.le.f32.partialorder %v4276_v50, 0.0  ;;  %vm9728_vm14 = vcmp.gt.f32.partialorder %v9374_v32, 0.0  ;;  %v9739_v50 = vmov 0  ;;  %v9743_v32 = vld [vmem:[#allocation105_spill] sm:$0xff] }
  0xd6   :  { %v9720_v24 = vsel %vm4955_vm8, 4294967295, %v9719_v24  ;;  %vm4963_vm6 = vmor %vm9722_vm11, %vm9721_vm3  ;;  %vm9732_vm3 = vcmp.gt.f32.partialorder %v9229_v60, 0.0  ;;  %vm9733_vm11 = vnez %v9440_v61  ;;  %v9750_v61 = vmov 0 }
  0xd7   :  { %v9724_v17 = vsel %vm4963_vm6, 4294967295, %v9723_v17  ;;  %vm4975_vm8 = vmand %vm9728_vm14, %vm9727_vm1  ;;  %vm9742_vm1 = vcmp.gt.f32.partialorder %v4655_v3, 0.0  ;;  %vm9744_vm14 = vnez %v9743_v32  ;;  %v9758_v32 = vld [vmem:[#allocation43_spill] sm:$0xff] }
  0xd8   :  { %9725 = vst [vmem:[#allocation110_spill] sm:$0xff] %v9724_v17  ;;  %v9730_v58 = vsel %vm4975_vm8, 4294967295, %v9729_v58  ;;  %vm4983_vm6 = vmand %vm9733_vm11, %vm9732_vm3  ;;  %v9737_v17 = vld [vmem:[#allocation64_spill] sm:$0xff]  ;;  %vm9748_vm3 = vcmp.le.f32.partialorder %v9409_v53, 0.0  ;;  %vm9749_vm11 = vnez %v9454_v2  ;;  %v9760_v2 = vld [vmem:[#allocation79_spill] sm:$0xff] }
  0xd9   :  { %9731 = vst [vmem:[#allocation51_spill] sm:$0xff] %v9730_v58  ;;  %v9735_v28 = vsel %vm4983_vm6, 4294967295, %v9734_v28  ;;  %vm9738_vm10 = vnez %v9737_v17  ;;  %vm4999_vm0 = vmor %vm9744_vm14, %vm9742_vm1  ;;  %v9745_v58 = vmov 0  ;;  %v9765_v17 = vld [vmem:[#allocation102_spill] sm:$0xff] }
  0xda   :  { %vm4991_vm4 = vmand %vm9738_vm10, %vm9736_vm15  ;;  %v9746_v58 = vsel %vm4999_vm0, 4294967295, %v9745_v58  ;;  %vm9753_vm10 = vcmp.le.f32.partialorder %v9656_v19, 0.0  ;;  %vm9769_vm0 = vcmp.le.f32.partialorder %v9481_v62, 0.0 }
  0xdb   :  { %v9740_v50 = vsel %vm4991_vm4, 4294967295, %v9739_v50  ;;  %9747 = vst [vmem:[#allocation87_spill] sm:$0xff] %v9746_v58  ;;  %vm5007_vm6 = vmor %vm9749_vm11, %vm9748_vm3  ;;  %vm9759_vm3 = vcmp.le.f32.partialorder %v3789_v16, 0.0  ;;  %vm9761_vm11 = vcmp.gt.f32.partialorder %v9760_v2, 0.0  ;;  %v9770_v58 = vld [vmem:[#allocation67_spill] sm:$0xff]  ;;  %v9772_v16 = vmov 0 }
  0xdc   :  { %9741 = vst [vmem:[#allocation97_spill] sm:$0xff] %v9740_v50  ;;  %v9751_v61 = vsel %vm5007_vm6, 4294967295, %v9750_v61  ;;  %vm5015_vm15 = vmor %vm4516_vm9, %vm9753_vm10  ;;  %v9755_v50 = vmov 0  ;;  %vm9764_vm9 = vcmp.gt.f32.partialorder %v9475_v30, 0.0  ;;  %vm9766_vm10 = vnez %v9765_v17 }
  0xdd   :  { %9752 = vst [vmem:[#allocation74_spill] sm:$0xff] %v9751_v61  ;;  %v9756_v50 = vsel %vm5015_vm15, 4294967295, %v9755_v50  ;;  %vm5027_vm6 = vmand %vm9761_vm11, %vm9759_vm3  ;;  %v9762_v61 = vmov 0  ;;  %vm9771_vm4 = vnez %v9770_v58  ;;  %vm9775_vm3 = vcmp.gt.f32.partialorder %v4720_v11, 0.0 }
  0xde   :  { %9757 = vst [vmem:[#allocation50_spill] sm:$0xff] %v9756_v50  ;;  %v9763_v61 = vsel %vm5027_vm6, 4294967295, %v9762_v61  ;;  %vm5035_vm15 = vmand %vm9766_vm10, %vm9764_vm9  ;;  %v9767_v50 = vmov 0  ;;  %vm9776_vm11 = vnez %v9474_v54  ;;  %v9777_v2 = vmov 0  ;;  %v9790_v54 = vld [vmem:[#allocation44_spill] sm:$0xff] }
  0xdf   :  { %v9768_v50 = vsel %vm5035_vm15, 4294967295, %v9767_v50  ;;  %vm5043_vm14 = vmand %vm9771_vm4, %vm9769_vm0  ;;  %vm9780_vm9 = vcmp.le.f32.partialorder %v9431_v40, 0.0  ;;  %vm9781_vm10 = vnez %v9480_v6  ;;  %v9782_v17 = vmov 0  ;;  %v9793_v6 = vld [vmem:[#allocation107_spill] sm:$0xff] }
  0xe0   :  { %v9773_v16 = vsel %vm5043_vm14, 4294967295, %v9772_v16  ;;  %vm5051_vm1 = vmor %vm9776_vm11, %vm9775_vm3  ;;  %vm9785_vm4 = vcmp.le.f32.partialorder %v9678_v22, 0.0  ;;  %vm9786_vm0 = vnez %v9485_v25  ;;  %v9787_v58 = vmov 0  ;;  %v9814_v25 = vld [vmem:[#allocation109_spill] sm:$0xff] }
  0xe1   :  { %9774 = vst [vmem:[#allocation63_spill] sm:$0xff] %v9773_v16  ;;  %v9778_v2 = vsel %vm5051_vm1, 4294967295, %v9777_v2  ;;  %vm5059_vm15 = vmor %vm9781_vm10, %vm9780_vm9  ;;  %vm9794_vm9 = vcmp.gt.f32.partialorder %v9793_v6, 0.0  ;;  %v9820_v16 = vld [vmem:[#allocation45_spill] sm:$0xff]  ;;  %v9825_v6 = vld [vmem:[#allocation46_spill] sm:$0xff] }
  0xe2   :  { %9779 = vst [vmem:[#allocation56_spill] sm:$0xff] %v9778_v2  ;;  %v9783_v17 = vsel %vm5059_vm15, 4294967295, %v9782_v17  ;;  %vm5067_vm14 = vmor %vm9786_vm0, %vm9785_vm4  ;;  %v9791_v2 = vld [vmem:[#allocation103_spill] sm:$0xff]  ;;  %vm9798_vm15 = vcmp.gt.f32.partialorder %v9264_v37, 0.0  ;;  %vm9803_vm0 = vcmp.le.f32.partialorder %v9166_v51, 0.0  ;;  %v9816_v51 = vmov 0 }
  0xe3   :  { %9784 = vst [vmem:[#allocation104_spill] sm:$0xff] %v9783_v17  ;;  %v9788_v58 = vsel %vm5067_vm14, 4294967295, %v9787_v58  ;;  %vm9792_vm6 = vcmp.le.f32.partialorder %v9791_v2, 0.0  ;;  %v9795_v17 = vmov 0  ;;  %vm5086_vm4 = vmand %vm4571_vm7, %vm9798_vm15  ;;  %v9805_v2 = vmov 0 }
  0xe4   :  { %9789 = vst [vmem:[#allocation99_spill] sm:$0xff] %v9788_v58  ;;  %vm5078_vm10 = vmand %vm9794_vm9, %vm9792_vm6  ;;  %v9800_v58 = vmov 0  ;;  %vm9808_vm6 = vcmp.gt.f32.partialorder %v4770_v9, 0.0  ;;  %vm9813_vm7 = vcmp.le.f32.partialorder %v9229_v60, 0.0  ;;  %vm9815_vm15 = vnez %v9814_v25 }
  0xe5   :  { %v9796_v17 = vsel %vm5078_vm10, 4294967295, %v9795_v17  ;;  %v9801_v58 = vsel %vm5086_vm4, 4294967295, %v9800_v58  ;;  %vm5094_vm1 = vmand %vm4579_vm13, %vm9803_vm0  ;;  %vm9819_vm13 = vcmp.le.f32.partialorder %v9704_v38, 0.0  ;;  %vm9821_vm0 = vnez %v9820_v16 }
  0xe6   :  { %9797 = vst [vmem:[#allocation61_spill] sm:$0xff] %v9796_v17  ;;  %v9806_v2 = vsel %vm5094_vm1, 4294967295, %v9805_v2  ;;  %vm5102_vm9 = vmor %vm4587_vm2, %vm9808_vm6  ;;  %v9810_v17 = vmov 0  ;;  %v9830_v25 = vmov 0  ;;  %v9836_v16 = vmov 0 }
  0xe7   :  { %9802 = vst [vmem:[#allocation64_spill] sm:$0xff] %v9801_v58  ;;  %v9811_v17 = vsel %vm5102_vm9, 4294967295, %v9810_v17  ;;  %vm5110_vm11 = vmor %vm9815_vm15, %vm9813_vm7  ;;  %v9828_v58 = vld [vmem:[#allocation95_spill] sm:$0xff]  ;;  %vm9833_vm15 = vcmp.gt.f32.partialorder %v9530_v26, 0.0 }
  0xe8   :  { %9807 = vst [vmem:[#allocation105_spill] sm:$0xff] %v9806_v2  ;;  %v9817_v51 = vsel %vm5110_vm11, 4294967295, %v9816_v51  ;;  %vm5118_vm3 = vmor %vm9821_vm0, %vm9819_vm13  ;;  %v9822_v2 = vmov 0  ;;  %vm9829_vm1 = vcmp.gt.f32.partialorder %v9828_v58, 0.0  ;;  %vm9838_vm0 = vcmp.le.f32.partialorder %v9169_v41, 0.0  ;;  %v9844_v58 = vld [vmem:[#allocation111_spill] sm:$0xff] }
  0xe9   :  { %9812 = vst [vmem:[#allocation85_spill] sm:$0xff] %v9811_v17  ;;  %v9823_v2 = vsel %vm5118_vm3, 4294967295, %v9822_v2  ;;  %v9826_v17 = vld [vmem:[#allocation98_spill] sm:$0xff]  ;;  %v9850_v41 = vmov 0  ;;  %vm9858_vm3 = vcmp.gt.f32.partialorder %v4365_v43, 0.0  ;;  %v9871_v43 = vmov 0 }
  0xea   :  { %9818 = vst [vmem:[#allocation79_spill] sm:$0xff] %v9817_v51  ;;  %vm9827_vm9 = vcmp.le.f32.partialorder %v9826_v17, 0.0  ;;  %v9834_v51 = vld [vmem:[#allocation86_spill] sm:$0xff]  ;;  %v9841_v17 = vmov 0 }
  0xeb   :  { %9824 = vst [vmem:[#allocation102_spill] sm:$0xff] %v9823_v2  ;;  %vm5128_vm7 = vmand %vm9829_vm1, %vm9827_vm9  ;;  %vm9835_vm11 = vnez %v9834_v51  ;;  %v9839_v2 = vld [vmem:[#allocation70_spill] sm:$0xff]  ;;  %vm9843_vm1 = vcmp.gt.f32.partialorder %v4809_v63, 0.0  ;;  %vm9845_vm9 = vnez %v9844_v58  ;;  %v9856_v51 = vld [vmem:[#allocation47_spill] sm:$0xff]  ;;  %v9882_v58 = vmov 0 }
  0xec   :  { %v9831_v25 = vsel %vm5128_vm7, 4294967295, %v9830_v25  ;;  %vm5136_vm13 = vmand %vm9835_vm11, %vm9833_vm15  ;;  %vm9840_vm6 = vnez %v9839_v2  ;;  %vm9848_vm11 = vcmp.le.f32.partialorder %v9475_v30, 0.0  ;;  %vm9849_vm15 = vnez %v9534_v49 }
  0xed   :  { %9832 = vst [vmem:[#allocation67_spill] sm:$0xff] %v9831_v25  ;;  %v9837_v16 = vsel %vm5136_vm13, 4294967295, %v9836_v16  ;;  %vm5144_vm2 = vmand %vm9840_vm6, %vm9838_vm0  ;;  %v9846_v25 = vmov 0  ;;  %vm9852_vm6 = vcmp.le.f32.partialorder %v9726_v0, 0.0  ;;  %vm9853_vm0 = vnez %v9538_v31 }
  0xee   :  { %v9842_v17 = vsel %vm5144_vm2, 4294967295, %v9841_v17  ;;  %vm5152_vm7 = vmor %vm9845_vm9, %vm9843_vm1  ;;  %v9859_v49 = vmov 0  ;;  %v9863_v31 = vmov 0  ;;  %vm9866_vm9 = vnez %v9551_v46  ;;  %v9880_v46 = vld [vmem:[#allocation80_spill] sm:$0xff] }
  0xef   :  { %v9847_v25 = vsel %vm5152_vm7, 4294967295, %v9846_v25  ;;  %vm5160_vm13 = vmor %vm9849_vm15, %vm9848_vm11  ;;  %vm9857_vm7 = vcmp.le.f32.partialorder %v4403_v48, 0.0  ;;  %vm9861_vm15 = vcmp.gt.f32.partialorder %v9455_v10, 0.0  ;;  %v9867_v48 = vmov 0  ;;  %v9873_v10 = vld [vmem:[#allocation55_spill] sm:$0xff] }
  0xf0   :  { %v9851_v41 = vsel %vm5160_vm13, 4294967295, %v9850_v41  ;;  %vm5168_vm2 = vmor %vm9853_vm0, %vm9852_vm6  ;;  %vm9862_vm13 = vnez %v9547_v59  ;;  %vm9865_vm0 = vcmp.gt.f32.partialorder %v9481_v62, 0.0  ;;  %v9876_v62 = vmov 0  ;;  %v9891_v59 = vld [vmem:[#allocation81_spill] sm:$0xff] }
  0xf1   :  { %vm5178_vm11 = vmand %vm9858_vm3, %vm9857_vm7  ;;  %vm9869_vm3 = vcmp.gt.f32.partialorder %v9297_v23, 0.0  ;;  %vm9870_vm7 = vnez %v9555_v42  ;;  %v9885_v42 = vld [vmem:[#allocation112_spill] sm:$0xff] }
  0xf2   :  { %v9860_v49 = vsel %vm5178_vm11, 4294967295, %v9859_v49  ;;  %vm5186_vm6 = vmand %vm9862_vm13, %vm9861_vm15  ;;  %vm9874_vm13 = vcmp.le.f32.partialorder %v9873_v10, 0.0  ;;  %v9887_v10 = vmov 0 }
  0xf3   :  { %v9864_v31 = vsel %vm5186_vm6, 4294967295, %v9863_v31  ;;  %vm5194_vm1 = vmand %vm9866_vm9, %vm9865_vm0  ;;  %vm9879_vm9 = vcmp.gt.f32.partialorder %v4659_v55, 0.0  ;;  %vm9881_vm0 = vnez %v9880_v46  ;;  %v9896_v46 = vld [vmem:[#allocation48_spill] sm:$0xff] }
  0xf4   :  { %v9868_v48 = vsel %vm5194_vm1, 4294967295, %v9867_v48  ;;  %vm5202_vm11 = vmand %vm9870_vm7, %vm9869_vm3  ;;  %vm9884_vm3 = vcmp.le.f32.partialorder %v9264_v37, 0.0  ;;  %vm9886_vm7 = vnez %v9885_v42  ;;  %v9899_v42 = vmov 0 }
  0xf5   :  { %v9872_v43 = vsel %vm5202_vm11, 4294967295, %v9871_v43  ;;  %vm5210_vm15 = vmand %vm4690_vm5, %vm9874_vm13  ;;  %vm9890_vm5 = vcmp.le.f32.partialorder %v9758_v32, 0.0  ;;  %vm9892_vm13 = vnez %v9891_v59  ;;  %vm9898_vm11 = vcmp.gt.f32.partialorder %v4441_v47, 0.0  ;;  %v9914_v47 = vld [vmem:[#allocation82_spill] sm:$0xff] }
  0xf6   :  { %v9877_v62 = vsel %vm5210_vm15, 4294967295, %v9876_v62  ;;  %vm5218_vm1 = vmor %vm9881_vm0, %vm9879_vm9  ;;  %v9905_v59 = vmov 0 }
  0xf7   :  { %9878 = vst [vmem:[#allocation103_spill] sm:$0xff] %v9877_v62  ;;  %v9883_v58 = vsel %vm5218_vm1, 4294967295, %v9882_v58  ;;  %vm5226_vm6 = vmor %vm9886_vm7, %vm9884_vm3  ;;  %v9893_v62 = vmov 0  ;;  %vm9897_vm1 = vcmp.le.f32.partialorder %v3801_v18, 0.0  ;;  %vm9902_vm7 = vcmp.gt.f32.partialorder %v9486_v52, 0.0 }
  0xf8   :  { %v9888_v10 = vsel %vm5226_vm6, 4294967295, %v9887_v10  ;;  %vm5234_vm15 = vmor %vm9892_vm13, %vm9890_vm5  ;;  %vm9907_vm13 = vcmp.le.f32.partialorder %v9178_v56, 0.0  ;;  %v9910_v18 = vmov 0  ;;  %v9922_v56 = vmov 0 }
  0xf9   :  { %9889 = vst [vmem:[#allocation107_spill] sm:$0xff] %v9888_v10  ;;  %v9894_v62 = vsel %vm5234_vm15, 4294967295, %v9893_v62  ;;  %vm5244_vm3 = vmand %vm9898_vm11, %vm9897_vm1  ;;  %v9903_v10 = vld [vmem:[#allocation113_spill] sm:$0xff]  ;;  %vm9913_vm1 = vcmp.gt.f32.partialorder %v4724_v33, 0.0  ;;  %vm9915_vm11 = vnez %v9914_v47  ;;  %v9931_v47 = vld [vmem:[#allocation52_spill] sm:$0xff]  ;;  %vm9933_vm15 = vcmp.gt.f32.partialorder %v9514_v5, 0.0 }
  0xfa   :  { %9895 = vst [vmem:[#allocation106_spill] sm:$0xff] %v9894_v62  ;;  %v9900_v42 = vsel %vm5244_vm3, 4294967295, %v9899_v42  ;;  %vm9904_vm6 = vnez %v9903_v10  ;;  %v9908_v62 = vld [vmem:[#allocation78_spill] sm:$0xff]  ;;  %vm5268_vm3 = vmor %vm9915_vm11, %vm9913_vm1  ;;  %v9920_v10 = vld [vmem:[#allocation83_spill] sm:$0xff]  ;;  %vm9943_vm11 = vcmp.le.f32.partialorder %v9297_v23, 0.0 }
  0xfb   :  { %9901 = vst [vmem:[#allocation68_spill] sm:$0xff] %v9900_v42  ;;  %vm5252_vm5 = vmand %vm9904_vm6, %vm9902_vm7  ;;  %vm9909_vm0 = vnez %v9908_v62  ;;  %v9916_v42 = vmov 0  ;;  %vm9919_vm6 = vcmp.le.f32.partialorder %v9530_v26, 0.0  ;;  %vm9921_vm7 = vnez %v9920_v10  ;;  %v9926_v62 = vld [vmem:[#allocation108_spill] sm:$0xff]  ;;  %v9934_v10 = vld [vmem:[#allocation101_spill] sm:$0xff] }
  0xfc   :  { %v9906_v59 = vsel %vm5252_vm5, 4294967295, %v9905_v59  ;;  %vm5260_vm9 = vmand %vm9909_vm0, %vm9907_vm13  ;;  %v9917_v42 = vsel %vm5268_vm3, 4294967295, %v9916_v42  ;;  %vm9925_vm0 = vcmp.le.f32.partialorder %v9790_v54, 0.0  ;;  %vm9927_vm13 = vnez %v9926_v62 }
  0xfd   :  { %v9911_v18 = vsel %vm5260_vm9, 4294967295, %v9910_v18  ;;  %9918 = vst [vmem:[#allocation109_spill] sm:$0xff] %v9917_v42  ;;  %vm5276_vm5 = vmor %vm9921_vm7, %vm9919_vm6  ;;  %v9932_v42 = vld [vmem:[#allocation93_spill] sm:$0xff]  ;;  %vm9935_vm6 = vnez %v9934_v10  ;;  %v9940_v62 = vmov 0  ;;  %v9946_v54 = vmov 0  ;;  %v9950_v10 = vld [vmem:[#allocation115_spill] sm:$0xff] }
  0xfe   :  { %9912 = vst [vmem:[#allocation100_spill] sm:$0xff] %v9911_v18  ;;  %v9923_v56 = vsel %vm5276_vm5, 4294967295, %v9922_v56  ;;  %vm5284_vm9 = vmor %vm9927_vm13, %vm9925_vm0  ;;  %v9928_v18 = vmov 0  ;;  %vm9938_vm5 = vcmp.le.f32.partialorder %v9184_v1, 0.0  ;;  %vm9939_vm0 = vnez %v9620_v4  ;;  %v9955_v4 = vld [vmem:[#allocation53_spill] sm:$0xff]  ;;  %v10185_v2 = vld [vmem:[#allocation103_spill] sm:$0xff] }
  0xff   :  { %9924 = vst [vmem:[#allocation45_spill] sm:$0xff] %v9923_v56  ;;  %v9929_v18 = vsel %vm5284_vm9, 4294967295, %v9928_v18  ;;  %vm5295_vm7 = vmand %vm9935_vm6, %vm9933_vm15  ;;  %v9936_v56 = vmov 0  ;;  %vm9949_vm15 = vcmp.le.f32.partialorder %v9825_v6, 0.0  ;;  %vm9951_vm6 = vnez %v9950_v10  ;;  %v9962_v10 = vld [vmem:[#allocation57_spill] sm:$0xff] }
 0x100   :  { %9930 = vst [vmem:[#allocation98_spill] sm:$0xff] %v9929_v18  ;;  %v9937_v56 = vsel %vm5295_vm7, 4294967295, %v9936_v56  ;;  %vm5303_vm13 = vmand %vm9939_vm0, %vm9938_vm5  ;;  %v9944_v18 = vld [vmem:[#allocation114_spill] sm:$0xff]  ;;  %v9952_v1 = vmov 0  ;;  %vm9957_vm9 = vcmp.gt.f32.partialorder %v9543_v8, 0.0  ;;  %vm9966_vm0 = vcmp.le.f32.partialorder %v9486_v52, 0.0 }
 0x101   :  { %v9941_v62 = vsel %vm5303_vm13, 4294967295, %v9940_v62  ;;  %vm9945_vm3 = vnez %v9944_v18  ;;  %vm5319_vm7 = vmor %vm9951_vm6, %vm9949_vm15  ;;  %v9959_v18 = vmov 0  ;;  %vm9963_vm15 = vnez %v9962_v10  ;;  %v9978_v10 = vld [vmem:[#allocation54_spill] sm:$0xff] }
 0x102   :  { %9942 = vst [vmem:[#allocation95_spill] sm:$0xff] %v9941_v62  ;;  %vm5311_vm1 = vmor %vm9945_vm3, %vm9943_vm11  ;;  %v9953_v1 = vsel %vm5319_vm7, 4294967295, %v9952_v1  ;;  %v9956_v62 = vld [vmem:[#allocation94_spill] sm:$0xff]  ;;  %vm9958_vm3 = vnez %v9638_v45  ;;  %v9969_v6 = vmov 0  ;;  %v9973_v45 = vld [vmem:[#allocation96_spill] sm:$0xff]  ;;  %vm9980_vm7 = vnez %v9661_v57 }
 0x103   :  { %v9947_v54 = vsel %vm5311_vm1, 4294967295, %v9946_v54  ;;  %9954 = vst [vmem:[#allocation70_spill] sm:$0xff] %v9953_v1  ;;  %vm5330_vm11 = vmand %vm9958_vm3, %vm9957_vm9  ;;  %vm9961_vm1 = vcmp.le.f32.partialorder %v9187_v20, 0.0  ;;  %v9964_v1 = vmov 0  ;;  %vm9972_vm9 = vcmp.le.f32.partialorder %v9856_v51, 0.0  ;;  %v9994_v57 = vld [vmem:[#allocation116_spill] sm:$0xff] }
 0x104   :  { %9948 = vst [vmem:[#allocation86_spill] sm:$0xff] %v9947_v54  ;;  %v9960_v18 = vsel %vm5330_vm11, 4294967295, %v9959_v18  ;;  %vm5338_vm6 = vmand %vm9963_vm15, %vm9961_vm1  ;;  %v9967_v54 = vld [vmem:[#allocation84_spill] sm:$0xff]  ;;  %vm9974_vm3 = vnez %v9973_v45  ;;  %v9975_v20 = vmov 0  ;;  %v9985_v45 = vmov 0 }
 0x105   :  { %v9965_v1 = vsel %vm5338_vm6, 4294967295, %v9964_v1  ;;  %vm9968_vm13 = vnez %v9967_v54  ;;  %vm5354_vm11 = vmor %vm9974_vm3, %vm9972_vm9  ;;  %vm9979_vm6 = vcmp.gt.f32.partialorder %v9578_v12, 0.0  ;;  %v9981_v54 = vmov 0 }
 0x106   :  { %vm5346_vm5 = vmor %vm9968_vm13, %vm9966_vm0  ;;  %v9976_v20 = vsel %vm5354_vm11, 4294967295, %v9975_v20  ;;  %vm9983_vm0 = vcmp.le.f32.partialorder %v9339_v27, 0.0  ;;  %vm9987_vm3 = vcmp.le.f32.partialorder %v9514_v5, 0.0  ;;  %v9996_v27 = vmov 0 }
 0x107   :  { %v9970_v6 = vsel %vm5346_vm5, 4294967295, %v9969_v6  ;;  %9977 = vst [vmem:[#allocation55_spill] sm:$0xff] %v9976_v20  ;;  %vm5364_vm13 = vmand %vm9980_vm7, %vm9979_vm6  ;;  %vm9984_vm5 = vnez %v9666_v29  ;;  %v9988_v20 = vld [vmem:[#allocation69_spill] sm:$0xff]  ;;  %vm9993_vm7 = vcmp.le.f32.partialorder %v9896_v46, 0.0  ;;  %vm9995_vm6 = vnez %v9994_v57  ;;  %v9999_v29 = vld [vmem:[#allocation58_spill] sm:$0xff] }
 0x108   :  { %9971 = vst [vmem:[#allocation111_spill] sm:$0xff] %v9970_v6  ;;  %v9982_v54 = vsel %vm5364_vm13, 4294967295, %v9981_v54  ;;  %vm5372_vm9 = vmand %vm9984_vm5, %vm9983_vm0  ;;  %vm9989_vm15 = vnez %v9988_v20  ;;  %v9990_v6 = vmov 0  ;;  %vm10001_vm11 = vnez %v9683_v34 }
 0x109   :  { %v9986_v45 = vsel %vm5372_vm9, 4294967295, %v9985_v45  ;;  %vm5380_vm1 = vmor %vm9989_vm15, %vm9987_vm3  ;;  %vm10000_vm9 = vcmp.gt.f32.partialorder %v9609_v44, 0.0  ;;  %v10002_v20 = vmov 0  ;;  %vm10004_vm3 = vcmp.le.f32.partialorder %v9361_v13, 0.0 }
 0x10a   :  { %v9991_v6 = vsel %vm5380_vm1, 4294967295, %v9990_v6  ;;  %vm5388_vm13 = vmor %vm9995_vm6, %vm9993_vm7  ;;  %v10007_v57 = vmov 0  ;;  %vm10009_vm6 = vcmp.le.f32.partialorder %v9543_v8, 0.0  ;;  %vm10010_vm0 = vnez %v9693_v39  ;;  %v10021_v39 = vld [vmem:[#allocation59_spill] sm:$0xff] }
 0x10b   :  { %9992 = vst [vmem:[#allocation49_spill] sm:$0xff] %v9991_v6  ;;  %v9997_v27 = vsel %vm5388_vm13, 4294967295, %v9996_v27  ;;  %vm5398_vm15 = vmand %vm10001_vm11, %vm10000_vm9  ;;  %v10005_v6 = vld [vmem:[#allocation117_spill] sm:$0xff]  ;;  %vm10013_vm11 = vcmp.le.f32.partialorder %v9931_v47, 0.0  ;;  %vm10014_vm9 = vnez %v9697_v21  ;;  %v10015_v13 = vmov 0 }
 0x10c   :  { %9998 = vst [vmem:[#allocation80_spill] sm:$0xff] %v9997_v27  ;;  %v10003_v20 = vsel %vm5398_vm15, 4294967295, %v10002_v20  ;;  %vm10006_vm1 = vnez %v10005_v6  ;;  %vm5414_vm5 = vmor %vm10010_vm0, %vm10009_vm6  ;;  %v10011_v27 = vmov 0  ;;  %v10024_v21 = vmov 0  ;;  %v5981_v6 = vld [vmem:[%s8632_s1 + $0xe8] sm:$0xff] }
 0x10d   :  { %vm5406_vm7 = vmand %vm10006_vm1, %vm10004_vm3  ;;  %v10012_v27 = vsel %vm5414_vm5, 4294967295, %v10011_v27  ;;  %vm10017_vm1 = vcmp.le.f32.partialorder %v9932_v42, 0.0  ;;  %vm10022_vm5 = vcmp.gt.f32.partialorder %v4609_v35, 0.0  ;;  %v10028_v42 = vmov 0 }
 0x10e   :  { %v10008_v57 = vsel %vm5406_vm7, 4294967295, %v10007_v57  ;;  %vm5422_vm15 = vmor %vm10014_vm9, %vm10013_vm11  ;;  %vm10023_vm7 = vnez %v9708_v7  ;;  %vm10026_vm9 = vcmp.le.f32.partialorder %v9385_v36, 0.0  ;;  %vm10031_vm6 = vnez %v9717_v14  ;;  %v10045_v14 = vld [vmem:[#allocation60_spill] sm:$0xff] }
 0x10f   :  { %v10016_v13 = vsel %vm5422_vm15, 4294967295, %v10015_v13  ;;  %vm5430_vm3 = vmor %vm4920_vm12, %vm10017_vm1  ;;  %vm10027_vm15 = vnez %v9713_v15  ;;  %vm10030_vm1 = vcmp.le.f32.partialorder %v9578_v12, 0.0  ;;  %v10032_v34 = vmov 0  ;;  %v10040_v15 = vld [vmem:[#allocation110_spill] sm:$0xff] }
 0x110   :  { %vm5440_vm11 = vmand %vm10023_vm7, %vm10022_vm5  ;;  %vm10035_vm5 = vcmp.le.f32.partialorder %v9955_v4, 0.0  ;;  %vm10036_vm7 = vnez %v9720_v24  ;;  %v10037_v36 = vmov 0  ;;  %v10042_v7 = vmov 0 }
 0x111   :  { %v10025_v21 = vsel %vm5440_vm11, 4294967295, %v10024_v21  ;;  %vm5448_vm12 = vmand %vm10027_vm15, %vm10026_vm9  ;;  %vm10039_vm15 = vcmp.le.f32.partialorder %v9956_v62, 0.0  ;;  %vm10041_vm9 = vnez %v10040_v15  ;;  %v10048_v24 = vmov 0  ;;  %v10056_v15 = vld [vmem:[#allocation97_spill] sm:$0xff] }
 0x112   :  { %v10029_v42 = vsel %vm5448_vm12, 4294967295, %v10028_v42  ;;  %vm5456_vm0 = vmor %vm10031_vm6, %vm10030_vm1  ;;  %v10052_v62 = vmov 0  ;;  %vm10057_vm1 = vnez %v10056_v15  ;;  %v10073_v15 = vld [vmem:[#allocation50_spill] sm:$0xff] }
 0x113   :  { %v10033_v34 = vsel %vm5456_vm0, 4294967295, %v10032_v34  ;;  %vm5464_vm11 = vmor %vm10036_vm7, %vm10035_vm5  ;;  %vm10046_vm0 = vcmp.gt.f32.partialorder %v4655_v3, 0.0  ;;  %vm10050_vm7 = vcmp.le.f32.partialorder %v9409_v53, 0.0  ;;  %v10064_v53 = vmov 0 }
 0x114   :  { %10034 = vst [vmem:[#allocation112_spill] sm:$0xff] %v10033_v34  ;;  %v10038_v36 = vsel %vm5464_vm11, 4294967295, %v10037_v36  ;;  %vm5472_vm12 = vmor %vm10041_vm9, %vm10039_vm15  ;;  %vm10051_vm11 = vnez %v9735_v28  ;;  %vm10055_vm9 = vcmp.le.f32.partialorder %v9656_v19, 0.0  ;;  %v10062_v34 = vld [vmem:[#allocation87_spill] sm:$0xff]  ;;  %v10068_v28 = vld [vmem:[#allocation74_spill] sm:$0xff]  ;;  %v10070_v19 = vmov 0 }
 0x115   :  { %v10043_v7 = vsel %vm5472_vm12, 4294967295, %v10042_v7  ;;  %vm5482_vm5 = vmand %vm4975_vm8, %vm10046_vm0  ;;  %vm10061_vm8 = vcmp.le.f32.partialorder %v9609_v44, 0.0  ;;  %vm10063_vm0 = vnez %v10062_v34  ;;  %v5529_v34 = vld [vmem:[%s8632_s1] sm:$0xff] }
 0x116   :  { %10044 = vst [vmem:[#allocation81_spill] sm:$0xff] %v10043_v7  ;;  %v10049_v24 = vsel %vm5482_vm5, 4294967295, %v10048_v24  ;;  %vm5490_vm15 = vmand %vm10051_vm11, %vm10050_vm7  ;;  %v10058_v7 = vmov 0  ;;  %vm10067_vm11 = vcmp.le.f32.partialorder %v9978_v10, 0.0  ;;  %vm10069_vm7 = vnez %v10068_v28  ;;  %v5535_v28 = vld [vmem:[%s8632_s1 + $0x8] sm:$0xff] }
 0x117   :  { %v10053_v62 = vsel %vm5490_vm15, 4294967295, %v10052_v62  ;;  %vm5498_vm6 = vmand %vm10057_vm1, %vm10055_vm9  ;;  %vm8884_vm1 = vmmov 1   ;;  %vm10074_vm9 = vnez %v10073_v15  ;;  %v10078_v15 = vld [vmem:[#allocation65_spill] sm:$0xff] }
 0x118   :  { %10054 = vst [vmem:[#allocation113_spill] sm:$0xff] %v10053_v62  ;;  %v10059_v7 = vsel %vm5498_vm6, 4294967295, %v10058_v7  ;;  %vm5506_vm5 = vmor %vm10063_vm0, %vm10061_vm8  ;;  %vm10080_vm8 = vnez %v9763_v61  ;;  %vm10084_vm0 = vnez %v9768_v50  ;;  %v10091_v62 = vmov 0  ;;  %v10095_v61 = vld [vmem:[#allocation56_spill] sm:$0xff] }
 0x119   :  { %10060 = vst [vmem:[#allocation78_spill] sm:$0xff] %v10059_v7  ;;  %v10065_v53 = vsel %vm5506_vm5, 4294967295, %v10064_v53  ;;  %vm5514_vm15 = vmor %vm10069_vm7, %vm10067_vm11  ;;  %v10075_v7 = vmov 0  ;;  %vm10088_vm11 = vcmp.le.f32.partialorder %v9678_v22, 0.0  ;;  %v10101_v50 = vld [vmem:[#allocation104_spill] sm:$0xff]  ;;  %v10103_v22 = vmov 0 }
 0x11a   :  { %10066 = vst [vmem:[#allocation82_spill] sm:$0xff] %v10065_v53  ;;  %v10071_v19 = vsel %vm5514_vm15, 4294967295, %v10070_v19  ;;  %vm5521_vm6 = vmxor %vm10074_vm9, %vm8884_vm1  ;;  %vm10079_vm9 = vcmp.gt.f32.partialorder %v4720_v11, 0.0  ;;  %v10089_v53 = vld [vmem:[#allocation63_spill] sm:$0xff] }
 0x11b   :  { %10072 = vst [vmem:[#allocation83_spill] sm:$0xff] %v10071_v19  ;;  %v10076_v7 = vsel %vm5521_vm6, 4294967295, %v10075_v7  ;;  %vm5543_vm1 = vmand %vm10080_vm8, %vm10079_vm9  ;;  %vm10083_vm6 = vcmp.le.f32.partialorder %v9431_v40, 0.0  ;;  %v10085_v19 = vmov 0  ;;  %vm10090_vm7 = vnez %v10089_v53 }
 0x11c   :  { %10077 = vst [vmem:[#allocation108_spill] sm:$0xff] %v10076_v7  ;;  %v10081_v7 = vmov 0  ;;  %vm5551_vm15 = vmand %vm10084_vm0, %vm10083_vm6  ;;  %vm10094_vm8 = vcmp.le.f32.partialorder %v4609_v35, 0.0  ;;  %vm10096_vm9 = vnez %v10095_v61  ;;  %v10097_v40 = vmov 0  ;;  %v10111_v61 = vld [vmem:[#allocation66_spill] sm:$0xff] }
 0x11d   :  { %v10082_v7 = vsel %vm5543_vm1, 4294967295, %v10081_v7  ;;  %v10086_v19 = vsel %vm5551_vm15, 4294967295, %v10085_v19  ;;  %vm5559_vm5 = vmand %vm10090_vm7, %vm10088_vm11  ;;  %vm10100_vm6 = vcmp.le.f32.partialorder %v9999_v29, 0.0  ;;  %vm10102_vm0 = vnez %v10101_v50 }
 0x11e   :  { %10087 = vst [vmem:[#allocation101_spill] sm:$0xff] %v10086_v19  ;;  %v10092_v62 = vsel %vm5559_vm5, 4294967295, %v10091_v62  ;;  %vm5567_vm1 = vmor %vm10096_vm9, %vm10094_vm8  ;;  %vm10106_vm11 = vmmov 1   ;;  %vm10112_vm5 = vcmp.gt.f32.partialorder %v4770_v9, 0.0  ;;  %v10114_v50 = vmov 0 }
 0x11f   :  { %10093 = vst [vmem:[#allocation114_spill] sm:$0xff] %v10092_v62  ;;  %v10098_v40 = vsel %vm5567_vm1, 4294967295, %v10097_v40  ;;  %vm5575_vm15 = vmor %vm10102_vm0, %vm10100_vm6  ;;  %v10108_v62 = vmov 0  ;;  %vm10116_vm6 = vcmp.le.f32.partialorder %v9229_v60, 0.0  ;;  %v10118_v53 = vmov 0 }
 0x120   :  { %10099 = vst [vmem:[#allocation115_spill] sm:$0xff] %v10098_v40  ;;  %v10104_v22 = vsel %vm5575_vm15, 4294967295, %v10103_v22  ;;  %vm5582_vm7 = vmxor %vm5067_vm14, %vm10106_vm11  ;;  %vm10121_vm0 = vcmp.le.f32.partialorder %v9704_v38, 0.0  ;;  %v10124_v19 = vmov 0  ;;  %v10128_v40 = vld [vmem:[#allocation85_spill] sm:$0xff]  ;;  %v10130_v60 = vmov 0 }
 0x121   :  { %10105 = vst [vmem:[#allocation57_spill] sm:$0xff] %v10104_v22  ;;  %v10109_v62 = vsel %vm5582_vm7, 4294967295, %v10108_v62  ;;  %vm5592_vm1 = vmand %vm5078_vm10, %vm10112_vm5  ;;  %vm10127_vm10 = vcmp.le.f32.partialorder %v4655_v3, 0.0  ;;  %vm10129_vm5 = vnez %v10128_v40  ;;  %v10134_v22 = vld [vmem:[#allocation79_spill] sm:$0xff]  ;;  %v10136_v38 = vmov 0 }
 0x122   :  { %10110 = vst [vmem:[#allocation84_spill] sm:$0xff] %v10109_v62  ;;  %v10115_v50 = vsel %vm5592_vm1, 4294967295, %v10114_v50  ;;  %vm5600_vm14 = vmand %vm5086_vm4, %vm10116_vm6  ;;  %v10122_v62 = vld [vmem:[#allocation105_spill] sm:$0xff]  ;;  %vm10133_vm4 = vcmp.le.f32.partialorder %v10021_v39, 0.0  ;;  %vm10135_vm6 = vnez %v10134_v22  ;;  %v10142_v40 = vld [vmem:[#allocation71_spill] sm:$0xff]  ;;  %v10150_v22 = vmov 0 }
 0x123   :  { %v10119_v53 = vsel %vm5600_vm14, 4294967295, %v10118_v53  ;;  %vm10123_vm9 = vnez %v10122_v62  ;;  %vm5616_vm1 = vmor %vm10129_vm5, %vm10127_vm10  ;;  %v10138_v62 = vld [vmem:[#allocation102_spill] sm:$0xff]  ;;  %vm10143_vm5 = vcmp.gt.f32.partialorder %v4809_v63, 0.0  ;;  %vm10153_vm10 = vnez %v9842_v17 }
 0x124   :  { %10120 = vst [vmem:[#allocation96_spill] sm:$0xff] %v10119_v53  ;;  %vm5608_vm8 = vmand %vm10123_vm9, %vm10121_vm0  ;;  %v10131_v60 = vsel %vm5616_vm1, 4294967295, %v10130_v60  ;;  %vm10139_vm9 = vnez %v10138_v62  ;;  %v10146_v53 = vmov 0  ;;  %v10154_v62 = vmov 0 }
 0x125   :  { %v10125_v19 = vsel %vm5608_vm8, 4294967295, %v10124_v19  ;;  %10132 = vst [vmem:[#allocation116_spill] sm:$0xff] %v10131_v60  ;;  %vm5624_vm14 = vmor %vm10135_vm6, %vm10133_vm4  ;;  %v10144_v60 = vld [vmem:[#allocation67_spill] sm:$0xff]  ;;  %vm10148_vm4 = vcmp.le.f32.partialorder %v9475_v30, 0.0  ;;  %vm10149_vm6 = vnez %v9837_v16  ;;  %v10164_v16 = vmov 0 }
 0x126   :  { %10126 = vst [vmem:[#allocation69_spill] sm:$0xff] %v10125_v19  ;;  %v10137_v38 = vsel %vm5624_vm14, 4294967295, %v10136_v38  ;;  %vm5631_vm0 = vmxor %vm10139_vm9, %vm10106_vm11  ;;  %v10140_v19 = vmov 0  ;;  %vm10145_vm8 = vnez %v10144_v60  ;;  %vm10152_vm9 = vcmp.le.f32.partialorder %v9726_v0, 0.0  ;;  %v2667_v30 = vld [vmem:[%s8632_s1 + $0x50] sm:$0xff] }
 0x127   :  { %v10141_v19 = vsel %vm5631_vm0, 4294967295, %v10140_v19  ;;  %vm5640_vm1 = vmand %vm10145_vm8, %vm10143_vm5  ;;  %vm10156_vm8 = vcmp.le.f32.partialorder %v4720_v11, 0.0  ;;  %vm10157_vm5 = vnez %v9847_v25  ;;  %v10162_v0 = vmov 0  ;;  %v5686_v25 = vld [vmem:[%s8632_s1 + $0xa0] sm:$0xff] }
 0x128   :  { %v10147_v53 = vsel %vm5640_vm1, 4294967295, %v10146_v53  ;;  %vm5648_vm14 = vmand %vm10149_vm6, %vm10148_vm4  ;;  %vm10160_vm4 = vcmp.le.f32.partialorder %v10045_v14, 0.0  ;;  %vm10161_vm6 = vnez %v9851_v41  ;;  %v10168_v17 = vmov 0 }
 0x129   :  { %v10151_v22 = vsel %vm5648_vm14, 4294967295, %v10150_v22  ;;  %vm5656_vm0 = vmand %vm10153_vm10, %vm10152_vm9  ;;  %v10172_v41 = vmov 0  ;;  %vm10175_vm9 = vnez %v9864_v31  ;;  %v10191_v31 = vmov 0 }
 0x12a   :  { %v10155_v62 = vsel %vm5656_vm0, 4294967295, %v10154_v62  ;;  %vm5664_vm1 = vmor %vm10157_vm5, %vm10156_vm8  ;;  %vm10166_vm8 = vcmp.gt.f32.partialorder %v4659_v55, 0.0  ;;  %vm10167_vm5 = vnez %v9860_v49  ;;  %vm10174_vm0 = vcmp.le.f32.partialorder %v5529_v34, 0.0 }
 0x12b   :  { %vm5672_vm14 = vmor %vm10161_vm6, %vm10160_vm4  ;;  %vm10171_vm6 = vnez %v9872_v43  ;;  %v10176_v55 = vmov 0  ;;  %v10187_v49 = vmov 0  ;;  %v10198_v43 = vld [vmem:[#allocation106_spill] sm:$0xff]  ;;  %v10200_v60 = vmov 0 }
 0x12c   :  { %v10163_v0 = vsel %vm5672_vm14, 4294967295, %v10162_v0  ;;  %vm5679_vm10 = vmxor %vm5168_vm2, %vm10106_vm11  ;;  %vm10170_vm2 = vcmp.le.f32.partialorder %v9264_v37, 0.0  ;;  %v10181_v37 = vmov 0 }
 0x12d   :  { %v10165_v16 = vsel %vm5679_vm10, 4294967295, %v10164_v16  ;;  %vm5693_vm4 = vmand %vm10167_vm5, %vm10166_vm8  ;;  %vm10179_vm8 = vcmp.le.f32.partialorder %v5535_v28, 0.0  ;;  %vm10180_vm5 = vnez %v9868_v48  ;;  %v10194_v48 = vld [vmem:[#allocation107_spill] sm:$0xff] }
 0x12e   :  { %v10169_v17 = vsel %vm5693_vm4, 4294967295, %v10168_v17  ;;  %vm5701_vm10 = vmand %vm10171_vm6, %vm10170_vm2  ;;  %vm10184_vm2 = vcmp.le.f32.partialorder %v9758_v32, 0.0  ;;  %vm10186_vm6 = vnez %v10185_v2  ;;  %v10196_v32 = vmov 0  ;;  %v10203_v2 = vld [vmem:[#allocation68_spill] sm:$0xff] }
 0x12f   :  { %v10173_v41 = vsel %vm5701_vm10, 4294967295, %v10172_v41  ;;  %vm5709_vm14 = vmand %vm10175_vm9, %vm10174_vm0  ;;  %vm10189_vm0 = vcmp.le.f32.partialorder %v4770_v9, 0.0  ;;  %vm10190_vm9 = vnez %v9883_v58  ;;  %v5755_v58 = vld [vmem:[%s8632_s1 + $0xa8] sm:$0xff] }
 0x130   :  { %v10177_v55 = vsel %vm5709_vm14, 4294967295, %v10176_v55  ;;  %vm5717_vm4 = vmand %vm10180_vm5, %vm10179_vm8  ;;  %vm10193_vm8 = vcmp.le.f32.partialorder %v10078_v15, 0.0  ;;  %vm10195_vm5 = vnez %v10194_v48  ;;  %v10205_v48 = vmov 0 }
 0x131   :  { %10178 = vst [vmem:[#allocation117_spill] sm:$0xff] %v10177_v55  ;;  %v10182_v37 = vsel %vm5717_vm4, 4294967295, %v10181_v37  ;;  %vm5725_vm10 = vmand %vm10186_vm6, %vm10184_vm2  ;;  %vm10199_vm2 = vnez %v10198_v43  ;;  %v10209_v43 = vmov 0  ;;  %v10213_v55 = vld [vmem:[#allocation100_spill] sm:$0xff] }
 0x132   :  { %10183 = vst [vmem:[#allocation62_spill] sm:$0xff] %v10182_v37  ;;  %v10188_v49 = vsel %vm5725_vm10, 4294967295, %v10187_v49  ;;  %vm5733_vm14 = vmor %vm10190_vm9, %vm10189_vm0  ;;  %vm10202_vm9 = vcmp.gt.f32.partialorder %v4724_v33, 0.0  ;;  %vm10208_vm10 = vnez %v9906_v59  ;;  %v10211_v37 = vld [vmem:[#allocation44_spill] sm:$0xff]  ;;  %vm10214_vm0 = vnez %v10213_v55  ;;  %v10225_v59 = vld [vmem:[#allocation45_spill] sm:$0xff] }
 0x133   :  { %v10192_v31 = vsel %vm5733_vm14, 4294967295, %v10191_v31  ;;  %vm5741_vm4 = vmor %vm10195_vm5, %vm10193_vm8  ;;  %vm10204_vm8 = vnez %v10203_v2  ;;  %v10215_v33 = vmov 0  ;;  %v10219_v2 = vld [vmem:[#allocation109_spill] sm:$0xff]  ;;  %v10230_v55 = vld [vmem:[#allocation98_spill] sm:$0xff] }
 0x134   :  { %v10197_v32 = vsel %vm5741_vm4, 4294967295, %v10196_v32  ;;  %vm5748_vm6 = vmxor %vm10199_vm2, %vm10106_vm11  ;;  %vm10207_vm2 = vcmp.le.f32.partialorder %v9530_v26, 0.0  ;;  %vm10212_vm4 = vcmp.le.f32.partialorder %v10211_v37, 0.0  ;;  %v10221_v26 = vmov 0 }
 0x135   :  { %v10201_v60 = vsel %vm5748_vm6, 4294967295, %v10200_v60  ;;  %vm5762_vm5 = vmand %vm10204_vm8, %vm10202_vm9  ;;  %vm10218_vm9 = vcmp.le.f32.partialorder %v4809_v63, 0.0  ;;  %vm10220_vm8 = vnez %v10219_v2  ;;  %v10227_v37 = vmov 0  ;;  %v5808_v2 = vld [vmem:[%s8632_s1 + $0xb0] sm:$0xff] }
 0x136   :  { %v10206_v48 = vsel %vm5762_vm5, 4294967295, %v10205_v48  ;;  %vm5770_vm6 = vmand %vm10208_vm10, %vm10207_vm2  ;;  %vm10224_vm10 = vcmp.le.f32.partialorder %v10111_v61, 0.0  ;;  %vm10226_vm2 = vnez %v10225_v59  ;;  %v10237_v59 = vmov 0 }
 0x137   :  { %v10210_v43 = vsel %vm5770_vm6, 4294967295, %v10209_v43  ;;  %vm5778_vm14 = vmand %vm10214_vm0, %vm10212_vm4  ;;  %vm10231_vm4 = vnez %v10230_v55  ;;  %v10240_v55 = vld [vmem:[#allocation46_spill] sm:$0xff] }
 0x138   :  { %v10216_v33 = vsel %vm5778_vm14, 4294967295, %v10215_v33  ;;  %vm5786_vm5 = vmor %vm10220_vm8, %vm10218_vm9  ;;  %vm10235_vm8 = vcmp.le.f32.partialorder %v9297_v23, 0.0  ;;  %v10249_v23 = vmov 0 }
 0x139   :  { %10217 = vst [vmem:[#allocation110_spill] sm:$0xff] %v10216_v33  ;;  %v10222_v26 = vsel %vm5786_vm5, 4294967295, %v10221_v26  ;;  %vm5794_vm6 = vmor %vm10226_vm2, %vm10224_vm10  ;;  %v10232_v33 = vmov 0  ;;  %vm10236_vm10 = vnez %v9937_v56  ;;  %v10251_v56 = vld [vmem:[#allocation70_spill] sm:$0xff] }
 0x13a   :  { %10223 = vst [vmem:[#allocation51_spill] sm:$0xff] %v10222_v26  ;;  %v10228_v37 = vsel %vm5794_vm6, 4294967295, %v10227_v37  ;;  %vm5801_vm0 = vmxor %vm10231_vm4, %vm10106_vm11  ;;  %vm10241_vm4 = vcmp.le.f32.partialorder %v10240_v55, 0.0  ;;  %vm10246_vm6 = vcmp.le.f32.partialorder %v10142_v40, 0.0  ;;  %v10247_v26 = vld [vmem:[#allocation86_spill] sm:$0xff]  ;;  %v10262_v55 = vmov 0 }
 0x13b   :  { %10229 = vst [vmem:[#allocation97_spill] sm:$0xff] %v10228_v37  ;;  %v10233_v33 = vsel %vm5801_vm0, 4294967295, %v10232_v33  ;;  %vm5815_vm2 = vmand %vm10236_vm10, %vm10235_vm8  ;;  %v10242_v37 = vld [vmem:[#allocation95_spill] sm:$0xff]  ;;  %vm10248_vm9 = vnez %v10247_v26  ;;  %vm10252_vm8 = vnez %v10251_v56  ;;  %v10257_v26 = vmov 0 }
 0x13c   :  { %10234 = vst [vmem:[#allocation87_spill] sm:$0xff] %v10233_v33  ;;  %v10238_v59 = vsel %vm5815_vm2, 4294967295, %v10237_v59  ;;  %vm10243_vm14 = vnez %v10242_v37  ;;  %v10244_v33 = vmov 0  ;;  %vm5831_vm5 = vmor %vm10248_vm9, %vm10246_vm6  ;;  %v5845_v37 = vld [vmem:[%s8632_s1 + $0xb8] sm:$0xff]  ;;  %vm10256_vm6 = vnez %v9960_v18  ;;  %v10265_v56 = vld [vmem:[#allocation111_spill] sm:$0xff] }
 0x13d   :  { %10239 = vst [vmem:[#allocation74_spill] sm:$0xff] %v10238_v59  ;;  %vm5823_vm0 = vmand %vm10243_vm14, %vm10241_vm4  ;;  %v10250_v23 = vsel %vm5831_vm5, 4294967295, %v10249_v23  ;;  %v10253_v59 = vmov 0  ;;  %vm10255_vm4 = vcmp.le.f32.partialorder %v9486_v52, 0.0  ;;  %vm10264_vm5 = vcmp.le.f32.partialorder %v5686_v25, 0.0  ;;  %v10269_v18 = vld [vmem:[#allocation55_spill] sm:$0xff] }
 0x13e   :  { %v10245_v33 = vsel %vm5823_vm0, 4294967295, %v10244_v33  ;;  %vm5838_vm10 = vmxor %vm10252_vm8, %vm10106_vm11  ;;  %vm10260_vm8 = vcmp.le.f32.partialorder %v9856_v51, 0.0  ;;  %vm10261_vm0 = vnez %v9965_v1  ;;  %vm10266_vm14 = vnez %v10265_v56  ;;  %v5882_v51 = vld [vmem:[%s8632_s1 + $0xc0] sm:$0xff] }
 0x13f   :  { %v10254_v59 = vsel %vm5838_vm10, 4294967295, %v10253_v59  ;;  %vm5852_vm9 = vmand %vm10256_vm6, %vm10255_vm4  ;;  %v10267_v52 = vmov 0  ;;  %vm10270_vm4 = vnez %v10269_v18  ;;  %10273 = vst [vmem:[#allocation63_spill] sm:$0xff] %v5882_v51  ;;  %v10276_v1 = vmov 0  ;;  %v10284_v18 = vld [vmem:[#allocation49_spill] sm:$0xff] }
 0x140   :  { %v10258_v26 = vsel %vm5852_vm9, 4294967295, %v10257_v26  ;;  %vm5860_vm10 = vmand %vm10261_vm0, %vm10260_vm8  ;;  %vm10274_vm8 = vcmp.le.f32.partialorder %v9514_v5, 0.0  ;;  %v10281_v56 = vmov 0  ;;  %vm10285_vm0 = vnez %v10284_v18 }
 0x141   :  { %10259 = vst [vmem:[#allocation50_spill] sm:$0xff] %v10258_v26  ;;  %v10263_v55 = vsel %vm5860_vm10, 4294967295, %v10262_v55  ;;  %vm5868_vm2 = vmor %vm10266_vm14, %vm10264_vm5  ;;  %v10271_v26 = vmov 0  ;;  %vm10275_vm5 = vnez %v9982_v54  ;;  %vm10280_vm10 = vnez %v9986_v45 }
 0x142   :  { %v10268_v52 = vsel %vm5868_vm2, 4294967295, %v10267_v52  ;;  %vm5875_vm6 = vmxor %vm10270_vm4, %vm10106_vm11  ;;  %vm10279_vm4 = vcmp.le.f32.partialorder %v9896_v46, 0.0  ;;  %vm10283_vm2 = vcmp.le.f32.partialorder %v5755_v58, 0.0  ;;  %v10286_v5 = vmov 0  ;;  %v5919_v46 = vld [vmem:[%s8632_s1 + $0xc8] sm:$0xff] }
 0x143   :  { %v10272_v26 = vsel %vm5875_vm6, 4294967295, %v10271_v26  ;;  %vm5889_vm14 = vmand %vm10275_vm5, %vm10274_vm8  ;;  %10291 = vst [vmem:[#allocation104_spill] sm:$0xff] %v5919_v46  ;;  %vm10292_vm5 = vcmp.le.f32.partialorder %v9543_v8, 0.0  ;;  %v10294_v45 = vmov 0  ;;  %v10298_v18 = vmov 0 }
 0x144   :  { %v10277_v1 = vsel %vm5889_vm14, 4294967295, %v10276_v1  ;;  %vm5897_vm6 = vmand %vm10280_vm10, %vm10279_vm4  ;;  %vm10297_vm4 = vnez %v10008_v57  ;;  %vm10302_vm10 = vnez %v10012_v27  ;;  %v10303_v8 = vmov 0  ;;  %v5963_v27 = vld [vmem:[%s8632_s1 + $0xd0] sm:$0xff]  ;;  %v5969_v57 = vld [vmem:[%s8632_s1 + $0xd8] sm:$0xff] }
 0x145   :  { %10278 = vst [vmem:[#allocation56_spill] sm:$0xff] %v10277_v1  ;;  %v10282_v56 = vsel %vm5897_vm6, 4294967295, %v10281_v56  ;;  %vm5905_vm9 = vmor %vm10285_vm0, %vm10283_vm2  ;;  %v10289_v1 = vmov 0  ;;  %vm10293_vm2 = vnez %v10003_v20  ;;  %vm10301_vm6 = vcmp.le.f32.partialorder %v5808_v2, 0.0 }
 0x146   :  { %v10287_v5 = vsel %vm5905_vm9, 4294967295, %v10286_v5  ;;  %vm5912_vm8 = vmxor %vm5388_vm13, %vm10106_vm11  ;;  %vm10296_vm13 = vcmp.le.f32.partialorder %v9931_v47, 0.0  ;;  %v10306_v20 = vmov 0  ;;  %v10309_v47 = vmov 0 }
 0x147   :  { %v10290_v1 = vsel %vm5912_vm8, 4294967295, %v10289_v1  ;;  %vm5926_vm0 = vmand %vm10293_vm2, %vm10292_vm5  ;;  %vm10305_vm5 = vnez %v10016_v13  ;;  %v5975_v13 = vld [vmem:[%s8632_s1 + $0xe0] sm:$0xff]  ;;  %v10313_v54 = vmov 0 }
 0x148   :  { %v10295_v45 = vsel %vm5926_vm0, 4294967295, %v10294_v45  ;;  %vm5934_vm8 = vmand %vm10297_vm4, %vm10296_vm13 }
 0x149   :  { %v10299_v18 = vsel %vm5934_vm8, 4294967295, %v10298_v18  ;;  %vm5942_vm9 = vmor %vm10302_vm10, %vm10301_vm6  ;;  %vm10312_vm6 = vnez %v10025_v21  ;;  %vm10315_vm10 = vcmp.le.f32.partialorder %v9955_v4, 0.0  ;;  %vm10316_vm8 = vnez %v10029_v42  ;;  %v10344_v4 = vld [vmem:[#allocation82_spill] sm:$0xff] }
 0x14a   :  { %10300 = vst [vmem:[#allocation99_spill] sm:$0xff] %v10299_v18  ;;  %v10304_v8 = vsel %vm5942_vm9, 4294967295, %v10303_v8  ;;  %vm5949_vm2 = vmxor %vm10305_vm5, %vm10106_vm11  ;;  %vm10311_vm5 = vcmp.le.f32.partialorder %v9578_v12, 0.0  ;;  %vm10320_vm9 = vcmp.le.f32.partialorder %v5845_v37, 0.0  ;;  %v10321_v18 = vld [vmem:[#allocation112_spill] sm:$0xff]  ;;  %v10323_v12 = vmov 0 }
 0x14b   :  { %v10307_v20 = vsel %vm5949_vm2, 4294967295, %v10306_v20  ;;  %vm5956_vm13 = vmxor %vm5430_vm3, %vm10106_vm11  ;;  %vm10322_vm4 = vnez %v10321_v18  ;;  %v10326_v21 = vmov 0  ;;  %v10330_v42 = vmov 0 }
 0x14c   :  { %10308 = vst [vmem:[#allocation61_spill] sm:$0xff] %v10307_v20  ;;  %v10310_v47 = vsel %vm5956_vm13, 4294967295, %v10309_v47  ;;  %vm5988_vm2 = vmand %vm10312_vm6, %vm10311_vm5  ;;  %v10317_v20 = vmov 0  ;;  %vm10325_vm6 = vnez %v10038_v36  ;;  %v10334_v18 = vmov 0  ;;  %v10338_v36 = vld [vmem:[#allocation113_spill] sm:$0xff] }
 0x14d   :  { %v10314_v54 = vsel %vm5988_vm2, 4294967295, %v10313_v54  ;;  %vm5996_vm3 = vmand %vm10316_vm8, %vm10315_vm10  ;;  %vm10332_vm10 = vcmp.le.f32.partialorder %v9609_v44, 0.0  ;;  %v10346_v44 = vmov 0 }
 0x14e   :  { %v10318_v20 = vsel %vm5996_vm3, 4294967295, %v10317_v20  ;;  %vm6004_vm0 = vmor %vm10322_vm4, %vm10320_vm9  ;;  %vm10333_vm9 = vnez %v10049_v24  ;;  %vm10339_vm3 = vnez %v10338_v36  ;;  %v10349_v24 = vld [vmem:[#allocation83_spill] sm:$0xff]  ;;  %v10356_v36 = vld [vmem:[#allocation108_spill] sm:$0xff] }
 0x14f   :  { %10319 = vst [vmem:[#allocation64_spill] sm:$0xff] %v10318_v20  ;;  %v10324_v12 = vsel %vm6004_vm0, 4294967295, %v10323_v12  ;;  %vm6011_vm5 = vmxor %vm10325_vm6, %vm10106_vm11  ;;  %vm10337_vm6 = vcmp.le.f32.partialorder %v9978_v10, 0.0  ;;  %vm10345_vm0 = vnez %v10344_v4  ;;  %v10354_v10 = vld [vmem:[#allocation78_spill] sm:$0xff]  ;;  %v875_v4 = vand.u32 2147483647, %v5535_v28 }
 0x150   :  { %v10327_v21 = vsel %vm6011_vm5, 4294967295, %v10326_v21  ;;  %vm6018_vm8 = vmxor %vm5472_vm12, %vm10106_vm11  ;;  %vm10343_vm12 = vcmp.le.f32.partialorder %v5882_v51, 0.0  ;;  %v10370_v28 = vld [vmem:[#allocation115_spill] sm:$0xff]  ;;  %v10389_v20 = vmov 0 }
 0x151   :  { %10328 = vst [vmem:[#allocation105_spill] sm:$0xff] %v10327_v21  ;;  %v10331_v42 = vsel %vm6018_vm8, 4294967295, %v10330_v42  ;;  %vm6026_vm4 = vmand %vm10333_vm9, %vm10332_vm10  ;;  %v10340_v21 = vmov 0  ;;  %vm10350_vm10 = vnez %v10349_v24  ;;  %v10360_v24 = vmov 0 }
 0x152   :  { %v10335_v18 = vsel %vm6026_vm4, 4294967295, %v10334_v18  ;;  %vm6034_vm5 = vmand %vm10339_vm3, %vm10337_vm6  ;;  %vm10355_vm3 = vnez %v10354_v10  ;;  %vm10357_vm6 = vnez %v10356_v36  ;;  %vm10369_vm4 = vcmp.le.f32.partialorder %v5919_v46, 0.0  ;;  %v10474_v10 = vld [vmem:[#allocation74_spill] sm:$0xff] }
 0x153   :  { %10336 = vst [vmem:[#allocation85_spill] sm:$0xff] %v10335_v18  ;;  %v10341_v21 = vsel %vm6034_vm5, 4294967295, %v10340_v21  ;;  %vm6042_vm2 = vmor %vm10345_vm0, %vm10343_vm12  ;;  %v10351_v18 = vmov 0  ;;  %vm10358_vm0 = vcmp.le.f32.partialorder %v4609_v35, 0.0  ;;  %vm10359_vm12 = vnez %v10082_v7  ;;  %v2662_v7 = vld [vmem:[%s8632_s1 + $0x28] sm:$0xff] }
 0x154   :  { %10342 = vst [vmem:[#allocation79_spill] sm:$0xff] %v10341_v21  ;;  %v10347_v44 = vsel %vm6042_vm2, 4294967295, %v10346_v44  ;;  %vm6049_vm9 = vmxor %vm10350_vm10, %vm10106_vm11  ;;  %v874_v21 = vand.u32 2147483647, %v5529_v34  ;;  %v10366_v34 = vmov 0  ;;  %vm10371_vm14 = vnez %v10370_v28  ;;  %v2660_v28 = vld [vmem:[%s8632_s1 + $0x18] sm:$0xff] }
 0x155   :  { %10348 = vst [vmem:[#allocation102_spill] sm:$0xff] %v10347_v44  ;;  %v10352_v18 = vsel %vm6049_vm9, 4294967295, %v10351_v18  ;;  %v2659_v44 = vld [vmem:[%s8632_s1 + $0x10] sm:$0xff]  ;;  %vm6066_vm10 = vmand %vm10359_vm12, %vm10358_vm0  ;;  %vm10363_vm9 = vcmp.le.f32.partialorder %v9999_v29, 0.0  ;;  %v10372_v35 = vmov 0  ;;  %v10379_v29 = vld [vmem:[#allocation114_spill] sm:$0xff] }
 0x156   :  { %10353 = vst [vmem:[#allocation67_spill] sm:$0xff] %v10352_v18  ;;  %v876_v51 = vand.u32 2147483647, %v2659_v44  ;;  %v10361_v24 = vsel %vm6066_vm10, 4294967295, %v10360_v24  ;;  %v10364_v18 = vld [vmem:[#allocation101_spill] sm:$0xff]  ;;  %vm6082_vm8 = vmor %vm10371_vm14, %vm10369_vm4  ;;  %v10376_v44 = vmov 0  ;;  %vm10383_vm14 = vnez %v10115_v50 }
 0x157   :  { %10362 = vst [vmem:[#allocation103_spill] sm:$0xff] %v10361_v24  ;;  %vm10365_vm5 = vnez %v10364_v18  ;;  %v10373_v35 = vsel %vm6082_vm8, 4294967295, %v10372_v35  ;;  %vm6089_vm0 = vmxor %vm5575_vm15, %vm10106_vm11  ;;  %vm10382_vm15 = vcmp.le.f32.partialorder %v4655_v3, 0.0  ;;  %v10384_v46 = vmov 0 }
 0x158   :  { %vm6074_vm2 = vmand %vm10365_vm5, %vm10363_vm9  ;;  %10374 = vst [vmem:[#allocation106_spill] sm:$0xff] %v10373_v35  ;;  %v10377_v44 = vsel %vm6089_vm0, 4294967295, %v10376_v44  ;;  %vm10380_vm5 = vnez %v10379_v29  ;;  %v2661_v35 = vld [vmem:[%s8632_s1 + $0x20] sm:$0xff]  ;;  %vm10386_vm12 = vcmp.le.f32.partialorder %v10021_v39, 0.0  ;;  %v10395_v3 = vmov 0 }
 0x159   :  { %v10367_v34 = vsel %vm6074_vm2, 4294967295, %v10366_v34  ;;  %10378 = vst [vmem:[#allocation68_spill] sm:$0xff] %v10377_v44  ;;  %v878_v24 = vand.u32 2147483647, %v2661_v35  ;;  %v879_v44 = vand.u32 2147483647, %v2662_v7  ;;  %vm6110_vm4 = vmand %vm10383_vm14, %vm10382_vm15  ;;  %vm10398_vm15 = vnez %v10137_v38 }
 0x15a   :  { %10368 = vst [vmem:[#allocation107_spill] sm:$0xff] %v10367_v34  ;;  %v877_v34 = vand.u32 2147483647, %v2660_v28  ;;  %v10385_v46 = vsel %vm6110_vm4, 4294967295, %v10384_v46  ;;  %v10387_v28 = vld [vmem:[#allocation96_spill] sm:$0xff]  ;;  %vm10392_vm2 = vcmp.le.f32.partialorder %v5963_v27, 0.0  ;;  %vm6133_vm14 = vmxor %vm10398_vm15, %vm10106_vm11 }
 0x15b   :  { %vm10388_vm9 = vnez %v10387_v28  ;;  %v10393_v35 = vld [vmem:[#allocation116_spill] sm:$0xff]  ;;  %v10399_v50 = vmov 0  ;;  %v10402_v39 = vld [vmem:[#allocation69_spill] sm:$0xff]  ;;  %v2663_v7 = vld [vmem:[%s8632_s1 + $0x30] sm:$0xff]  ;;  %vm10413_vm4 = vcmp.le.f32.partialorder %v5969_v57, 0.0 }
 0x15c   :  { %vm6118_vm0 = vmand %vm10388_vm9, %vm10386_vm12  ;;  %vm10394_vm8 = vnez %v10393_v35  ;;  %v10400_v50 = vsel %vm6133_vm14, 4294967295, %v10399_v50  ;;  %vm10403_vm9 = vnez %v10402_v39  ;;  %vm10404_vm12 = vnez %v10141_v19  ;;  %v2664_v35 = vld [vmem:[%s8632_s1 + $0x38] sm:$0xff]  ;;  %v2665_v38 = vld [vmem:[%s8632_s1 + $0x40] sm:$0xff] }
 0x15d   :  { %v10390_v20 = vsel %vm6118_vm0, 4294967295, %v10389_v20  ;;  %vm6126_vm10 = vmor %vm10394_vm8, %vm10392_vm2  ;;  %10401 = vst [vmem:[#allocation45_spill] sm:$0xff] %v10400_v50  ;;  %v880_v28 = vand.u32 2147483647, %v2663_v7  ;;  %v882_v50 = vand.u32 2147483647, %v2665_v38  ;;  %vm10406_vm8 = vnez %v10147_v53 }
 0x15e   :  { %10391 = vst [vmem:[#allocation100_spill] sm:$0xff] %v10390_v20  ;;  %v10396_v3 = vsel %vm6126_vm10, 4294967295, %v10395_v3  ;;  %v881_v20 = vand.u32 2147483647, %v2664_v35  ;;  %vm10405_vm2 = vcmp.le.f32.partialorder %v4720_v11, 0.0  ;;  %vm10409_vm0 = vcmp.le.f32.partialorder %v10045_v14, 0.0  ;;  %vm6170_vm13 = vmor %vm5664_vm1, %vm10413_vm4 }
 0x15f   :  { %10397 = vst [vmem:[#allocation109_spill] sm:$0xff] %v10396_v3  ;;  %vm6154_vm15 = vmand %vm10406_vm8, %vm10405_vm2  ;;  %v10407_v3 = vmov 0  ;;  %vm10410_vm14 = vnez %v10151_v22  ;;  %v10411_v7 = vmov 0  ;;  %v10414_v11 = vmov 0  ;;  %v2666_v14 = vld [vmem:[%s8632_s1 + $0x48] sm:$0xff]  ;;  %v10526_v39 = vld [vmem:[#allocation64_spill] sm:$0xff] }
 0x160   :  { %v10408_v3 = vsel %vm6154_vm15, 4294967295, %v10407_v3  ;;  %vm6162_vm10 = vmand %vm10410_vm14, %vm10409_vm0  ;;  %v10415_v11 = vsel %vm6170_vm13, 4294967295, %v10414_v11  ;;  %vm10416_vm2 = vnez %v10163_v0  ;;  %v10417_v53 = vmov 0  ;;  %v2668_v0 = vld [vmem:[%s8632_s1 + $0x58] sm:$0xff] }
 0x161   :  { %v10412_v7 = vsel %vm6162_vm10, 4294967295, %v10411_v7  ;;  %vm6177_vm8 = vmxor %vm10416_vm2, %vm10106_vm11  ;;  %v883_v22 = vand.u32 2147483647, %v2666_v14  ;;  %v884_v35 = vand.u32 2147483647, %v2667_v30  ;;  %vm10422_vm1 = vcmp.le.f32.partialorder %v4770_v9, 0.0 }
 0x162   :  { %v10418_v53 = vsel %vm6177_vm8, 4294967295, %v10417_v53  ;;  %v885_v38 = vand.u32 2147483647, %v2668_v0  ;;  %vm10423_vm4 = vnez %v10169_v17  ;;  %vm10426_vm10 = vcmp.le.f32.partialorder %v10078_v15, 0.0  ;;  %v2669_v15 = vld [vmem:[%s8632_s1 + $0xf0] sm:$0xff] }
 0x163   :  { %10419 = vst [vmem:[#allocation98_spill] sm:$0xff] %v10418_v53  ;;  %vm6198_vm2 = vmand %vm10423_vm4, %vm10422_vm1  ;;  %v10424_v53 = vmov 0  ;;  %vm10427_vm8 = vnez %v10173_v41  ;;  %v10428_v14 = vmov 0  ;;  %vm10431_vm15 = vcmp.le.f32.partialorder %v5975_v13, 0.0 }
 0x164   :  { %v10425_v53 = vsel %vm6198_vm2, 4294967295, %v10424_v53  ;;  %vm6206_vm13 = vmand %vm10427_vm8, %vm10426_vm10  ;;  %vm10432_vm0 = vnez %v10192_v31  ;;  %v10433_v9 = vmov 0  ;;  %vm10436_vm1 = vnez %v10197_v32  ;;  %v2670_v31 = vld [vmem:[%s8632_s1 + $0xf8] sm:$0xff]  ;;  %v10442_v32 = vld [vmem:[#allocation117_spill] sm:$0xff] }
 0x165   :  { %v10429_v14 = vsel %vm6206_vm13, 4294967295, %v10428_v14  ;;  %vm6214_vm14 = vmor %vm10432_vm0, %vm10431_vm15  ;;  %v10437_v17 = vmov 0  ;;  %v904_v41 = vand.u32 2147483647, %v2669_v15  ;;  %v905_v30 = vand.u32 2147483647, %v2670_v31 }
 0x166   :  { %10430 = vst [vmem:[#allocation95_spill] sm:$0xff] %v10429_v14  ;;  %v10434_v9 = vsel %vm6214_vm14, 4294967295, %v10433_v9  ;;  %vm6221_vm4 = vmxor %vm10436_vm1, %vm10106_vm11  ;;  %vm10443_vm15 = vnez %v10442_v32  ;;  %vm10446_vm1 = vcmp.le.f32.partialorder %v4809_v63, 0.0  ;;  %vm10447_vm13 = vnez %v10206_v48  ;;  %v10459_v48 = vld [vmem:[#allocation97_spill] sm:$0xff] }
 0x167   :  { %10435 = vst [vmem:[#allocation86_spill] sm:$0xff] %v10434_v9  ;;  %v10438_v17 = vsel %vm6221_vm4, 4294967295, %v10437_v17  ;;  %v6237_v0 = vsel %vm10443_vm15, %v874_v21, -inf   ;;  %vm6247_vm4 = vmand %vm10447_vm13, %vm10446_vm1  ;;  %vm10450_vm14 = vcmp.le.f32.partialorder %v10111_v61, 0.0  ;;  %vm10451_vm2 = vnez %v10210_v43  ;;  %v10455_v21 = vld [vmem:[#allocation51_spill] sm:$0xff]  ;;  %v10463_v61 = vld [vmem:[#allocation110_spill] sm:$0xff] }
 0x168   :  { %10439 = vst [vmem:[#allocation70_spill] sm:$0xff] %v10438_v17  ;;  %v10444_v17 = vld [vmem:[#allocation62_spill] sm:$0xff]  ;;  %vm6255_vm10 = vmand %vm10451_vm2, %vm10450_vm14  ;;  %v10452_v15 = vmov 0  ;;  %vm10454_vm15 = vcmp.le.f32.partialorder %v5981_v6, 0.0  ;;  %vm10460_vm13 = vnez %v10459_v48  ;;  %vm10464_vm14 = vnez %v10463_v61  ;;  %v10465_v43 = vld [vmem:[#allocation87_spill] sm:$0xff] }
 0x169   :  { %vm10445_vm0 = vnez %v10444_v17  ;;  %v10453_v15 = vsel %vm6255_vm10, 4294967295, %v10452_v15  ;;  %vm6270_vm1 = vmxor %vm10460_vm13, %vm10106_vm11  ;;  %vm10466_vm2 = vnez %v10465_v43  ;;  %v10538_v48 = vmov 0  ;;  %v10540_v61 = vld [vmem:[#allocation79_spill] sm:$0xff]  ;;  %10630 = vst [vmem:[#allocation116_spill] sm:$0xff] %v6237_v0 }
 0x16a   :  { %v6241_v14 = vsel %vm10445_vm0, %v875_v4, -inf   ;;  %vm10456_vm0 = vnez %v10455_v21  ;;  %vm849_vm10 = vmor %vm10466_vm2, %vm10464_vm14  ;;  %vm10470_vm14 = vnez %v10165_v16  ;;  %vm10473_vm2 = vcmp.le.f32.partialorder %v10142_v40, 0.0  ;;  %v10536_v21 = vld [vmem:[#allocation102_spill] sm:$0xff]  ;;  %v10542_v43 = vld [vmem:[#allocation67_spill] sm:$0xff] }
 0x16b   :  { %vm6263_vm8 = vmor %vm10456_vm0, %vm10454_vm15  ;;  %v896_v9 = vand.u32 2147483647, %v5808_v2  ;;  %10629 = vst [vmem:[#allocation96_spill] sm:$0xff] %v6241_v14 }
 0x16c   :  { %vm10467_vm15 = vmor %vm10357_vm6, %vm10355_vm3  ;;  %vm10471_vm3 = vnez %v10155_v62  ;;  %v6332_v62 = vsel %vm849_vm10, %v881_v20, -inf   ;;  %vm10493_vm10 = vnez %v10268_v52  ;;  %v10501_v52 = vmov 0 }
 0x16d   :  { %v6283_v17 = vsel %vm10467_vm15, %v876_v51, -inf   ;;  %vm10468_vm0 = vmor %vm5582_vm7, %vm10380_vm5  ;;  %vm10475_vm7 = vnez %v10474_v10  ;;  %vm10481_vm15 = vnez %v10245_v33  ;;  %v10489_v33 = vld [vmem:[#allocation50_spill] sm:$0xff]  ;;  %10623 = vst [vmem:[#allocation108_spill] sm:$0xff] %v6332_v62 }
 0x16e   :  { %v6290_v31 = vsel %vm10468_vm0, %v877_v34, -inf   ;;  %vm10469_vm13 = vmor %vm10404_vm12, %vm10403_vm9  ;;  %vm10478_vm9 = vnez %v10250_v23  ;;  %vm10482_vm0 = vnez %v10254_v59  ;;  %v2671_v59 = vld [vmem:[%s8632_s1 + $0x60] sm:$0xff]  ;;  %10628 = vst [vmem:[#allocation84_spill] sm:$0xff] %v6283_v17 }
 0x16f   :  { %v6297_v32 = vsel %vm10469_vm13, %v878_v24, -inf   ;;  %vm10472_vm6 = vmor %vm10470_vm14, %vm10471_vm3  ;;  %vm10483_vm14 = vnez %v10201_v60  ;;  %vm10484_vm3 = vnez %v10188_v49  ;;  %v10494_v49 = vmov 0  ;;  %10627 = vst [vmem:[#allocation114_spill] sm:$0xff] %v6290_v31 }
 0x170   :  { %v6304_v51 = vsel %vm10472_vm6, %v879_v44, -inf   ;;  %vm6310_vm5 = vmand %vm10475_vm7, %vm10473_vm2  ;;  %vm10486_vm2 = vnez %v10310_v47  ;;  %vm10487_vm7 = vnez %v10331_v42  ;;  %v886_v20 = vand.u32 2147483647, %v2671_v59  ;;  %v10499_v42 = vld [vmem:[#allocation56_spill] sm:$0xff]  ;;  %v10517_v44 = vld [vmem:[#allocation61_spill] sm:$0xff]  ;;  %10626 = vst [vmem:[#allocation57_spill] sm:$0xff] %v6297_v32 }
 0x171   :  { %vm6317_vm12 = vmxor %vm10478_vm9, %vm10106_vm11  ;;  %v6336_v16 = vsel %vm10486_vm2, %v904_v41, -inf   ;;  %v6340_v23 = vsel %vm10487_vm7, %v905_v30, -inf   ;;  %vm10488_vm9 = vcmp.le.f32.partialorder %v5686_v25, 0.0  ;;  %vm10498_vm7 = vcmp.le.f32.partialorder %v5755_v58, 0.0  ;;  %v10530_v41 = vld [vmem:[#allocation63_spill] sm:$0xff]  ;;  %v10532_v30 = vld [vmem:[#allocation85_spill] sm:$0xff] }
 0x172   :  { %vm850_vm13 = vmor %vm10482_vm0, %vm10481_vm15  ;;  %vm10490_vm15 = vnez %v10489_v33  ;;  %v10544_v59 = vld [vmem:[#allocation104_spill] sm:$0xff]  ;;  %10625 = vst [vmem:[#allocation115_spill] sm:$0xff] %v6304_v51 }
 0x173   :  { %vm10485_vm6 = vmor %vm10483_vm14, %vm10484_vm3  ;;  %vm10496_vm3 = vnez %v10263_v55  ;;  %v6364_v47 = vsel %vm850_vm13, %v882_v50, -inf   ;;  %vm10507_vm13 = vnez %v10290_v1  ;;  %v2672_v55 = vld [vmem:[%s8632_s1 + $0x68] sm:$0xff]  ;;  %v10513_v1 = vmov 0 }
 0x174   :  { %v6330_v40 = vsel %vm10485_vm6, %v880_v28, -inf   ;;  %vm6346_vm0 = vmand %vm10490_vm15, %vm10488_vm9  ;;  %vm10497_vm6 = vnez %v10272_v26  ;;  %vm10500_vm9 = vnez %v10499_v42  ;;  %v10504_v26 = vmov 0  ;;  %v10528_v28 = vld [vmem:[#allocation105_spill] sm:$0xff]  ;;  %v10546_v42 = vld [vmem:[#allocation103_spill] sm:$0xff]  ;;  %10622 = vst [vmem:[#allocation78_spill] sm:$0xff] %v6364_v47 }
 0x175   :  { %vm6353_vm14 = vmxor %vm10493_vm10, %vm10106_vm11  ;;  %vm10503_vm10 = vnez %v10287_v5  ;;  %v887_v24 = vand.u32 2147483647, %v2672_v55  ;;  %v10510_v5 = vmov 0  ;;  %v10524_v50 = vmov 0  ;;  %10624 = vst [vmem:[#allocation101_spill] sm:$0xff] %v6330_v40 }
 0x176   :  { %v10495_v49 = vsel %vm6353_vm14, 4294967295, %v10494_v49  ;;  %vm851_vm2 = vmor %vm10497_vm6, %vm10496_vm3  ;;  %vm10506_vm3 = vnez %v10282_v56  ;;  %v10515_v56 = vld [vmem:[#allocation99_spill] sm:$0xff]  ;;  %v10548_v55 = vmov 0 }
 0x177   :  { %vm6370_vm15 = vmand %vm10500_vm9, %vm10498_vm7  ;;  %v6388_v34 = vsel %vm851_vm2, %v883_v22, -inf   ;;  %vm10508_vm7 = vcmp.le.f32.partialorder %v5808_v2, 0.0  ;;  %vm10509_vm9 = vnez %v10295_v45  ;;  %vm10518_vm2 = vnez %v10517_v44  ;;  %v2673_v45 = vld [vmem:[%s8632_s1 + $0x70] sm:$0xff] }
 0x178   :  { %v10502_v52 = vsel %vm6370_vm15, 4294967295, %v10501_v52  ;;  %vm6377_vm14 = vmxor %vm10503_vm10, %vm10106_vm11  ;;  %v888_v29 = vand.u32 2147483647, %v2673_v45  ;;  %v10552_v44 = vmov 0  ;;  %v10554_v45 = vld [vmem:[#allocation107_spill] sm:$0xff]  ;;  %10621 = vst [vmem:[#allocation83_spill] sm:$0xff] %v6388_v34 }
 0x179   :  { %v10505_v26 = vsel %vm6377_vm14, 4294967295, %v10504_v26  ;;  %vm852_vm6 = vmor %vm10507_vm13, %vm10506_vm3  ;;  %vm10512_vm14 = vnez %v10304_v8  ;;  %vm10516_vm3 = vnez %v10515_v56  ;;  %v10521_v8 = vmov 0  ;;  %v10550_v56 = vld [vmem:[#allocation106_spill] sm:$0xff] }
 0x17a   :  { %vm6394_vm10 = vmand %vm10509_vm9, %vm10508_vm7  ;;  %v6412_v18 = vsel %vm852_vm6, %v884_v35, -inf   ;;  %vm10519_vm7 = vcmp.le.f32.partialorder %v5845_v37, 0.0  ;;  %vm10520_vm9 = vnez %v10314_v54  ;;  %vm10529_vm6 = vnez %v10528_v28  ;;  %v2674_v54 = vld [vmem:[%s8632_s1 + $0x78] sm:$0xff] }
 0x17b   :  { %v10511_v5 = vsel %vm6394_vm10, 4294967295, %v10510_v5  ;;  %vm6401_vm15 = vmxor %vm10512_vm14, %vm10106_vm11  ;;  %v889_v22 = vand.u32 2147483647, %v2674_v54  ;;  %v899_v2 = vand.u32 2147483647, %v10544_v59  ;;  %10620 = vst [vmem:[#allocation82_spill] sm:$0xff] %v6412_v18 }
 0x17c   :  { %v10514_v1 = vsel %vm6401_vm15, 4294967295, %v10513_v1  ;;  %vm853_vm13 = vmor %vm10518_vm2, %vm10516_vm3  ;;  %vm10523_vm15 = vnez %v10324_v12  ;;  %vm10527_vm3 = vnez %v10526_v39  ;;  %v10534_v12 = vmov 0  ;;  %v10556_v39 = vld [vmem:[#allocation68_spill] sm:$0xff] }
 0x17d   :  { %vm6418_vm14 = vmand %vm10520_vm9, %vm10519_vm7  ;;  %v6436_v35 = vsel %vm853_vm13, %v885_v38, -inf   ;;  %vm10531_vm7 = vcmp.le.f32.partialorder %v10530_v41, 0.0  ;;  %vm10533_vm9 = vnez %v10532_v30  ;;  %vm10543_vm13 = vnez %v10542_v43  ;;  %v2675_v38 = vld [vmem:[%s8632_s1 + $0x80] sm:$0xff]  ;;  %v10566_v43 = vld [vmem:[#allocation100_spill] sm:$0xff] }
 0x17e   :  { %v10522_v8 = vsel %vm6418_vm14, 4294967295, %v10521_v8  ;;  %vm6425_vm10 = vmxor %vm10523_vm15, %vm10106_vm11  ;;  %v890_v10 = vand.u32 2147483647, %v2675_v38  ;;  %v10560_v30 = vmov 0  ;;  %v10568_v38 = vld [vmem:[#allocation45_spill] sm:$0xff]  ;;  %10619 = vst [vmem:[#allocation113_spill] sm:$0xff] %v6436_v35 }
 0x17f   :  { %v10525_v50 = vsel %vm6425_vm10, 4294967295, %v10524_v50  ;;  %vm854_vm2 = vmor %vm10529_vm6, %vm10527_vm3  ;;  %vm10537_vm10 = vnez %v10536_v21  ;;  %vm10541_vm3 = vnez %v10540_v61  ;;  %v10562_v21 = vld [vmem:[#allocation109_spill] sm:$0xff]  ;;  %v10564_v61 = vmov 0 }
 0x180   :  { %vm6442_vm15 = vmand %vm10533_vm9, %vm10531_vm7  ;;  %v6460_v33 = vsel %vm854_vm2, %v886_v20, -inf   ;;  %vm10545_vm7 = vcmp.le.f32.partialorder %v10544_v59, 0.0  ;;  %vm10547_vm9 = vnez %v10546_v42  ;;  %vm10557_vm2 = vnez %v10556_v39  ;;  %v2676_v20 = vld [vmem:[%s8632_s1 + $0x88] sm:$0xff] }
 0x181   :  { %v10535_v12 = vsel %vm6442_vm15, 4294967295, %v10534_v12  ;;  %vm6449_vm14 = vmxor %vm10537_vm10, %vm10106_vm11  ;;  %v891_v28 = vand.u32 2147483647, %v2676_v20  ;;  %v10578_v39 = vld [vmem:[#allocation98_spill] sm:$0xff]  ;;  %v6644_v59 = vmov 0.0   ;;  %10618 = vst [vmem:[#allocation81_spill] sm:$0xff] %v6460_v33 }
 0x182   :  { %v10539_v48 = vsel %vm6449_vm14, 4294967295, %v10538_v48  ;;  %vm855_vm6 = vmor %vm10543_vm13, %vm10541_vm3  ;;  %vm10551_vm14 = vnez %v10550_v56  ;;  %vm10555_vm3 = vnez %v10554_v45  ;;  %v10572_v56 = vmov 0 }
 0x183   :  { %vm6466_vm10 = vmand %vm10547_vm9, %vm10545_vm7  ;;  %v6484_v54 = vsel %vm855_vm6, %v887_v24, -inf   ;;  %vm10558_vm7 = vcmp.le.f32.partialorder %v5963_v27, 0.0  ;;  %vm10559_vm9 = vnez %v10385_v46  ;;  %vm10569_vm6 = vnez %v10568_v38  ;;  %v2677_v46 = vld [vmem:[%s8632_s1 + $0x90] sm:$0xff]  ;;  %v10590_v38 = vld [vmem:[#allocation70_spill] sm:$0xff] }
 0x184   :  { %v10549_v55 = vsel %vm6466_vm10, 4294967295, %v10548_v55  ;;  %vm6473_vm15 = vmxor %vm10551_vm14, %vm10106_vm11  ;;  %v892_v24 = vand.u32 2147483647, %v2677_v46  ;;  %v10575_v45 = vmov 0 }
 0x185   :  { %v10553_v44 = vsel %vm6473_vm15, 4294967295, %v10552_v44  ;;  %vm856_vm13 = vmor %vm10557_vm2, %vm10555_vm3  ;;  %vm10563_vm15 = vnez %v10562_v21  ;;  %vm10567_vm3 = vnez %v10566_v43  ;;  %v10588_v43 = vld [vmem:[#allocation95_spill] sm:$0xff]  ;;  %v6670_v21 = vmov 0.0  }
 0x186   :  { %vm6490_vm14 = vmand %vm10559_vm9, %vm10558_vm7  ;;  %v6508_v42 = vsel %vm856_vm13, %v888_v29, -inf   ;;  %vm10570_vm7 = vcmp.le.f32.partialorder %v5969_v57, 0.0  ;;  %vm10571_vm9 = vnez %v10408_v3  ;;  %vm10579_vm13 = vnez %v10578_v39  ;;  %v2678_v3 = vld [vmem:[%s8632_s1 + $0x98] sm:$0xff]  ;;  %s6787_s1 = smov 0  }
 0x187   :  { %v10561_v30 = vsel %vm6490_vm14, 4294967295, %v10560_v30  ;;  %vm6497_vm10 = vmxor %vm10563_vm15, %vm10106_vm11  ;;  %v893_v29 = vand.u32 2147483647, %v2678_v3  ;;  %v6662_v3 = vmov 0.0   ;;  %v6680_v39 = vmov 0.0  }
 0x188   :  { %v10565_v61 = vsel %vm6497_vm10, 4294967295, %v10564_v61  ;;  %vm857_vm2 = vmor %vm10569_vm6, %vm10567_vm3  ;;  %vm10574_vm10 = vnez %v10415_v11  ;;  %vm10577_vm3 = vnez %v10412_v7  ;;  %v10584_v7 = vld [vmem:[#allocation86_spill] sm:$0xff]  ;;  %v6666_v11 = vmov 0.0  }
 0x189   :  { %vm6514_vm15 = vmand %vm10571_vm9, %vm10570_vm7  ;;  %v6532_v20 = vsel %vm857_vm2, %v889_v22, -inf   ;;  %vm10580_vm7 = vcmp.le.f32.partialorder %v5975_v13, 0.0  ;;  %vm10581_vm9 = vnez %v10425_v53  ;;  %vm10591_vm2 = vnez %v10590_v38 }
 0x18a   :  { %v10573_v56 = vsel %vm6514_vm15, 4294967295, %v10572_v56  ;;  %vm6521_vm14 = vmxor %vm10574_vm10, %vm10106_vm11  ;;  %v894_v22 = vand.u32 2147483647, %v5686_v25  ;;  %v895_v25 = vand.u32 2147483647, %v5755_v58  ;;  %v6674_v38 = vmov 0.0  }
 0x18b   :  { %v10576_v45 = vsel %vm6521_vm14, 4294967295, %v10575_v45  ;;  %vm858_vm6 = vmor %vm10579_vm13, %vm10577_vm3  ;;  %vm10585_vm14 = vnez %v10584_v7  ;;  %vm10589_vm3 = vnez %v10588_v43  ;;  %v898_v58 = vand.u32 2147483647, %v10530_v41  ;;  %10617 = vst [vmem:[#allocation112_spill] sm:$0xff] %v6532_v20 }
 0x18c   :  { %vm6538_vm10 = vmand %vm10581_vm9, %vm10580_vm7  ;;  %v6554_v46 = vsel %vm858_vm6, %v890_v10, -inf   ;;  %vm10592_vm7 = vcmp.le.f32.partialorder %v5981_v6, 0.0  ;;  %v6638_v41 = vmov 0.0   ;;  %v6668_v7 = vmov 0.0  }
 0x18d   :  { %vm6545_vm15 = vmxor %vm10585_vm14, %vm10106_vm11  ;;  %v6672_v43 = vmov 0.0   ;;  %v6678_v53 = vmov 0.0  }
 0x18e   :  { %vm859_vm13 = vmor %vm10591_vm2, %vm10589_vm3  ;;  %vm10597_vm3 = vnez %v10453_v15  ;;  %v897_v15 = vand.u32 2147483647, %v5845_v37  ;;  %vm10600_vm2 = vnez %v10505_v26  ;;  %v900_v37 = vand.u32 2147483647, %v5963_v27 }
 0x18f   :  { %vm6560_vm9 = vmand %vm6247_vm4, %vm10592_vm7  ;;  %v6576_v10 = vsel %vm859_vm13, %v891_v28, -inf   ;;  %v902_v26 = vand.u32 2147483647, %v5975_v13  ;;  %v903_v27 = vand.u32 2147483647, %v5981_v6  ;;  %v6650_v28 = vmov 0.0  }
 0x190   :  { %vm6567_vm14 = vmxor %vm6263_vm8, %vm10106_vm11  ;;  %vm10598_vm11 = vnez %v10495_v49  ;;  %v901_v49 = vand.u32 2147483647, %v5969_v57 }
 0x191   :  { %vm860_vm6 = vmor %vm6270_vm1, %vm10597_vm3  ;;  %vm10599_vm1 = vnez %v10502_v52  ;;  %vm10604_vm3 = vnez %v10525_v50  ;;  %v6636_v50 = vmov 0.0  }
 0x192   :  { %vm861_vm4 = vmor %vm6317_vm12, %vm6310_vm5  ;;  %v6583_v63 = vsel %vm860_vm6, %v892_v24, -inf   ;;  %vm10601_vm5 = vnez %v10511_v5  ;;  %vm10602_vm12 = vnez %v10514_v1  ;;  %v6656_v24 = vmov 0.0  }
 0x193   :  { %vm862_vm8 = vmor %vm10598_vm11, %vm6346_vm0  ;;  %v6590_v4 = vsel %vm861_vm4, %v893_v29, -inf   ;;  %vm10603_vm0 = vnez %v10522_v8  ;;  %vm10605_vm4 = vnez %v10535_v12  ;;  %vm10606_vm11 = vnez %v10539_v48  ;;  %10616 = vst [vmem:[#allocation80_spill] sm:$0xff] %v6583_v63 }
 0x194   :  { %vm863_vm13 = vmor %vm10600_vm2, %vm10599_vm1  ;;  %v6597_v36 = vsel %vm862_vm8, %v894_v22, -inf   ;;  %vm10607_vm1 = vnez %v10549_v55  ;;  %vm10608_vm2 = vnez %v10553_v44  ;;  %v6640_v12 = vmov 0.0  }
 0x195   :  { %vm864_vm7 = vmor %vm10602_vm12, %vm10601_vm5  ;;  %v927_v19 = vsel %vm863_vm13, %v895_v25, -inf   ;;  %vm10609_vm5 = vnez %v10561_v30  ;;  %vm10610_vm12 = vnez %v10565_v61  ;;  %v6642_v48 = vmov 0.0  }
 0x196   :  { %vm865_vm6 = vmor %vm10604_vm3, %vm10603_vm0  ;;  %v928_v60 = vsel %vm864_vm7, %v896_v9, -inf   ;;  %vm10611_vm0 = vnez %v10573_v56  ;;  %vm10612_vm3 = vnez %v10576_v45  ;;  %v6646_v55 = vmov 0.0   ;;  %10615 = vst [vmem:[#allocation49_spill] sm:$0xff] %v927_v19 }
 0x197   :  { %vm866_vm8 = vmor %vm10606_vm11, %vm10605_vm4  ;;  %v929_v52 = vsel %vm865_vm6, %v897_v15, -inf   ;;  %v6648_v44 = vmov 0.0   ;;  %v6652_v30 = vmov 0.0   ;;  %v6654_v61 = vmov 0.0  }
 0x198   :  { %vm867_vm13 = vmor %vm10608_vm2, %vm10607_vm1  ;;  %v930_v5 = vsel %vm866_vm8, %v898_v58, -inf   ;;  %v6658_v56 = vmov 0.0   ;;  %v6660_v45 = vmov 0.0   ;;  %v6664_v29 = vmov 0.0  }
 0x199   :  { %vm868_vm7 = vmor %vm10610_vm12, %vm10609_vm5  ;;  %v931_v1 = vsel %vm867_vm13, %v899_v2, -inf   ;;  %v6676_v22 = vmov 0.0   ;;  %v6682_v25 = vmov 0.0   ;;  %v6684_v9 = vmov 0.0  }
 0x19a   :  { %vm869_vm6 = vmor %vm10612_vm3, %vm10611_vm0  ;;  %v932_v57 = vsel %vm868_vm7, %v900_v37, -inf   ;;  %v6686_v15 = vmov 0.0   ;;  %v6688_v58 = vmov 0.0   ;;  %v6690_v2 = vmov 0.0  }
 0x19b   :  { %vm870_vm4 = vmor %vm6545_vm15, %vm6538_vm10  ;;  %v933_v13 = vsel %vm869_vm6, %v901_v49, -inf   ;;  %v6692_v37 = vmov 0.0   ;;  %v6694_v49 = vmov 0.0   ;;  %10614 = vst [vmem:[#allocation55_spill] sm:$0xff] %v932_v57 }
 0x19c   :  { %vm871_vm11 = vmor %vm6567_vm14, %vm6560_vm9  ;;  %v934_v8 = vsel %vm870_vm4, %v902_v26, -inf   ;;  %v6696_v26 = vmov 0.0  }
 0x19d   :  { %v935_v6 = vsel %vm871_vm11, %v903_v27, -inf   ;;  %v6698_v27 = vmov 0.0  }
 0x19e   :  { %10613 = vst [vmem:[#allocation111_spill] sm:$0xff] %v935_v6 }
 0x19f LB: > { %10649 = vst [vmem:[#allocation118_spill] sm:$0xff] %v2970_v50  ;;  %v10693_v19 = vld [vmem:[#allocation49_spill] sm:$0xff]  ;;  %v10697_v63 = vld [vmem:[#allocation80_spill] sm:$0xff]  ;;  %v10709_v18 = vld [vmem:[#allocation82_spill] sm:$0xff]  ;;  %v3229_v50 = vmov 0   ;;  %s1867_s28 = sadd.s32 1, %s3226_s1   ;;  %s3226_s1 = sphi %s6787_s1, %s11383_s1   ;;  %v3170_v54 = vphi %v6484_v54, %v11317_v54   ;;  %v3166_v42 = vphi %v6508_v42, %v11313_v42   ;;  %v3158_v46 = vphi %v6554_v46, %v11304_v46   ;;  %v3154_v10 = vphi %v6576_v10, %v11300_v10   ;;  %v3146_v4 = vphi %v6590_v4, %v11293_v4   ;;  %v3142_v36 = vphi %v6597_v36, %v11291_v36   ;;  %v3134_v60 = vphi %v928_v60, %v11286_v60   ;;  %v3130_v52 = vphi %v929_v52, %v11285_v52   ;;  %v3126_v5 = vphi %v930_v5, %v11284_v5   ;;  %v3122_v1 = vphi %v931_v1, %v11283_v1   ;;  %v3114_v13 = vphi %v933_v13, %v11281_v13   ;;  %v3110_v8 = vphi %v934_v8, %v1858_v8   ;;  %v3102_v16 = vphi %v6336_v16, %v1860_v16   ;;  %v3098_v23 = vphi %v6340_v23, %v1861_v23   ;;  %v3094_v27 = vphi %v6698_v27, %v11278_v27   ;;  %v3090_v26 = vphi %v6696_v26, %v11277_v26   ;;  %v3086_v49 = vphi %v6694_v49, %v11276_v49   ;;  %v3082_v37 = vphi %v6692_v37, %v11275_v37   ;;  %v3078_v2 = vphi %v6690_v2, %v11274_v2   ;;  %v3074_v58 = vphi %v6688_v58, %v11273_v58   ;;  %v3070_v15 = vphi %v6686_v15, %v11272_v15   ;;  %v3066_v9 = vphi %v6684_v9, %v11271_v9   ;;  %v3062_v25 = vphi %v6682_v25, %v11270_v25   ;;  %v3058_v39 = vphi %v6680_v39, %v11269_v39   ;;  %v3054_v53 = vphi %v6678_v53, %v11268_v53   ;;  %v3050_v22 = vphi %v6676_v22, %v11267_v22   ;;  %v3046_v38 = vphi %v6674_v38, %v11266_v38   ;;  %v3042_v43 = vphi %v6672_v43, %v11265_v43   ;;  %v3038_v21 = vphi %v6670_v21, %v11264_v21   ;;  %v3034_v7 = vphi %v6668_v7, %v11263_v7   ;;  %v3030_v11 = vphi %v6666_v11, %v11262_v11   ;;  %v3026_v29 = vphi %v6664_v29, %v11261_v29   ;;  %v3022_v3 = vphi %v6662_v3, %v11260_v3   ;;  %v3018_v45 = vphi %v6660_v45, %v11259_v45   ;;  %v3014_v56 = vphi %v6658_v56, %v11258_v56   ;;  %v3010_v24 = vphi %v6656_v24, %v11257_v24   ;;  %v3006_v61 = vphi %v6654_v61, %v11256_v61   ;;  %v3002_v30 = vphi %v6652_v30, %v11255_v30   ;;  %v2998_v28 = vphi %v6650_v28, %v11254_v28   ;;  %v2994_v44 = vphi %v6648_v44, %v11253_v44   ;;  %v2990_v55 = vphi %v6646_v55, %v11252_v55   ;;  %v2986_v59 = vphi %v6644_v59, %v11251_v59   ;;  %v2982_v48 = vphi %v6642_v48, %v11250_v48   ;;  %v2978_v12 = vphi %v6640_v12, %v11249_v12   ;;  %v2974_v41 = vphi %v6638_v41, %v11248_v41   ;;  %v2970_v50 = vphi %v6636_v50, %v11247_v50  }
 0x1a0   : > { %10650 = vst [vmem:[#allocation119_spill] sm:$0xff] %v2974_v41  ;;  %v10701_v20 = vld [vmem:[#allocation112_spill] sm:$0xff]  ;;  %v10705_v33 = vld [vmem:[#allocation81_spill] sm:$0xff]  ;;  %v10711_v34 = vld [vmem:[#allocation83_spill] sm:$0xff]  ;;  %2681 = vset.pattern.permute.xlu2 %v3229_v50  ;;  %2680 = vset.pattern.permute.xlu1 %v3229_v50  ;;  %p1005_p1 = scmp.lt.s32.totalorder %s1867_s28, 36  ;;  %s11383_s1 = smov %s1867_s28 }
 0x1a1   : > { %10651 = vst [vmem:[#allocation120_spill] sm:$0xff] %v2978_v12  ;;  %v10707_v35 = vld [vmem:[#allocation113_spill] sm:$0xff]  ;;  %v10713_v47 = vld [vmem:[#allocation78_spill] sm:$0xff]  ;;  %v10715_v62 = vld [vmem:[#allocation108_spill] sm:$0xff]  ;;  %2679 = vset.pattern.permute.xlu0 %v3229_v50 }
 0x1a2   : > { %10652 = vst [vmem:[#allocation121_spill] sm:$0xff] %v2982_v48  ;;  %v10687_v57 = vld [vmem:[#allocation55_spill] sm:$0xff]  ;;  %v10717_v40 = vld [vmem:[#allocation101_spill] sm:$0xff]  ;;  %v10723_v31 = vld [vmem:[#allocation114_spill] sm:$0xff] }
 0x1a3   : > { %10653 = vst [vmem:[#allocation122_spill] sm:$0xff] %v2986_v59  ;;  %v10719_v51 = vld [vmem:[#allocation115_spill] sm:$0xff]  ;;  %v10721_v32 = vld [vmem:[#allocation57_spill] sm:$0xff]  ;;  %v10725_v17 = vld [vmem:[#allocation84_spill] sm:$0xff] }
 0x1a4   : > { %10654 = vst [vmem:[#allocation123_spill] sm:$0xff] %v2990_v55  ;;  %v10727_v14 = vld [vmem:[#allocation96_spill] sm:$0xff]  ;;  %v10731_v41 = vld [vmem:[#allocation9_spill] sm:$0xff]  ;;  %v10732_v12 = vld [vmem:[#allocation7_spill] sm:$0xff] }
 0x1a5   : > { %10655 = vst [vmem:[#allocation124_spill] sm:$0xff] %v2994_v44  ;;  %v10683_v6 = vld [vmem:[#allocation111_spill] sm:$0xff]  ;;  %v10729_v0 = vld [vmem:[#allocation116_spill] sm:$0xff]  ;;  %1093 = vperm.xlu2 %2681, %v10731_v41   ;;  %1087 = vperm.xlu1 %2680, %v10732_v12   ;;  %v10733_v48 = vld [vmem:[#allocation5_spill] sm:$0xff] }
 0x1a6   : > { %10656 = vst [vmem:[#allocation125_spill] sm:$0xff] %v2998_v28  ;;  %1081 = vperm.xlu0 %2679, %v10733_v48   ;;  %v10734_v59 = vld [vmem:[#allocation10_spill] sm:$0xff]  ;;  %v10735_v55 = vld [vmem:[#allocation8_spill] sm:$0xff]  ;;  %v10737_v28 = vld [vmem:[#allocation13_spill] sm:$0xff] }
 0x1a7   : > { %10657 = vst [vmem:[#allocation126_spill] sm:$0xff] %v3002_v30  ;;  %v10736_v44 = vld [vmem:[#allocation6_spill] sm:$0xff]  ;;  %v10738_v30 = vld [vmem:[#allocation12_spill] sm:$0xff]  ;;  %v10741_v50 = vld [vmem:[#allocation15_spill] sm:$0xff] }
 0x1a8   : > { %10658 = vst [vmem:[#allocation127_spill] sm:$0xff] %v3006_v61  ;;  %v10739_v61 = vld [vmem:[#allocation11_spill] sm:$0xff]  ;;  %v10742_v41 = vld [vmem:[#allocation14_spill] sm:$0xff] }
 0x1a9   : > { %10659 = vst [vmem:[#allocation128_spill] sm:$0xff] %v3010_v24  ;;  %v10740_v24 = vld [vmem:[#allocation16_spill] sm:$0xff]  ;;  %v10743_v12 = vld [vmem:[#allocation19_spill] sm:$0xff]  ;;  %v10744_v48 = vld [vmem:[#allocation18_spill] sm:$0xff] }
 0x1aa   : > { %10660 = vst [vmem:[#allocation129_spill] sm:$0xff] %v3014_v56 }
 0x1ab   : > { %10661 = vst [vmem:[#allocation130_spill] sm:$0xff] %v3018_v45 }
 0x1ac   : > { %10662 = vst [vmem:[#allocation131_spill] sm:$0xff] %v3022_v3 }
 0x1ad   : > { %10663 = vst [vmem:[#allocation132_spill] sm:$0xff] %v3026_v29  ;;  %1096 = vperm.xlu2 %2681, %v10734_v59   ;;  %1090 = vperm.xlu1 %2680, %v10735_v55   ;;  %v10745_v59 = vld [vmem:[#allocation17_spill] sm:$0xff]  ;;  %v10746_v55 = vld [vmem:[#allocation22_spill] sm:$0xff]  ;;  %v10769_v29 = vmov %v10729_v0 }
 0x1ae   : > { %10664 = vst [vmem:[#allocation133_spill] sm:$0xff] %v3030_v11  ;;  %1084 = vperm.xlu0 %2679, %v10736_v44   ;;  %v10747_v44 = vld [vmem:[#allocation21_spill] sm:$0xff]  ;;  %v10771_v11 = vmov %v10717_v40 }
 0x1af   : > { %10665 = vst [vmem:[#allocation134_spill] sm:$0xff] %v3034_v7 }
 0x1b0   : > { %10666 = vst [vmem:[#allocation135_spill] sm:$0xff] %v3038_v21  ;;  %v10776_v21 = vmov %v10727_v14 }
 0x1b1   : > { %10667 = vst [vmem:[#allocation136_spill] sm:$0xff] %v3042_v43  ;;  %v10779_v43 = vmov %v10723_v31 }
 0x1b2   : > { %10668 = vst [vmem:[#allocation137_spill] sm:$0xff] %v3046_v38 }
 0x1b3   : > { %10669 = vst [vmem:[#allocation138_spill] sm:$0xff] %v3050_v22 }
 0x1b4   : > { %10670 = vst [vmem:[#allocation139_spill] sm:$0xff] %v3054_v53 }
 0x1b5   : > { %10671 = vst [vmem:[#allocation140_spill] sm:$0xff] %v3058_v39  ;;  %1105 = vperm.xlu2 %2681, %v10737_v28   ;;  %1102 = vperm.xlu1 %2680, %v10738_v30   ;;  %v10748_v28 = vld [vmem:[#allocation20_spill] sm:$0xff]  ;;  %v10749_v30 = vld [vmem:[#allocation25_spill] sm:$0xff]  ;;  %v10798_v39 = vld [vmem:[#allocation18_spill] sm:$0xff] }
 0x1b6   : > { %10672 = vst [vmem:[#allocation141_spill] sm:$0xff] %v3062_v25  ;;  %1099 = vperm.xlu0 %2679, %v10739_v61   ;;  %v10750_v61 = vld [vmem:[#allocation24_spill] sm:$0xff] }
 0x1b7   : > { %10673 = vst [vmem:[#allocation142_spill] sm:$0xff] %v3066_v9 }
 0x1b8   : > { %10674 = vst [vmem:[#allocation143_spill] sm:$0xff] %v3070_v15  ;;  %v10805_v15 = vld [vmem:[#allocation25_spill] sm:$0xff] }
 0x1b9   : > { %10675 = vst [vmem:[#allocation144_spill] sm:$0xff] %v3074_v58 }
 0x1ba   : > { %10676 = vst [vmem:[#allocation145_spill] sm:$0xff] %v3078_v2 }
 0x1bb   : > { %10677 = vst [vmem:[#allocation146_spill] sm:$0xff] %v3082_v37  ;;  %v10823_v37 = vld [vmem:[#allocation34_spill] sm:$0xff] }
 0x1bc   : > { %10678 = vst [vmem:[#allocation147_spill] sm:$0xff] %v3086_v49  ;;  %v1343_v49 = vshra.s32 %v10823_v37, 4 }
 0x1bd   : > { %10679 = vst [vmem:[#allocation148_spill] sm:$0xff] %v3090_v26  ;;  %1114 = vperm.xlu2 %2681, %v10740_v24   ;;  %1111 = vperm.xlu1 %2680, %v10741_v50   ;;  %v10751_v24 = vld [vmem:[#allocation23_spill] sm:$0xff]  ;;  %v10752_v50 = vld [vmem:[#allocation28_spill] sm:$0xff]  ;;  %v10825_v26 = vld [vmem:[#allocation33_spill] sm:$0xff] }
 0x1be   : > { %10680 = vst [vmem:[#allocation149_spill] sm:$0xff] %v3094_v27  ;;  %1108 = vperm.xlu0 %2679, %v10742_v41   ;;  %v10753_v41 = vld [vmem:[#allocation27_spill] sm:$0xff]  ;;  %v1342_v27 = vshra.s32 %v10825_v26, 4 }
 0x1bf   : > { %10681 = vst [vmem:[#allocation150_spill] sm:$0xff] %v3098_v23 }
 0x1c0   : > { %10682 = vst [vmem:[#allocation151_spill] sm:$0xff] %v3102_v16 }
 0x1c1   : > { %10684 = vst [vmem:[#allocation111_spill] sm:$0xff] %v10683_v6 }
 0x1c2   : > { %10685 = vst [vmem:[#allocation152_spill] sm:$0xff] %v3110_v8 }
 0x1c3   : > { %10686 = vst [vmem:[#allocation153_spill] sm:$0xff] %v3114_v13 }
 0x1c4   : > { %10688 = vst [vmem:[#allocation55_spill] sm:$0xff] %v10687_v57 }
 0x1c5   : > { %10689 = vst [vmem:[#allocation154_spill] sm:$0xff] %v3122_v1  ;;  %1123 = vperm.xlu2 %2681, %v10743_v12   ;;  %1120 = vperm.xlu1 %2680, %v10744_v48   ;;  %v10754_v12 = vld [vmem:[#allocation26_spill] sm:$0xff]  ;;  %v10755_v48 = vld [vmem:[#allocation31_spill] sm:$0xff] }
 0x1c6   : > { %10690 = vst [vmem:[#allocation155_spill] sm:$0xff] %v3126_v5  ;;  %1117 = vperm.xlu0 %2679, %v10745_v59   ;;  %v10756_v59 = vld [vmem:[#allocation30_spill] sm:$0xff] }
 0x1c7   : > { %10691 = vst [vmem:[#allocation156_spill] sm:$0xff] %v3130_v52 }
 0x1c8   : > { %10692 = vst [vmem:[#allocation157_spill] sm:$0xff] %v3134_v60 }
 0x1c9   : > { %10694 = vst [vmem:[#allocation49_spill] sm:$0xff] %v10693_v19 }
 0x1ca   : > { %10695 = vst [vmem:[#allocation158_spill] sm:$0xff] %v3142_v36 }
 0x1cb   : > { %10696 = vst [vmem:[#allocation159_spill] sm:$0xff] %v3146_v4 }
 0x1cc   : > { %10698 = vst [vmem:[#allocation80_spill] sm:$0xff] %v10697_v63 }
 0x1cd   : > { %10699 = vst [vmem:[#allocation69_spill] sm:$0xff] %v3154_v10  ;;  %1132 = vperm.xlu2 %2681, %v10746_v55   ;;  %1129 = vperm.xlu1 %2680, %v10747_v44   ;;  %v10757_v55 = vld [vmem:[#allocation29_spill] sm:$0xff]  ;;  %v10758_v44 = vld [vmem:[#allocation34_spill] sm:$0xff] }
 0x1ce   : > { %10700 = vst [vmem:[#allocation117_spill] sm:$0xff] %v3158_v46  ;;  %1126 = vperm.xlu0 %2679, %v10748_v28   ;;  %v10759_v28 = vld [vmem:[#allocation33_spill] sm:$0xff] }
 0x1cf   : > { %10702 = vst [vmem:[#allocation112_spill] sm:$0xff] %v10701_v20 }
 0x1d0   : > { %10703 = vst [vmem:[#allocation62_spill] sm:$0xff] %v3166_v42 }
 0x1d1   : > { %10704 = vst [vmem:[#allocation51_spill] sm:$0xff] %v3170_v54 }
 0x1d2   : > { %10706 = vst [vmem:[#allocation81_spill] sm:$0xff] %v10705_v33 }
 0x1d3   : > { %10708 = vst [vmem:[#allocation113_spill] sm:$0xff] %v10707_v35 }
 0x1d4   : > { %10710 = vst [vmem:[#allocation82_spill] sm:$0xff] %v10709_v18 }
 0x1d5   : > { %10712 = vst [vmem:[#allocation83_spill] sm:$0xff] %v10711_v34  ;;  %1141 = vperm.xlu2 %2681, %v10749_v30   ;;  %1138 = vperm.xlu1 %2680, %v10750_v61   ;;  %v10760_v30 = vld [vmem:[#allocation32_spill] sm:$0xff]  ;;  %v10761_v61 = vld [vmem:[#allocation5_spill] sm:$0xff] }
 0x1d6   : > { %10714 = vst [vmem:[#allocation78_spill] sm:$0xff] %v10713_v47  ;;  %1135 = vperm.xlu0 %2679, %v10751_v24   ;;  %v1314_v24 = vshra.s32 %v10761_v61, 4  ;;  %v10772_v47 = vmov %v10771_v11 }
 0x1d7   : > { %10716 = vst [vmem:[#allocation108_spill] sm:$0xff] %v10715_v62 }
 0x1d8   : > { %10718 = vst [vmem:[#allocation101_spill] sm:$0xff] %v10717_v40  ;;  %v10826_v40 = vmov %v10825_v26 }
 0x1d9   : > { %10720 = vst [vmem:[#allocation115_spill] sm:$0xff] %v10719_v51 }
 0x1da   : > { %10722 = vst [vmem:[#allocation57_spill] sm:$0xff] %v10721_v32  ;;  %v10784_v53 = vld [vmem:[#allocation113_spill] sm:$0xff] }
 0x1db   : > { %10724 = vst [vmem:[#allocation114_spill] sm:$0xff] %v10723_v31 }
 0x1dc   : > { %10726 = vst [vmem:[#allocation84_spill] sm:$0xff] %v10725_v17 }
 0x1dd   : > { %10728 = vst [vmem:[#allocation96_spill] sm:$0xff] %v10727_v14  ;;  %1150 = vperm.xlu2 %2681, %v10752_v50   ;;  %1147 = vperm.xlu1 %2680, %v10753_v41   ;;  %v10762_v50 = vld [vmem:[#allocation36_spill] sm:$0xff]  ;;  %v10763_v41 = vld [vmem:[#allocation35_spill] sm:$0xff]  ;;  %v10785_v14 = vmov %v10784_v53 }
 0x1de   : > { %10730 = vst [vmem:[#allocation116_spill] sm:$0xff] %v10729_v0  ;;  %1144 = vperm.xlu0 %2679, %v10754_v12   ;;  %v10764_v12 = vld [vmem:[#allocation8_spill] sm:$0xff]  ;;  %v10770_v0 = vmov %v10769_v29 }
 0x1df   : > { %v1317_v56 = vshra.s32 %v10764_v12, 4  ;;  %v10782_v12 = vld [vmem:[#allocation82_spill] sm:$0xff] }
 0x1e5   : > { %1159 = vperm.xlu2 %2681, %v10755_v48   ;;  %1156 = vperm.xlu1 %2680, %v10756_v59   ;;  %v10765_v48 = vld [vmem:[#allocation7_spill] sm:$0xff]  ;;  %v10766_v59 = vld [vmem:[#allocation6_spill] sm:$0xff] }
 0x1e6   : > { %1153 = vperm.xlu0 %2679, %v10757_v55   ;;  %v1316_v45 = vshra.s32 %v10765_v48, 4  ;;  %v1315_v3 = vshra.s32 %v10766_v59, 4  ;;  %v10767_v55 = vmov %v10721_v32  ;;  %v10780_v32 = vmov %v10779_v43 }
 0x1e7   : > { %v10768_v62 = vmov %v10767_v55  ;;  %v10783_v48 = vmov %v10711_v34 }
 0x1ed   : > { %1168 = vperm.xlu2 %2681, %v10758_v44   ;;  %1165 = vperm.xlu1 %2680, %v10759_v28   ;;  %v1010_v44 = vmax.f32 %v10769_v29, %v10767_v55  ;;  %v10773_v28 = vmov %v10725_v17 }
 0x1ee   : > { %1162 = vperm.xlu0 %2679, %v10760_v30   ;;  %v10774_v18 = vmov %v10773_v28  ;;  %v1011_v7 = vmax.f32 %v10773_v28, %v10771_v11  ;;  %v10775_v30 = vmov %v10719_v51  ;;  %v10786_v28 = vld [vmem:[#allocation11_spill] sm:$0xff] }
 0x1ef   : > { %v1025_v61 = vmax.f32 %v10776_v21, %v10775_v30  ;;  %v1320_v30 = vshra.s32 %v10786_v28, 4  ;;  %v10791_v28 = vld [vmem:[#allocation12_spill] sm:$0xff] }
 0x1f0   : > { %v1013_v22 = vmax.f32 %v1011_v7, %v10782_v12  ;;  %v10789_v12 = vld [vmem:[#allocation14_spill] sm:$0xff] }
 0x1f1   : > { %v1027_v59 = vmax.f32 %v1025_v61, %v10783_v48  ;;  %v1323_v48 = vshra.s32 %v10789_v12, 4 }
 0x1f2   : > { %v1015_v21 = vmax.f32 %v1013_v22, %v3166_v42 }
 0x1f5   : > { %1380 = vperm.xlu2 %2681, %v1314_v24   ;;  %1174 = vperm.xlu1 %2680, %v10762_v50   ;;  %v10777_v24 = vld [vmem:[#allocation108_spill] sm:$0xff] }
 0x1f6   : > { %1171 = vperm.xlu0 %2679, %v10763_v41   ;;  %v10778_v35 = vmov %v10777_v24  ;;  %v1026_v50 = vmax.f32 %v10779_v43, %v10777_v24  ;;  %v10781_v41 = vld [vmem:[#allocation78_spill] sm:$0xff] }
 0x1f7   : > { %v1012_v38 = vmax.f32 %v1010_v44, %v10781_v41  ;;  %v10787_v44 = vld [vmem:[#allocation10_spill] sm:$0xff] }
 0x1f8   : > { %v1028_v29 = vmax.f32 %v1026_v50, %v10784_v53  ;;  %v1319_v7 = vshra.s32 %v10787_v44, 4  ;;  %v1017_v53 = vmax.f32 %v1015_v21, %v10697_v63 }
 0x1f9   : > { %v1014_v11 = vmax.f32 %v1012_v38, %v10705_v33 }
 0x1fa   : > { %v1030_v43 = vmax.f32 %v1028_v29, %v10701_v20  ;;  %v1019_v41 = vmax.f32 %v1017_v53, %v3134_v60  ;;  %v10792_v53 = vld [vmem:[#allocation17_spill] sm:$0xff] }
 0x1fb   : > { %v1016_v61 = vmax.f32 %v1014_v11, %v3158_v46  ;;  %v10790_v11 = vld [vmem:[#allocation13_spill] sm:$0xff] }
 0x1fc   : > { %v1032_v38 = vmax.f32 %v1030_v43, %v3146_v4  ;;  %v1322_v21 = vshra.s32 %v10790_v11, 4  ;;  %v1021_v43 = vmax.f32 %v1019_v41, %v10687_v57  ;;  %v10793_v41 = vld [vmem:[#allocation16_spill] sm:$0xff] }
 0x1fd   : > { %1389 = vperm.xlu2 %2681, %v1317_v56   ;;  %1386 = vperm.xlu1 %2680, %v1316_v45   ;;  %v1029_v56 = vmax.f32 %v1027_v59, %v3170_v54  ;;  %v10788_v45 = vld [vmem:[#allocation9_spill] sm:$0xff]  ;;  %v1018_v50 = vmax.f32 %v1016_v61, %v3142_v36  ;;  %v1325_v12 = vshra.s32 %v10793_v41, 4  ;;  %v1327_v41 = vshra.s32 %v10798_v39, 4 }
 0x1fe   : > { %1383 = vperm.xlu0 %2679, %v1315_v3   ;;  %v1318_v3 = vshra.s32 %v10788_v45, 4  ;;  %v1034_v29 = vmax.f32 %v1032_v38, %v3130_v52  ;;  %v1023_v61 = vmax.f32 %v1021_v43, %v3102_v16 }
 0x1ff   : > { %v7032_v55 = vpop.permute.xlu2 %1093  ;;  %v1031_v24 = vmax.f32 %v1029_v56, %v3154_v10  ;;  %v1020_v56 = vmax.f32 %v1018_v50, %v3126_v5 }
 0x201   : > { %v1033_v59 = vmax.f32 %v1031_v24, %v10693_v19  ;;  %v1326_v24 = vshra.s32 %v10792_v53, 4  ;;  %v10797_v53 = vld [vmem:[#allocation19_spill] sm:$0xff] }
 0x203   : > { %v1035_v44 = vmax.f32 %v1033_v59, %v3122_v1 }
 0x205   : > { %1398 = vperm.xlu2 %2681, %v1320_v30   ;;  %1395 = vperm.xlu1 %2680, %v1319_v7   ;;  %v1321_v30 = vshra.s32 %v10791_v28, 4  ;;  %v1036_v7 = vmax.f32 %v1034_v29, %v3114_v13  ;;  %v1037_v38 = vmax.f32 %v1035_v44, %v10683_v6 }
 0x206   : > { %1392 = vperm.xlu0 %2679, %v1318_v3   ;;  %v1022_v3 = vmax.f32 %v1020_v56, %v3110_v8  ;;  %v10796_v56 = vld [vmem:[#allocation20_spill] sm:$0xff] }
 0x207   : > { %v7045_v22 = vpop.permute.xlu2 %1096  ;;  %v1038_v50 = vmax.f32 %v1036_v7, %v3098_v23  ;;  %v1329_v43 = vshra.s32 %v10796_v56, 4  ;;  %v1328_v7 = vshra.s32 %v10797_v53, 4 }
 0x208   : > { %v1024_v29 = vmax.f32 %v1022_v3, %v1023_v61 }
 0x209   : > { %v1039_v11 = vmax.f32 %v1037_v38, %v1038_v50  ;;  %v10799_v38 = vld [vmem:[#allocation23_spill] sm:$0xff] }
 0x20a   : > { %v1332_v50 = vshra.s32 %v10799_v38, 4  ;;  %v1334_v38 = vshra.s32 %v10805_v15, 4 }
 0x20b   : > { %v1040_v44 = vmax.f32 %v1024_v29, %v1039_v11  ;;  %v10801_v29 = vld [vmem:[#allocation21_spill] sm:$0xff] }
 0x20c   : > { %v10802_v34 = vmov %v10801_v29  ;;  %v1330_v11 = vshra.s32 %v10801_v29, 4 }
 0x20d   : > { %1407 = vperm.xlu2 %2681, %v1323_v48   ;;  %1404 = vperm.xlu1 %2680, %v1322_v21   ;;  %v10794_v48 = vld [vmem:[#allocation15_spill] sm:$0xff] }
 0x20e   : > { %1401 = vperm.xlu0 %2679, %v1321_v30   ;;  %v1324_v59 = vshra.s32 %v10794_v48, 4  ;;  %v1041_v48 = vrot.slane %v1040_v44, 4 }
 0x20f   : > { %v7058_v45 = vpop.permute.xlu2 %1105 }
 0x215   : > { %1416 = vperm.xlu2 %2681, %v1326_v24   ;;  %1413 = vperm.xlu1 %2680, %v1325_v12   ;;  %v1042_v12 = vmax.f32 %v1040_v44, %v1041_v48  ;;  %v10806_v44 = vld [vmem:[#allocation24_spill] sm:$0xff] }
 0x216   : > { %1410 = vperm.xlu0 %2679, %v1324_v59   ;;  %v10800_v59 = vld [vmem:[#allocation22_spill] sm:$0xff]  ;;  %v10807_v31 = vmov %v10806_v44  ;;  %v1333_v48 = vshra.s32 %v10806_v44, 4 }
 0x217   : > { %v7067_v21 = vpop.permute.xlu2 %1114  ;;  %v7069_v28 = vpop.permute.xlu1 %1087  ;;  %v1331_v56 = vshra.s32 %v10800_v59, 4  ;;  %v1043_v53 = vrot.slane %v1042_v12, 2 }
 0x218   : > { %10795 = vst [vmem:[#allocation160_spill] sm:$0xff] %v7067_v21  ;;  %v7071_v30 = vpop.permute.xlu0 %1081 }
 0x219   : > { %v1044_v9 = vmax.f32 %v1042_v12, %v1043_v53  ;;  %v10812_v53 = vld [vmem:[#allocation27_spill] sm:$0xff] }
 0x21a   : > { %v1336_v15 = vshra.s32 %v10812_v53, 4 }
 0x21b   : > { %v1045_v59 = vrot.slane %v1044_v9, 1 }
 0x21d   : > { %1425 = vperm.xlu2 %2681, %v1329_v43   ;;  %1422 = vperm.xlu1 %2680, %v1328_v7   ;;  %v7101_v2 = vmax.f32 %v1044_v9, %v1045_v59  ;;  %v10813_v59 = vld [vmem:[#allocation32_spill] sm:$0xff] }
 0x21e   : > { %1419 = vperm.xlu0 %2679, %v1327_v41   ;;  %v10804_v41 = vld [vmem:[#allocation26_spill] sm:$0xff] }
 0x21f   : > { %v7076_v3 = vpop.permute.xlu2 %1123  ;;  %v7078_v61 = vpop.permute.xlu1 %1090  ;;  %v1335_v25 = vshra.s32 %v10804_v41, 4  ;;  %v10810_v41 = vld [vmem:[#allocation28_spill] sm:$0xff]  ;;  %vm1051_vm15 = vcmp.ge.f32.partialorder %v10780_v32, %v7101_v2  ;;  %vm1055_vm10 = vcmp.ge.f32.partialorder %v10778_v35, %v7101_v2  ;;  %vm1059_vm9 = vcmp.ge.f32.partialorder %v10785_v14, %v7101_v2 }
 0x220   : > { %v7080_v24 = vpop.permute.xlu0 %1084  ;;  %v10811_v17 = vmov %v10810_v41  ;;  %v1337_v12 = vshra.s32 %v10810_v41, 4  ;;  %vm1050_vm14 = vcmp.ge.f32.partialorder %v10774_v18, %v7101_v2  ;;  %vm1054_vm1 = vcmp.ge.f32.partialorder %v10772_v47, %v7101_v2 }
 0x221   : > { %vm1052_vm2 = vcmp.ge.f32.partialorder %v10768_v62, %v7101_v2  ;;  %vm1048_vm13 = vcmp.ge.f32.partialorder %v10770_v0, %v7101_v2  ;;  %v1187_v18 = vsel %vm1059_vm9, %v7067_v21, 304  ;;  %v10817_v62 = vld [vmem:[#allocation96_spill] sm:$0xff]  ;;  %v10818_v0 = vld [vmem:[#allocation82_spill] sm:$0xff]  ;;  %vm1063_vm4 = vcmp.ge.f32.partialorder %v10701_v20, %v7101_v2 }
 0x222   : > { %vm1049_vm12 = vcmp.ge.f32.partialorder %v10817_v62, %v7101_v2  ;;  %vm1058_vm7 = vcmp.ge.f32.partialorder %v10818_v0, %v7101_v2  ;;  %v10821_v0 = vld [vmem:[#allocation35_spill] sm:$0xff] }
 0x223   : > { %v10822_v62 = vld [vmem:[#allocation83_spill] sm:$0xff] }
 0x225   : > { %1434 = vperm.xlu2 %2681, %v1332_v50   ;;  %1431 = vperm.xlu1 %2680, %v1331_v56  }
 0x226   : > { %1428 = vperm.xlu0 %2679, %v1330_v11   ;;  %v10809_v11 = vld [vmem:[#allocation29_spill] sm:$0xff] }
 0x227   : > { %v7085_v39 = vpop.permute.xlu2 %1132  ;;  %v7087_v43 = vpop.permute.xlu1 %1102  ;;  %v1338_v58 = vshra.s32 %v10809_v11, 4  ;;  %v10814_v11 = vld [vmem:[#allocation31_spill] sm:$0xff] }
 0x228   : > { %10803 = vst [vmem:[#allocation161_spill] sm:$0xff] %v7087_v43  ;;  %v7089_v7 = vpop.permute.xlu0 %1099  ;;  %v1340_v41 = vshra.s32 %v10814_v11, 4  ;;  %v1180_v11 = vsel %vm1052_vm2, %v7032_v55, 304 }
 0x229   : > { %v1182_v47 = vsel %vm1054_vm1, %v7089_v7, 304  ;;  %vm1060_vm1 = vcmp.ge.f32.partialorder %v10705_v33, %v7101_v2 }
 0x22d   : > { %1443 = vperm.xlu2 %2681, %v1335_v25   ;;  %1440 = vperm.xlu1 %2680, %v1334_v38   ;;  %v1179_v25 = vsel %vm1051_vm15, %v7078_v61, 304  ;;  %v1183_v38 = vsel %vm1055_vm10, %v7087_v43, 304  ;;  %vm1057_vm15 = vcmp.ge.f32.partialorder %v10822_v62, %v7101_v2  ;;  %vm1062_vm10 = vcmp.ge.f32.partialorder %v3166_v42, %v7101_v2 }
 0x22e   : > { %1437 = vperm.xlu0 %2679, %v1333_v48   ;;  %vm1240_vm8 = vcmp.lt.s32.totalorder %v1179_v25, %v1183_v38 }
 0x22f   : > { %v7094_v50 = vpop.permute.xlu2 %1141  ;;  %v7096_v56 = vpop.permute.xlu1 %1111  ;;  %v1241_v32 = vsel %vm1240_vm8, %v1179_v25, %v1183_v38  ;;  %vm1061_vm8 = vcmp.ge.f32.partialorder %v3170_v54, %v7101_v2 }
 0x230   : > { %10808 = vst [vmem:[#allocation162_spill] sm:$0xff] %v7096_v56  ;;  %v7098_v29 = vpop.permute.xlu0 %1108  ;;  %vm1244_vm3 = vcmp.lt.s32.totalorder %v1241_v32, %v1187_v18 }
 0x231   : > { %v1245_v43 = vsel %vm1244_vm3, %v1241_v32, %v1187_v18  ;;  %v1185_v62 = vsel %vm1057_vm15, %v7098_v29, 304  ;;  %v1190_v32 = vsel %vm1062_vm10, %v7076_v3, 304 }
 0x235   : > { %1452 = vperm.xlu2 %2681, %v1338_v58   ;;  %1449 = vperm.xlu1 %2680, %v1337_v12   ;;  %v1341_v58 = vshra.s32 %v10813_v59, 4  ;;  %v10815_v12 = vld [vmem:[#allocation30_spill] sm:$0xff]  ;;  %v1178_v59 = vsel %vm1050_vm14, %v7069_v28, 304 }
 0x236   : > { %1446 = vperm.xlu0 %2679, %v1336_v15   ;;  %v1339_v53 = vshra.s32 %v10815_v12, 4  ;;  %v10816_v15 = vmov %v10719_v51  ;;  %v1176_v12 = vsel %vm1048_vm13, %v7071_v30, 304  ;;  %vm1210_vm6 = vcmp.lt.s32.totalorder %v1178_v59, %v1182_v47 }
 0x237   : > { %v7111_v44 = vpop.permute.xlu2 %1150  ;;  %v7113_v9 = vpop.permute.xlu1 %1120  ;;  %vm1053_vm5 = vcmp.ge.f32.partialorder %v10816_v15, %v7101_v2  ;;  %v10819_v15 = vld [vmem:[#allocation78_spill] sm:$0xff]  ;;  %vm1208_vm11 = vcmp.lt.s32.totalorder %v1176_v12, %v1180_v11  ;;  %v10824_v51 = vmov %v10823_v37  ;;  %v1211_v21 = vsel %vm1210_vm6, %v1178_v59, %v1182_v47 }
 0x238   : > { %v7115_v48 = vpop.permute.xlu0 %1117  ;;  %vm1056_vm0 = vcmp.ge.f32.partialorder %v10819_v15, %v7101_v2  ;;  %v1181_v25 = vsel %vm1053_vm5, %v7045_v22, 304  ;;  %v1344_v15 = vshra.s32 %v10821_v0, 4  ;;  %v1209_v0 = vsel %vm1208_vm11, %v1176_v12, %v1180_v11 }
 0x239   : > { %vm1067_vm13 = vcmp.ge.f32.partialorder %v3146_v4, %v7101_v2  ;;  %v1188_v11 = vsel %vm1060_vm1, %v7115_v48, 304  ;;  %vm1069_vm1 = vcmp.ge.f32.partialorder %v10693_v19, %v7101_v2 }
 0x23d   : > { %1461 = vperm.xlu2 %2681, %v1341_v58   ;;  %1458 = vperm.xlu1 %2680, %v1340_v41   ;;  %v1177_v41 = vsel %vm1049_vm12, %v7080_v24, 304 }
 0x23e   : > { %1455 = vperm.xlu0 %2679, %v1339_v53   ;;  %v1186_v53 = vsel %vm1058_vm7, %v7096_v56, 304  ;;  %v1184_v56 = vsel %vm1056_vm0, %v7058_v45, 304  ;;  %vm1238_vm9 = vcmp.lt.s32.totalorder %v1177_v41, %v1181_v25  ;;  %vm1064_vm7 = vcmp.ge.f32.partialorder %v3158_v46, %v7101_v2 }
 0x23f   : > { %v7143_v35 = vpop.permute.xlu2 %1159  ;;  %v7146_v38 = vpop.permute.xlu1 %1129  ;;  %vm1214_vm14 = vcmp.lt.s32.totalorder %v1211_v21, %v1186_v53  ;;  %vm1212_vm5 = vcmp.lt.s32.totalorder %v1209_v0, %v1184_v56  ;;  %v1239_v18 = vsel %vm1238_vm9, %v1177_v41, %v1181_v25  ;;  %vm1066_vm0 = vcmp.ge.f32.partialorder %v10697_v63, %v7101_v2  ;;  %v10828_v41 = vld [vmem:[#allocation5_spill] sm:$0xff] }
 0x240   : > { %v7148_v58 = vpop.permute.xlu0 %1126  ;;  %v1215_v47 = vsel %vm1214_vm14, %v1211_v21, %v1186_v53  ;;  %vm1242_vm12 = vcmp.lt.s32.totalorder %v1239_v18, %v1185_v62  ;;  %v1189_v21 = vsel %vm1061_vm8, %v7113_v9, 304  ;;  %v1346_v53 = vand.u32 15, %v10828_v41 }
 0x241   : > { %v1191_v20 = vsel %vm1063_vm4, %v7148_v58, 304  ;;  %vm1218_vm3 = vcmp.lt.s32.totalorder %v1215_v47, %v1190_v32  ;;  %v1243_v63 = vsel %vm1242_vm12, %v1239_v18, %v1185_v62  ;;  %v1213_v42 = vsel %vm1212_vm5, %v1209_v0, %v1184_v56 }
 0x242   : > { %vm1248_vm2 = vcmp.lt.s32.totalorder %v1245_v43, %v1191_v20  ;;  %vm1065_vm4 = vcmp.ge.f32.partialorder %v3154_v10, %v7101_v2  ;;  %vm1246_vm11 = vcmp.lt.s32.totalorder %v1243_v63, %v1189_v21  ;;  %vm1216_vm15 = vcmp.lt.s32.totalorder %v1213_v42, %v1188_v11  ;;  %v10844_v10 = vld [vmem:[#allocation23_spill] sm:$0xff] }
 0x243   : > { %v1249_v25 = vsel %vm1248_vm2, %v1245_v43, %v1191_v20  ;;  %v1192_v20 = vsel %vm1064_vm7, %v7146_v38, 304  ;;  %v1219_v43 = vsel %vm1218_vm3, %v1215_v47, %v1190_v32  ;;  %vm1070_vm9 = vcmp.ge.f32.partialorder %v3134_v60, %v7101_v2 }
 0x244   : > { %v1193_v0 = vsel %vm1065_vm4, %v7085_v39, 304  ;;  %v1247_v62 = vsel %vm1246_vm11, %v1243_v63, %v1189_v21  ;;  %v1217_v56 = vsel %vm1216_vm15, %v1213_v42, %v1188_v11  ;;  %vm1068_vm14 = vcmp.ge.f32.partialorder %v3142_v36, %v7101_v2  ;;  %v10831_v42 = vld [vmem:[#allocation8_spill] sm:$0xff]  ;;  %v10832_v21 = vld [vmem:[#allocation7_spill] sm:$0xff] }
 0x245   : > { %1470 = vperm.xlu2 %2681, %v1344_v15   ;;  %1467 = vperm.xlu1 %2680, %v1343_v49   ;;  %v10829_v15 = vld [vmem:[#allocation36_spill] sm:$0xff]  ;;  %vm1220_vm8 = vcmp.lt.s32.totalorder %v1217_v56, %v1192_v20  ;;  %vm1250_vm2 = vcmp.lt.s32.totalorder %v1247_v62, %v1193_v0  ;;  %v1349_v63 = vand.u32 15, %v10831_v42  ;;  %v1348_v11 = vand.u32 15, %v10832_v21 }
 0x246   : > { %1464 = vperm.xlu0 %2679, %v1342_v27   ;;  %v10827_v27 = vld [vmem:[#allocation6_spill] sm:$0xff]  ;;  %v1251_v36 = vsel %vm1250_vm2, %v1247_v62, %v1193_v0  ;;  %vm1073_vm5 = vcmp.ge.f32.partialorder %v3122_v1, %v7101_v2  ;;  %vm1071_vm3 = vcmp.ge.f32.partialorder %v3130_v52, %v7101_v2  ;;  %v10833_v0 = vld [vmem:[#allocation12_spill] sm:$0xff] }
 0x247   : > { %v7177_v37 = vpop.permute.xlu2 %1168  ;;  %v7181_v26 = vpop.permute.xlu1 %1138  ;;  %v1347_v59 = vand.u32 15, %v10827_v27  ;;  %v1345_v27 = vshra.s32 %v10829_v15, 4  ;;  %v1221_v15 = vsel %vm1220_vm8, %v1217_v56, %v1192_v20  ;;  %v1353_v62 = vand.u32 15, %v10833_v0  ;;  %v10845_v1 = vld [vmem:[#allocation22_spill] sm:$0xff] }
 0x248   : > { %v7183_v49 = vpop.permute.xlu0 %1135  ;;  %v1195_v12 = vsel %vm1067_vm13, %v7181_v26, 304  ;;  %v1199_v0 = vsel %vm1071_vm3, %v7111_v44, 304  ;;  %vm1074_vm8 = vcmp.ge.f32.partialorder %v10687_v57, %v7101_v2  ;;  %v10843_v57 = vld [vmem:[#allocation19_spill] sm:$0xff] }
 0x249   : > { %vm1252_vm6 = vcmp.lt.s32.totalorder %v1249_v25, %v1195_v12  ;;  %v1194_v54 = vsel %vm1066_vm0, %v7183_v49, 304  ;;  %vm1072_vm0 = vcmp.ge.f32.partialorder %v3126_v5, %v7101_v2 }
 0x24a   : > { %v7201_v4 = vsel %vm1252_vm6, %v1249_v25, %v1195_v12  ;;  %vm1222_vm10 = vcmp.lt.s32.totalorder %v1219_v43, %v1194_v54  ;;  %v10830_v25 = vld [vmem:[#allocation9_spill] sm:$0xff]  ;;  %vm1077_vm6 = vcmp.ge.f32.partialorder %v10683_v6, %v7101_v2 }
 0x24b   : > { %v1350_v41 = vand.u32 15, %v10830_v25 }
 0x24d   : > { %1577 = vperm.xlu2 %2681, %v1347_v59   ;;  %1574 = vperm.xlu1 %2680, %v1346_v53   ;;  %v1223_v59 = vsel %vm1222_vm10, %v1219_v43, %v1194_v54  ;;  %v1196_v53 = vsel %vm1068_vm14, %v7094_v50, 304  ;;  %vm1256_vm10 = vcmp.lt.s32.totalorder %v7201_v4, %v1199_v0  ;;  %vm1075_vm14 = vcmp.ge.f32.partialorder %v3114_v13, %v7101_v2 }
 0x24e   : > { %1473 = vperm.xlu0 %2679, %v1345_v27   ;;  %vm1224_vm12 = vcmp.lt.s32.totalorder %v1221_v15, %v1196_v53 }
 0x24f   : > { %v7213_v18 = vpop.permute.xlu2 %1380  ;;  %v7217_v12 = vpop.permute.xlu1 %1147  ;;  %v1225_v25 = vsel %vm1224_vm12, %v1221_v15, %v1196_v53  ;;  %vm1078_vm12 = vcmp.ge.f32.partialorder %v3102_v16, %v7101_v2 }
 0x250   : > { %v7219_v32 = vpop.permute.xlu0 %1144  ;;  %v1198_v47 = vsel %vm1070_vm9, %v7217_v12, 304  ;;  %vm1076_vm9 = vcmp.ge.f32.partialorder %v3110_v8, %v7101_v2  ;;  %v1202_v8 = vsel %vm1074_vm8, %v7143_v35, 304 }
 0x251   : > { %vm1226_vm13 = vcmp.lt.s32.totalorder %v1223_v59, %v1198_v47  ;;  %v1197_v60 = vsel %vm1069_vm1, %v7219_v32, 304 }
 0x252   : > { %v7228_v27 = vsel %vm1226_vm13, %v1223_v59, %v1198_v47  ;;  %vm1254_vm7 = vcmp.lt.s32.totalorder %v1251_v36, %v1197_v60 }
 0x253   : > { %v1255_v47 = vsel %vm1254_vm7, %v1251_v36, %v1197_v60  ;;  %vm1230_vm13 = vcmp.lt.s32.totalorder %v7228_v27, %v1202_v8 }
 0x255   : > { %1586 = vperm.xlu2 %2681, %v1350_v41   ;;  %1583 = vperm.xlu1 %2680, %v1349_v63   ;;  %v10834_v41 = vld [vmem:[#allocation11_spill] sm:$0xff]  ;;  %v10835_v63 = vld [vmem:[#allocation10_spill] sm:$0xff] }
 0x256   : > { %1580 = vperm.xlu0 %2679, %v1348_v11   ;;  %v1352_v42 = vand.u32 15, %v10834_v41  ;;  %v1351_v21 = vand.u32 15, %v10835_v63  ;;  %v1205_v11 = vsel %vm1077_vm6, %v7177_v37, 304 }
 0x257   : > { %v7235_v54 = vpop.permute.xlu2 %1389  ;;  %v7241_v20 = vpop.permute.xlu1 %1156 }
 0x258   : > { %v7243_v43 = vpop.permute.xlu0 %1153  ;;  %v1201_v56 = vsel %vm1073_vm5, %v7241_v20, 304  ;;  %vm1079_vm5 = vcmp.ge.f32.partialorder %v3098_v23, %v7101_v2  ;;  %v1360_v23 = vand.u32 15, %v10843_v57 }
 0x259   : > { %v1200_v59 = vsel %vm1072_vm0, %v7243_v43, 304  ;;  %vm1258_vm4 = vcmp.lt.s32.totalorder %v1255_v47, %v1201_v56 }
 0x25a   : > { %vm1228_vm11 = vcmp.lt.s32.totalorder %v1225_v25, %v1200_v59  ;;  %v1259_v5 = vsel %vm1258_vm4, %v1255_v47, %v1201_v56  ;;  %v1257_v56 = vsel %vm1256_vm10, %v7201_v4, %v1199_v0  ;;  %v10836_v47 = vld [vmem:[#allocation15_spill] sm:$0xff]  ;;  %v10839_v0 = vld [vmem:[#allocation18_spill] sm:$0xff] }
 0x25b   : > { %v1229_v6 = vsel %vm1228_vm11, %v1225_v25, %v1200_v59  ;;  %vm1262_vm15 = vcmp.lt.s32.totalorder %v1259_v5, %v1205_v11  ;;  %v1356_v59 = vand.u32 15, %v10836_v47  ;;  %v10837_v25 = vld [vmem:[#allocation14_spill] sm:$0xff]  ;;  %v1359_v47 = vand.u32 15, %v10839_v0 }
 0x25c   : > { %v1263_v36 = vsel %vm1262_vm15, %v1259_v5, %v1205_v11  ;;  %v1355_v41 = vand.u32 15, %v10837_v25  ;;  %v10840_v25 = vld [vmem:[#allocation17_spill] sm:$0xff]  ;;  %v1231_v0 = vsel %vm1230_vm13, %v7228_v27, %v1202_v8  ;;  %vm9006_vm11 = vcmp.gt.f32.partialorder %v7101_v2, -inf }
 0x25d   : > { %1595 = vperm.xlu2 %2681, %v1353_v62   ;;  %1592 = vperm.xlu1 %2680, %v1352_v42   ;;  %v10838_v42 = vld [vmem:[#allocation13_spill] sm:$0xff] }
 0x25e   : > { %1589 = vperm.xlu0 %2679, %v1351_v21   ;;  %v1354_v63 = vand.u32 15, %v10838_v42  ;;  %v10842_v42 = vld [vmem:[#allocation20_spill] sm:$0xff] }
 0x25f   : > { %v7260_v60 = vpop.permute.xlu2 %1398  ;;  %v7264_v53 = vpop.permute.xlu1 %1165 }
 0x260   : > { %v7266_v15 = vpop.permute.xlu0 %1162  ;;  %v1204_v5 = vsel %vm1076_vm9, %v7264_v53, 304 }
 0x261   : > { %v1203_v62 = vsel %vm1075_vm14, %v7266_v15, 304  ;;  %vm1232_vm1 = vcmp.lt.s32.totalorder %v1229_v6, %v1204_v5 }
 0x262   : > { %vm1260_vm2 = vcmp.lt.s32.totalorder %v1257_v56, %v1203_v62  ;;  %v1233_v21 = vsel %vm1232_vm1, %v1229_v6, %v1204_v5  ;;  %v1358_v6 = vand.u32 15, %v10840_v25  ;;  %v1365_v25 = vand.u32 15, %v10807_v31 }
 0x263   : > { %v1261_v11 = vsel %vm1260_vm2, %v1257_v56, %v1203_v62  ;;  %v10841_v56 = vld [vmem:[#allocation16_spill] sm:$0xff] }
 0x265   : > { %1604 = vperm.xlu2 %2681, %v1356_v59   ;;  %1601 = vperm.xlu1 %2680, %v1355_v41   ;;  %v1357_v59 = vand.u32 15, %v10841_v56  ;;  %v1362_v41 = vand.u32 15, %v10802_v34  ;;  %v1364_v56 = vand.u32 15, %v10844_v10  ;;  %v1363_v34 = vand.u32 15, %v10845_v1  ;;  %v10846_v10 = vld [vmem:[#allocation26_spill] sm:$0xff] }
 0x266   : > { %1598 = vperm.xlu0 %2679, %v1354_v63   ;;  %v1361_v63 = vand.u32 15, %v10842_v42  ;;  %v1367_v1 = vand.u32 15, %v10846_v10 }
 0x267   : > { %v7280_v4 = vpop.permute.xlu2 %1407  ;;  %v7284_v5 = vpop.permute.xlu1 %1174 }
 0x268   : > { %v7286_v62 = vpop.permute.xlu0 %1171  ;;  %v1207_v16 = vsel %vm1079_vm5, %v7284_v5, 304 }
 0x269   : > { %v1206_v13 = vsel %vm1078_vm12, %v7286_v62, 304  ;;  %vm1264_vm7 = vcmp.lt.s32.totalorder %v1261_v11, %v1207_v16 }
 0x26a   : > { %vm1234_vm0 = vcmp.lt.s32.totalorder %v1231_v0, %v1206_v13  ;;  %v1265_v52 = vsel %vm1264_vm7, %v1261_v11, %v1207_v16 }
 0x26b   : > { %v1235_v42 = vsel %vm1234_vm0, %v1231_v0, %v1206_v13  ;;  %vm1266_vm3 = vcmp.lt.s32.totalorder %v1263_v36, %v1265_v52  ;;  %v10848_v0 = vld [vmem:[#allocation27_spill] sm:$0xff] }
 0x26c   : > { %vm1236_vm6 = vcmp.lt.s32.totalorder %v1233_v21, %v1235_v42  ;;  %v1267_v57 = vsel %vm1266_vm3, %v1263_v36, %v1265_v52  ;;  %v10847_v52 = vld [vmem:[#allocation25_spill] sm:$0xff] }
 0x26d   : > { %v1237_v33 = vsel %vm1236_vm6, %v1233_v21, %v1235_v42  ;;  %1613 = vperm.xlu2 %2681, %v1359_v47   ;;  %1610 = vperm.xlu1 %2680, %v1358_v6   ;;  %v1366_v13 = vand.u32 15, %v10847_v52  ;;  %v10860_v52 = vld [vmem:[#allocation38_spill] sm:$0xff] }
 0x26e   : > { %vm1268_vm4 = vcmp.lt.s32.totalorder %v1237_v33, %v1267_v57  ;;  %1607 = vperm.xlu0 %2679, %v1357_v59  }
 0x26f   : > { %v1269_v19 = vsel %vm1268_vm4, %v1237_v33, %v1267_v57  ;;  %v7300_v8 = vpop.permute.xlu2 %1416  ;;  %v7302_v31 = vpop.permute.xlu1 %1386 }
 0x270   : > { %v1270_v27 = vrot.slane %v1269_v19, 4  ;;  %v7304_v46 = vpop.permute.xlu0 %1383 }
 0x272   : > { %vm1271_vm15 = vcmp.lt.s32.totalorder %v1269_v19, %v1270_v27 }
 0x273   : > { %v1272_v16 = vsel %vm1271_vm15, %v1269_v19, %v1270_v27  ;;  %v10876_v19 = vld [vmem:[#allocation145_spill] sm:$0xff] }
 0x274   : > { %v1273_v36 = vrot.slane %v1272_v16, 2 }
 0x275   : > { %1622 = vperm.xlu2 %2681, %v1362_v41   ;;  %1619 = vperm.xlu1 %2680, %v1361_v63   ;;  %v10874_v63 = vld [vmem:[#allocation40_spill] sm:$0xff] }
 0x276   : > { %vm1274_vm10 = vcmp.lt.s32.totalorder %v1272_v16, %v1273_v36  ;;  %1616 = vperm.xlu0 %2679, %v1360_v23   ;;  %v10849_v23 = vld [vmem:[#allocation30_spill] sm:$0xff] }
 0x277   : > { %v7309_v33 = vpop.permute.xlu2 %1425  ;;  %v1275_v21 = vsel %vm1274_vm10, %v1272_v16, %v1273_v36  ;;  %v7311_v11 = vpop.permute.xlu1 %1395  ;;  %v10850_v14 = vmov %v10849_v23  ;;  %v10851_v16 = vld [vmem:[#allocation29_spill] sm:$0xff] }
 0x278   : > { %v7313_v47 = vpop.permute.xlu0 %1392  ;;  %v1276_v59 = vrot.slane %v1275_v21, 1  ;;  %v10852_v6 = vmov %v10851_v16  ;;  %v10855_v36 = vld [vmem:[#allocation160_spill] sm:$0xff] }
 0x279   : > { %v10859_v16 = vld [vmem:[#allocation148_spill] sm:$0xff] }
 0x27a   : > { %vm1277_vm9 = vcmp.lt.s32.totalorder %v1275_v21, %v1276_v59 }
 0x27b   : > { %v1278_v42 = vsel %vm1277_vm9, %v1275_v21, %v1276_v59  ;;  %v10856_v21 = vld [vmem:[#allocation149_spill] sm:$0xff]  ;;  %v10857_v59 = vld [vmem:[#allocation37_spill] sm:$0xff] }
 0x27c   : > { %v7319_v41 = vsel %vm9006_vm11, %v1278_v42, 304 }
 0x27d   : > { %1631 = vperm.xlu2 %2681, %v1365_v25   ;;  %1628 = vperm.xlu1 %2680, %v1364_v56   ;;  %vm1280_vm14 = vcmp.eq.s32.totalorder %v7071_v30, %v7319_v41  ;;  %vm1281_vm8 = vcmp.eq.s32.totalorder %v7080_v24, %v7319_v41  ;;  %vm1282_vm7 = vcmp.eq.s32.totalorder %v7069_v28, %v7319_v41  ;;  %v10853_v25 = vld [vmem:[#allocation161_spill] sm:$0xff]  ;;  %v10854_v56 = vld [vmem:[#allocation162_spill] sm:$0xff]  ;;  %v10862_v24 = vmov 0 }
 0x27e   : > { %1625 = vperm.xlu0 %2679, %v1363_v34   ;;  %v1312_v34 = vshra.s32 %v7319_v41, 4  ;;  %vm1283_vm0 = vcmp.eq.s32.totalorder %v7078_v61, %v7319_v41  ;;  %vm1284_vm3 = vcmp.eq.s32.totalorder %v7032_v55, %v7319_v41  ;;  %vm1285_vm6 = vcmp.eq.s32.totalorder %v7045_v22, %v7319_v41 }
 0x27f   : > { %v7322_v57 = vpop.permute.xlu2 %1434  ;;  %v7324_v27 = vpop.permute.xlu1 %1404  ;;  %vm1286_vm9 = vcmp.eq.s32.totalorder %v7089_v7, %v7319_v41  ;;  %v7387_v42 = vsel %vm1280_vm14, %v10857_v59, %v10856_v21   ;;  %v7404_v30 = vsel %vm1281_vm8, %v10860_v52, %v10859_v16   ;;  %v10865_v52 = vand.u32 15, %v10811_v17  ;;  %v10871_v16 = vld [vmem:[#allocation39_spill] sm:$0xff] }
 0x280   : > { %v7326_v10 = vpop.permute.xlu0 %1401  ;;  %10858 = vst [vmem:[#allocation97_spill] sm:$0xff] %v7387_v42  ;;  %v10870_v42 = vld [vmem:[#allocation147_spill] sm:$0xff]  ;;  %v11087_v61 = vmov 0 }
 0x281   : > { %10861 = vst [vmem:[#allocation110_spill] sm:$0xff] %v7404_v30  ;;  %v7485_v30 = vsel %vm1282_vm7, %v10871_v16, %v10870_v42   ;;  %v10892_v16 = vld [vmem:[#allocation46_spill] sm:$0xff]  ;;  %vm10893_vm7 = vcmp.eq.s32.totalorder %v7058_v45, %v7319_v41 }
 0x282   : > { %10872 = vst [vmem:[#allocation87_spill] sm:$0xff] %v7485_v30  ;;  %v10895_v30 = vld [vmem:[#allocation140_spill] sm:$0xff] }
 0x285   : > { %1637 = vperm.xlu2 %2681, %v1367_v1   ;;  %1634 = vperm.xlu1 %2680, %v1366_v13   ;;  %v7380_v1 = vadd.s32 4294967294, %v1312_v34  ;;  %v7397_v13 = vadd.s32 2, %v1312_v34  ;;  %v10869_v34 = vand.u32 15, %v10848_v0  ;;  %v10879_v0 = vld [vmem:[#allocation144_spill] sm:$0xff] }
 0x287   : > { %v7389_v23 = vpop.permute.xlu2 %1443  ;;  %v7406_v21 = vpop.permute.xlu1 %1413  ;;  %vm1476_vm1 = vcmp.ge.s32.totalorder %v7304_v46, %v7380_v1  ;;  %vm1479_vm13 = vcmp.ge.s32.totalorder %v7313_v47, %v7380_v1  ;;  %vm1482_vm14 = vcmp.ge.s32.totalorder %v7326_v10, %v7380_v1  ;;  %vm1509_vm10 = vcmp.le.s32.totalorder %v7304_v46, %v7397_v13 }
 0x288   : > { %v1411_v59 = vpop.permute.xlu0 %1410  ;;  %vm1512_vm2 = vcmp.le.s32.totalorder %v7313_v47, %v7397_v13  ;;  %vm1515_vm4 = vcmp.le.s32.totalorder %v7326_v10, %v7397_v13  ;;  %vm7457_vm15 = vmand %vm1476_vm1, %vm1509_vm10  ;;  %vm1520_vm8 = vcmp.le.s32.totalorder %v7300_v8, %v7397_v13  ;;  %vm1523_vm12 = vcmp.le.s32.totalorder %v7309_v33, %v7397_v13  ;;  %v10891_v10 = vld [vmem:[#allocation141_spill] sm:$0xff] }
 0x289   : > { %v10863_v24 = vsel %vm7457_vm15, 4294967295, %v10862_v24  ;;  %vm1529_vm11 = vcmp.le.s32.totalorder %v7389_v23, %v7397_v13  ;;  %vm7474_vm1 = vmand %vm1479_vm13, %vm1512_vm2  ;;  %v10866_v46 = vmov 0  ;;  %vm10889_vm13 = vcmp.eq.s32.totalorder %v10853_v25, %v7319_v41 }
 0x28a   : > { %10864 = vst [vmem:[#allocation161_spill] sm:$0xff] %v10863_v24  ;;  %v10867_v46 = vsel %vm7474_vm1, 4294967295, %v10866_v46  ;;  %v10877_v24 = vld [vmem:[#allocation41_spill] sm:$0xff]  ;;  %vm7514_vm2 = vmand %vm1482_vm14, %vm1515_vm4  ;;  %v7539_v25 = vsel %vm10893_vm7, %v10892_v16, %v10891_v10   ;;  %vm10905_vm14 = vcmp.eq.s32.totalorder %v10854_v56, %v7319_v41  ;;  %vm10911_vm7 = vcmp.le.s32.totalorder %v7302_v31, %v7397_v13  ;;  %v10919_v56 = vld [vmem:[#allocation137_spill] sm:$0xff] }
 0x28b   : > { %10868 = vst [vmem:[#allocation162_spill] sm:$0xff] %v10867_v46  ;;  %v10880_v46 = vld [vmem:[#allocation42_spill] sm:$0xff]  ;;  %vm10916_vm5 = vcmp.ge.s32.totalorder %v7311_v11, %v7380_v1  ;;  %v10923_v10 = vld [vmem:[#allocation136_spill] sm:$0xff] }
 0x28c   : > { %v7506_v28 = vsel %vm1285_vm6, %v10880_v46, %v10879_v0   ;;  %v10888_v46 = vld [vmem:[#allocation44_spill] sm:$0xff]  ;;  %10894 = vst [vmem:[#allocation64_spill] sm:$0xff] %v7539_v25  ;;  %vm10900_vm6 = vcmp.ge.s32.totalorder %v1411_v59, %v7380_v1  ;;  %v10924_v16 = vld [vmem:[#allocation54_spill] sm:$0xff] }
 0x28d   : > { %1643 = vperm.xlu2 %2681, %v10865_v52   ;;  %1640 = vperm.xlu1 %2680, %v10869_v34   ;;  %v10873_v52 = vld [vmem:[#allocation146_spill] sm:$0xff]  ;;  %v7499_v34 = vsel %vm1284_vm3, %v10877_v24, %v10876_v19   ;;  %10881 = vst [vmem:[#allocation56_spill] sm:$0xff] %v7506_v28  ;;  %v10884_v19 = vld [vmem:[#allocation143_spill] sm:$0xff]  ;;  %vm10899_vm3 = vcmp.le.s32.totalorder %v1411_v59, %v7397_v13  ;;  %v11095_v28 = vmov 0 }
 0x28e   : > { %v7492_v47 = vsel %vm1283_vm0, %v10874_v63, %v10873_v52   ;;  %10878 = vst [vmem:[#allocation50_spill] sm:$0xff] %v7499_v34  ;;  %v10885_v63 = vld [vmem:[#allocation43_spill] sm:$0xff]  ;;  %vm10897_vm0 = vcmp.eq.s32.totalorder %v7098_v29, %v7319_v41  ;;  %vm7552_vm4 = vmand %vm10900_vm6, %vm10899_vm3  ;;  %v10903_v29 = vld [vmem:[#allocation139_spill] sm:$0xff] }
 0x28f   : > { %10875 = vst [vmem:[#allocation74_spill] sm:$0xff] %v7492_v47  ;;  %v7518_v55 = vpop.permute.xlu2 %1452  ;;  %v7525_v22 = vsel %vm1286_vm9, %v10885_v63, %v10884_v19   ;;  %v10887_v24 = vld [vmem:[#allocation142_spill] sm:$0xff]  ;;  %v7556_v63 = vpop.permute.xlu1 %1422  ;;  %v10904_v25 = vld [vmem:[#allocation48_spill] sm:$0xff]  ;;  %vm10915_vm9 = vcmp.le.s32.totalorder %v7311_v11, %v7397_v13  ;;  %v10928_v11 = vld [vmem:[#allocation58_spill] sm:$0xff] }
 0x290   : > { %10886 = vst [vmem:[#allocation99_spill] sm:$0xff] %v7525_v22  ;;  %v7532_v42 = vsel %vm10889_vm13, %v10888_v46, %v10887_v24   ;;  %v10896_v52 = vld [vmem:[#allocation47_spill] sm:$0xff]  ;;  %v1420_v45 = vpop.permute.xlu0 %1419  ;;  %v7567_v22 = vsel %vm10905_vm14, %v10904_v25, %v10903_v29   ;;  %v10908_v24 = vld [vmem:[#allocation52_spill] sm:$0xff]  ;;  %vm10909_vm13 = vcmp.eq.s32.totalorder %v10855_v36, %v7319_v41  ;;  %v10913_v46 = vmov 0  ;;  %v10920_v36 = vld [vmem:[#allocation53_spill] sm:$0xff] }
 0x291   : > { %10890 = vst [vmem:[#allocation61_spill] sm:$0xff] %v7532_v42  ;;  %v7546_v7 = vsel %vm10897_vm0, %v10896_v52, %v10895_v30   ;;  %v10907_v59 = vld [vmem:[#allocation138_spill] sm:$0xff]  ;;  %vm10912_vm0 = vcmp.ge.s32.totalorder %v7302_v31, %v7380_v1  ;;  %vm1488_vm6 = vcmp.ge.s32.totalorder %v1420_v45, %v7380_v1  ;;  %vm1521_vm10 = vcmp.le.s32.totalorder %v1420_v45, %v7397_v13  ;;  %v10927_v52 = vld [vmem:[#allocation135_spill] sm:$0xff] }
 0x292   : > { %10898 = vst [vmem:[#allocation105_spill] sm:$0xff] %v7546_v7  ;;  %vm7582_vm3 = vmand %vm10912_vm0, %vm10911_vm7  ;;  %v10917_v31 = vmov 0  ;;  %vm10921_vm0 = vcmp.eq.s32.totalorder %v7115_v48, %v7319_v41  ;;  %vm10925_vm14 = vcmp.eq.s32.totalorder %v7113_v9, %v7319_v41  ;;  %v10931_v45 = vld [vmem:[#allocation134_spill] sm:$0xff]  ;;  %v10935_v48 = vmov 0  ;;  %v10937_v9 = vld [vmem:[#allocation133_spill] sm:$0xff] }
 0x293   : > { %10906 = vst [vmem:[#allocation63_spill] sm:$0xff] %v7567_v22  ;;  %v7574_v22 = vsel %vm10909_vm13, %v10908_v24, %v10907_v59   ;;  %v10914_v46 = vsel %vm7582_vm3, 4294967295, %v10913_v46  ;;  %vm7598_vm7 = vmand %vm10916_vm5, %vm10915_vm9  ;;  %v7607_v42 = vsel %vm10921_vm0, %v10920_v36, %v10919_v56   ;;  %v7614_v30 = vsel %vm10925_vm14, %v10924_v16, %v10923_v10   ;;  %v10932_v29 = vld [vmem:[#allocation59_spill] sm:$0xff]  ;;  %v10938_v25 = vld [vmem:[#allocation60_spill] sm:$0xff] }
 0x294   : > { %10910 = vst [vmem:[#allocation85_spill] sm:$0xff] %v7574_v22  ;;  %v10918_v31 = vsel %vm7598_vm7, 4294967295, %v10917_v31  ;;  %vm10929_vm5 = vcmp.eq.s32.totalorder %v7076_v3, %v7319_v41  ;;  %vm10933_vm9 = vcmp.eq.s32.totalorder %v7148_v58, %v7319_v41  ;;  %vm7630_vm0 = vmand %vm1488_vm6, %vm1521_vm10  ;;  %vm10939_vm14 = vcmp.eq.s32.totalorder %v7146_v38, %v7319_v41  ;;  %v10941_v3 = vld [vmem:[#allocation132_spill] sm:$0xff]  ;;  %v10945_v58 = vld [vmem:[#allocation131_spill] sm:$0xff] }
 0x295   : > { %10922 = vst [vmem:[#allocation102_spill] sm:$0xff] %v7607_v42  ;;  %v7621_v7 = vsel %vm10929_vm5, %v10928_v11, %v10927_v52   ;;  %v10936_v48 = vsel %vm7630_vm0, 4294967295, %v10935_v48  ;;  %v7639_v11 = vsel %vm10939_vm14, %v10938_v25, %v10937_v9   ;;  %v10942_v22 = vld [vmem:[#allocation65_spill] sm:$0xff]  ;;  %vm10943_vm5 = vcmp.eq.s32.totalorder %v7085_v39, %v7319_v41  ;;  %v10946_v59 = vld [vmem:[#allocation66_spill] sm:$0xff]  ;;  %v10949_v24 = vld [vmem:[#allocation130_spill] sm:$0xff] }
 0x296   : > { %10926 = vst [vmem:[#allocation79_spill] sm:$0xff] %v7614_v30  ;;  %vm10947_vm10 = vcmp.eq.s32.totalorder %v7183_v49, %v7319_v41  ;;  %v10950_v56 = vld [vmem:[#allocation71_spill] sm:$0xff]  ;;  %vm10951_vm6 = vcmp.eq.s32.totalorder %v7181_v26, %v7319_v41  ;;  %vm10954_vm14 = vcmp.ge.s32.totalorder %v7324_v27, %v7380_v1  ;;  %v10955_v39 = vmov 0  ;;  %v10957_v38 = vld [vmem:[#allocation129_spill] sm:$0xff]  ;;  %v10958_v49 = vld [vmem:[#allocation72_spill] sm:$0xff] }
 0x297   : > { %10930 = vst [vmem:[#allocation67_spill] sm:$0xff] %v7621_v7  ;;  %v7628_v7 = vsel %vm10933_vm9, %v10932_v29, %v10931_v45   ;;  %v7646_v29 = vsel %vm10943_vm5, %v10942_v22, %v10941_v3   ;;  %v7653_v3 = vsel %vm10947_vm10, %v10946_v59, %v10945_v58   ;;  %v7660_v45 = vsel %vm10951_vm6, %v10950_v56, %v10949_v24   ;;  %v10961_v26 = vld [vmem:[#allocation128_spill] sm:$0xff]  ;;  %v10965_v42 = vld [vmem:[#allocation127_spill] sm:$0xff]  ;;  %v10969_v16 = vld [vmem:[#allocation126_spill] sm:$0xff] }
 0x298   : > { %10934 = vst [vmem:[#allocation104_spill] sm:$0xff] %v7628_v7  ;;  %vm10953_vm9 = vcmp.le.s32.totalorder %v7324_v27, %v7397_v13  ;;  %vm10959_vm10 = vcmp.eq.s32.totalorder %v7094_v50, %v7319_v41  ;;  %v10962_v36 = vld [vmem:[#allocation73_spill] sm:$0xff]  ;;  %vm10963_vm6 = vcmp.eq.s32.totalorder %v7219_v32, %v7319_v41  ;;  %v10966_v27 = vld [vmem:[#allocation75_spill] sm:$0xff]  ;;  %v10970_v30 = vld [vmem:[#allocation76_spill] sm:$0xff]  ;;  %v10974_v50 = vmov 0 }
 0x299   : > { %10940 = vst [vmem:[#allocation103_spill] sm:$0xff] %v7639_v11  ;;  %vm7668_vm5 = vmand %vm10954_vm14, %vm10953_vm9  ;;  %v7677_v56 = vsel %vm10959_vm10, %v10958_v49, %v10957_v38   ;;  %v7684_v24 = vsel %vm10963_vm6, %v10962_v36, %v10961_v26   ;;  %vm10967_vm9 = vcmp.eq.s32.totalorder %v7217_v12, %v7319_v41  ;;  %vm10971_vm14 = vcmp.eq.s32.totalorder %v7111_v44, %v7319_v41  ;;  %v10977_v32 = vld [vmem:[#allocation125_spill] sm:$0xff]  ;;  %v10978_v52 = vld [vmem:[#allocation77_spill] sm:$0xff] }
 0x29a   : > { %10944 = vst [vmem:[#allocation106_spill] sm:$0xff] %v7646_v29  ;;  %v10956_v39 = vsel %vm7668_vm5, 4294967295, %v10955_v39  ;;  %v7691_v10 = vsel %vm10967_vm9, %v10966_v27, %v10965_v42   ;;  %v7698_v30 = vsel %vm10971_vm14, %v10970_v30, %v10969_v16   ;;  %vm10973_vm10 = vcmp.ge.s32.totalorder %v7389_v23, %v7380_v1  ;;  %v10981_v11 = vld [vmem:[#allocation124_spill] sm:$0xff]  ;;  %v10982_v7 = vld [vmem:[#allocation88_spill] sm:$0xff]  ;;  %v10989_v9 = vld [vmem:[#allocation122_spill] sm:$0xff]  ;;  %v1429_v27 = vpop.permute.xlu0 %1428 }
 0x29b   : > { %10948 = vst [vmem:[#allocation107_spill] sm:$0xff] %v7653_v3  ;;  %vm7706_vm6 = vmand %vm10973_vm10, %vm1529_vm11  ;;  %v10976_v12 = vand.u32 15, %v10850_v14  ;;  %vm10979_vm9 = vcmp.eq.s32.totalorder %v7243_v43, %v7319_v41  ;;  %vm10983_vm14 = vcmp.eq.s32.totalorder %v7241_v20, %v7319_v41  ;;  %v10985_v23 = vld [vmem:[#allocation123_spill] sm:$0xff]  ;;  %vm10987_vm11 = vcmp.eq.s32.totalorder %v7143_v35, %v7319_v41  ;;  %v10990_v25 = vld [vmem:[#allocation90_spill] sm:$0xff] }
 0x29c   : > { %10952 = vst [vmem:[#allocation68_spill] sm:$0xff] %v7660_v45  ;;  %v10975_v50 = vsel %vm7706_vm6, 4294967295, %v10974_v50  ;;  %v7717_v44 = vsel %vm10979_vm9, %v10978_v52, %v10977_v32   ;;  %v10986_v45 = vld [vmem:[#allocation89_spill] sm:$0xff]  ;;  %vm10991_vm10 = vcmp.eq.s32.totalorder %v7266_v15, %v7319_v41  ;;  %vm10993_vm9 = vcmp.ge.s32.totalorder %v7300_v8, %v7380_v1  ;;  %v10997_v43 = vld [vmem:[#allocation121_spill] sm:$0xff]  ;;  %v10998_v3 = vld [vmem:[#allocation91_spill] sm:$0xff] }
 0x29d   : > { %10960 = vst [vmem:[#allocation109_spill] sm:$0xff] %v7677_v56  ;;  %1649 = vperm.xlu2 %2681, %v10976_v12   ;;  %v7731_v29 = vsel %vm10987_vm11, %v10986_v45, %v10985_v23   ;;  %v7738_v59 = vsel %vm10991_vm10, %v10990_v25, %v10989_v9   ;;  %v10994_v20 = vmov 0  ;;  %v10996_v35 = vand.u32 15, %v10852_v6  ;;  %v11001_v22 = vld [vmem:[#allocation120_spill] sm:$0xff]  ;;  %v11002_v58 = vld [vmem:[#allocation92_spill] sm:$0xff]  ;;  %v11009_v56 = vld [vmem:[#allocation118_spill] sm:$0xff] }
 0x29e   : > { %10964 = vst [vmem:[#allocation100_spill] sm:$0xff] %v7684_v24  ;;  %v10988_v14 = vmov %v7731_v29  ;;  %v10992_v32 = vmov %v7738_v59  ;;  %vm10999_vm11 = vcmp.eq.s32.totalorder %v7264_v53, %v7319_v41  ;;  %vm11003_vm10 = vcmp.eq.s32.totalorder %v7177_v37, %v7319_v41  ;;  %v11005_v8 = vld [vmem:[#allocation119_spill] sm:$0xff]  ;;  %v11006_v59 = vld [vmem:[#allocation93_spill] sm:$0xff]  ;;  %v11010_v38 = vld [vmem:[#allocation94_spill] sm:$0xff] }
 0x29f   : > { %10968 = vst [vmem:[#allocation45_spill] sm:$0xff] %v7691_v10  ;;  %1646 = vperm.xlu1 %2680, %v10996_v35   ;;  %v7757_v15 = vsel %vm10999_vm11, %v10998_v3, %v10997_v43   ;;  %v7764_v12 = vsel %vm11003_vm10, %v11002_v58, %v11001_v22   ;;  %vm11013_vm11 = vcmp.le.s32.totalorder %v7406_v21, %v7397_v13  ;;  %v11015_v37 = vmov 0  ;;  %v11017_v49 = vld [vmem:[#allocation32_spill] sm:$0xff]  ;;  %v11018_v36 = vld [vmem:[#allocation31_spill] sm:$0xff] }
 0x2a0   : > { %10972 = vst [vmem:[#allocation98_spill] sm:$0xff] %v7698_v30  ;;  %v11000_v0 = vmov %v7757_v15  ;;  %v11004_v47 = vmov %v7764_v12  ;;  %vm11014_vm10 = vcmp.ge.s32.totalorder %v7406_v21, %v7380_v1  ;;  %v1373_v26 = vand.u32 15, %v11017_v49  ;;  %v1432_v21 = vpop.permute.xlu1 %1431  ;;  %v11058_v58 = vld [vmem:[#allocation36_spill] sm:$0xff] }
 0x2a1   : > { %10980 = vst [vmem:[#allocation86_spill] sm:$0xff] %v7717_v44  ;;  %v7724_v44 = vsel %vm10983_vm14, %v10982_v7, %v10981_v11   ;;  %vm7746_vm14 = vmand %vm10993_vm9, %vm1520_vm8  ;;  %vm11007_vm8 = vcmp.eq.s32.totalorder %v7286_v62, %v7319_v41  ;;  %vm11011_vm9 = vcmp.eq.s32.totalorder %v7284_v5, %v7319_v41  ;;  %v1462_v62 = vpop.permute.xlu2 %1461  ;;  %v1372_v42 = vand.u32 15, %v11018_v36  ;;  %v11261_v29 = vld [vmem:[#allocation106_spill] sm:$0xff] }
 0x2a2   : > { %10984 = vst [vmem:[#allocation95_spill] sm:$0xff] %v7724_v44  ;;  %v10995_v20 = vsel %vm7746_vm14, 4294967295, %v10994_v20  ;;  %v7771_v24 = vsel %vm11007_vm8, %v11006_v59, %v11005_v8   ;;  %v7778_v53 = vsel %vm11011_vm9, %v11010_v38, %v11009_v56   ;;  %vm7786_vm13 = vmand %vm11014_vm10, %vm11013_vm11  ;;  %vm1475_vm8 = vcmp.ge.s32.totalorder %v7213_v18, %v7380_v1  ;;  %v1438_v52 = vpop.permute.xlu0 %1437  ;;  %v11266_v38 = vld [vmem:[#allocation102_spill] sm:$0xff] }
 0x2a3   : > { %v11008_v35 = vmov %v7771_v24  ;;  %v11012_v6 = vmov %v7778_v53  ;;  %v11016_v37 = vsel %vm7786_vm13, 4294967295, %v11015_v37  ;;  %vm1508_vm9 = vcmp.le.s32.totalorder %v7213_v18, %v7397_v13  ;;  %v11064_v24 = vld [vmem:[#allocation35_spill] sm:$0xff] }
 0x2a4   : > { %vm11019_vm11 = vcmp.ge.s32.totalorder %v7309_v33, %v7380_v1  ;;  %v11020_v5 = vmov 0  ;;  %vm7808_vm6 = vmand %vm1475_vm8, %vm1508_vm9  ;;  %v11022_v10 = vmov 0  ;;  %vm1478_vm5 = vcmp.ge.s32.totalorder %v7235_v54, %v7380_v1 }
 0x2a5   : > { %vm7802_vm10 = vmand %vm11019_vm11, %vm1523_vm12  ;;  %v11023_v10 = vsel %vm7808_vm6, 4294967295, %v11022_v10  ;;  %vm1511_vm7 = vcmp.le.s32.totalorder %v7235_v54, %v7397_v13  ;;  %vm1491_vm12 = vcmp.ge.s32.totalorder %v1429_v27, %v7380_v1  ;;  %vm1525_vm13 = vcmp.le.s32.totalorder %v1432_v21, %v7397_v13  ;;  %1655 = vperm.xlu2 %2681, %v1373_v26  }
 0x2a6   : > { %v11021_v5 = vsel %vm7802_vm10, 4294967295, %v11020_v5  ;;  %vm1524_vm10 = vcmp.le.s32.totalorder %v1429_v27, %v7397_v13  ;;  %vm7820_vm3 = vmand %vm1478_vm5, %vm1511_vm7  ;;  %v11024_v18 = vmov 0  ;;  %v11026_v33 = vmov 0 }
 0x2a7   : > { %v11025_v18 = vsel %vm7820_vm3, 4294967295, %v11024_v18  ;;  %vm7824_vm8 = vmand %vm1491_vm12, %vm1524_vm10  ;;  %vm1481_vm9 = vcmp.ge.s32.totalorder %v7260_v60, %v7380_v1  ;;  %vm1514_vm14 = vcmp.le.s32.totalorder %v7260_v60, %v7397_v13  ;;  %vm1484_vm11 = vcmp.ge.s32.totalorder %v7280_v4, %v7380_v1  ;;  %1652 = vperm.xlu1 %2680, %v1372_v42  }
 0x2a8   : > { %v11027_v33 = vsel %vm7824_vm8, 4294967295, %v11026_v33  ;;  %vm1517_vm0 = vcmp.le.s32.totalorder %v7280_v4, %v7397_v13  ;;  %vm7836_vm7 = vmand %vm1481_vm9, %vm1514_vm14  ;;  %v11028_v54 = vmov 0  ;;  %v11030_v16 = vmov 0  ;;  %v1441_v12 = vpop.permute.xlu1 %1440 }
 0x2a9   : > { %v11029_v54 = vsel %vm7836_vm7, 4294967295, %v11028_v54  ;;  %vm7840_vm5 = vmand %vm1484_vm11, %vm1517_vm0  ;;  %vm11032_vm10 = vcmp.le.s32.totalorder %v7556_v63, %v7397_v13  ;;  %vm11033_vm12 = vcmp.ge.s32.totalorder %v7556_v63, %v7380_v1  ;;  %v11034_v60 = vmov 0  ;;  %v1471_v30 = vpop.permute.xlu2 %1470 }
 0x2aa   : > { %v11031_v16 = vsel %vm7840_vm5, 4294967295, %v11030_v16  ;;  %vm7850_vm8 = vmand %vm11033_vm12, %vm11032_vm10  ;;  %vm11036_vm14 = vcmp.le.s32.totalorder %v7322_v57, %v7397_v13  ;;  %vm11037_vm0 = vcmp.ge.s32.totalorder %v7322_v57, %v7380_v1  ;;  %v11038_v4 = vmov 0  ;;  %v1447_v22 = vpop.permute.xlu0 %1446 }
 0x2ab   : > { %v11035_v60 = vsel %vm7850_vm8, 4294967295, %v11034_v60  ;;  %vm7860_vm11 = vmand %vm11037_vm0, %vm11036_vm14  ;;  %vm11040_vm9 = vcmp.ge.s32.totalorder %v1432_v21, %v7380_v1  ;;  %v11041_v63 = vmov 0  ;;  %v1375_v44 = vand.u32 15, %v10824_v51 }
 0x2ac   : > { %v11039_v4 = vsel %vm7860_vm11, 4294967295, %v11038_v4  ;;  %vm7866_vm5 = vmand %vm11040_vm9, %vm1525_vm13  ;;  %vm11043_vm10 = vcmp.le.s32.totalorder %v1462_v62, %v7397_v13  ;;  %vm11044_vm12 = vcmp.ge.s32.totalorder %v1462_v62, %v7380_v1  ;;  %v11045_v57 = vmov 0 }
 0x2ad   : > { %v11042_v63 = vsel %vm7866_vm5, 4294967295, %v11041_v63  ;;  %vm7875_vm8 = vmand %vm11044_vm12, %vm11043_vm10  ;;  %vm1505_vm14 = vcmp.ge.s32.totalorder %v1471_v30, %v7380_v1  ;;  %vm1538_vm0 = vcmp.le.s32.totalorder %v1471_v30, %v7397_v13  ;;  %vm1494_vm13 = vcmp.ge.s32.totalorder %v1438_v52, %v7380_v1  ;;  %1661 = vperm.xlu2 %2681, %v1375_v44  }
 0x2ae   : > { %v11046_v57 = vsel %vm7875_vm8, 4294967295, %v11045_v57  ;;  %vm1495_vm9 = vcmp.ge.s32.totalorder %v1441_v12, %v7380_v1  ;;  %vm1527_vm5 = vcmp.le.s32.totalorder %v1438_v52, %v7397_v13  ;;  %vm1528_vm11 = vcmp.le.s32.totalorder %v1441_v12, %v7397_v13  ;;  %vm7905_vm6 = vmand %vm1505_vm14, %vm1538_vm0 }
 0x2af   : > { %vm11047_vm7 = vcmp.le.s32.totalorder %v7518_v55, %v7397_v13  ;;  %vm11048_vm10 = vcmp.ge.s32.totalorder %v7518_v55, %v7380_v1  ;;  %v11049_v11 = vmov 0  ;;  %v1374_v7 = vand.u32 15, %v10826_v40  ;;  %vm7897_vm8 = vmand %vm1494_vm13, %vm1527_vm5 }
 0x2b0   : > { %vm7891_vm12 = vmand %vm11048_vm10, %vm11047_vm7  ;;  %v1313_v23 = vand.u32 15, %v7319_v41  ;;  %v11055_v9 = vmov 0  ;;  %v3230_v55 = vmov 0.0   ;;  %vm11057_vm7 = vcmp.gt.f32.partialorder %v7101_v2, -inf  ;;  %v1450_v15 = vpop.permute.xlu1 %1449 }
 0x2b1   : > { %v11050_v11 = vsel %vm7891_vm12, 4294967295, %v11049_v11  ;;  %vm7901_vm3 = vmand %vm1495_vm9, %vm1528_vm11  ;;  %v11056_v9 = vsel %vm7905_vm6, 4294967295, %v11055_v9  ;;  %v1862_v25 = vsel %vm11057_vm7, 1.0, %v3230_v55  ;;  %1658 = vperm.xlu1 %2680, %v1374_v7   ;;  %v1578_v3 = vpop.permute.xlu2 %1577  ;;  %v1377_v8 = vand.u32 15, %v11058_v58 }
 0x2b2   : > { %v7911_v43 = vadd.s32 4294967294, %v1313_v23  ;;  %v7913_v41 = vadd.s32 2, %v1313_v23  ;;  %1863 = vmax.xlane.f32.xlu0 %v1862_v25  ;;  %vm1497_vm14 = vcmp.ge.s32.totalorder %v1447_v22, %v7380_v1  ;;  %vm1498_vm0 = vcmp.ge.s32.totalorder %v1450_v15, %v7380_v1  ;;  %v1456_v42 = vpop.permute.xlu0 %1455 }
 0x2b3   : > { %vm1530_vm13 = vcmp.le.s32.totalorder %v1447_v22, %v7397_v13  ;;  %vm1531_vm9 = vcmp.le.s32.totalorder %v1450_v15, %v7397_v13  ;;  %v11060_v59 = vmov 0  ;;  %v1376_v56 = vand.u32 15, %v11064_v24 }
 0x2b4   : > { %vm1670_vm5 = vcmp.ge.s32.totalorder %v1578_v3, %v7911_v43  ;;  %vm1735_vm11 = vcmp.le.s32.totalorder %v1578_v3, %v7913_v41  ;;  %vm7932_vm6 = vmand %vm1498_vm0, %vm1531_vm9  ;;  %v11068_v49 = vmov 0  ;;  %v11071_v27 = vmov 0  ;;  %v11222_v3 = vld [vmem:[#allocation157_spill] sm:$0xff] }
 0x2b5   : > { %vm1702_vm10 = vmand %vm7457_vm15, %vm1670_vm5  ;;  %1667 = vperm.xlu2 %2681, %v1377_v8   ;;  %v11076_v12 = vmov 0  ;;  %v11080_v55 = vmov 0  ;;  %v11089_v8 = vmov 0  ;;  %v11142_v45 = vmov 0 }
 0x2b6   : > { %vm7924_vm7 = vmand %vm1702_vm10, %vm1735_vm11  ;;  %v11177_v53 = vmov 0  ;;  %v11193_v52 = vmov 0 }
 0x2b7   : > { %v11061_v59 = vsel %vm7924_vm7, 4294967295, %v11060_v59  ;;  %vm7936_vm12 = vmand %vm1497_vm14, %vm1530_vm13  ;;  %vm1500_vm14 = vcmp.ge.s32.totalorder %v1456_v42, %v7380_v1  ;;  %vm1533_vm13 = vcmp.le.s32.totalorder %v1456_v42, %v7397_v13  ;;  %v11223_v42 = vmov %v11222_v3  ;;  %v11260_v3 = vld [vmem:[#allocation107_spill] sm:$0xff] }
 0x2b8   : > { %11062 = vst [vmem:[#allocation70_spill] sm:$0xff] %v11061_v59  ;;  %v11069_v49 = vsel %vm7936_vm12, 4294967295, %v11068_v49  ;;  %v1459_v36 = vpop.permute.xlu1 %1458 }
 0x2b9   : > { %1664 = vperm.xlu1 %2680, %v1376_v56   ;;  %v1587_v26 = vpop.permute.xlu2 %1586  ;;  %vm1501_vm0 = vcmp.ge.s32.totalorder %v1459_v36, %v7380_v1  ;;  %vm1534_vm9 = vcmp.le.s32.totalorder %v1459_v36, %v7397_v13  ;;  %v11103_v56 = vmov 0  ;;  %v11115_v36 = vmov 0 }
 0x2ba   : > { %vm1673_vm15 = vcmp.ge.s32.totalorder %v1587_v26, %v7911_v43  ;;  %vm1738_vm5 = vcmp.le.s32.totalorder %v1587_v26, %v7913_v41  ;;  %vm7955_vm7 = vmand %vm1501_vm0, %vm1534_vm9  ;;  %v1465_v23 = vpop.permute.xlu0 %1464 }
 0x2bb   : > { %vm1705_vm11 = vmand %vm7474_vm1, %vm1673_vm15  ;;  %v11077_v12 = vsel %vm7955_vm7, 4294967295, %v11076_v12  ;;  %vm1503_vm9 = vcmp.ge.s32.totalorder %v1465_v23, %v7380_v1 }
 0x2bc   : > { %vm7948_vm10 = vmand %vm1705_vm11, %vm1738_vm5 }
 0x2bd   : > { %v11072_v27 = vsel %vm7948_vm10, 4294967295, %v11071_v27  ;;  %vm7959_vm1 = vmand %vm1500_vm14, %vm1533_vm13  ;;  %vm1536_vm14 = vcmp.le.s32.totalorder %v1465_v23, %v7397_v13  ;;  %v11132_v23 = vmov 0 }
 0x2be   : > { %11073 = vst [vmem:[#allocation163_spill] sm:$0xff] %v11072_v27 }
 0x2c0   : > { %v1468_v7 = vpop.permute.xlu1 %1467 }
 0x2c1   : > { %v1596_v44 = vpop.permute.xlu2 %1595  ;;  %vm1504_vm10 = vcmp.ge.s32.totalorder %v1468_v7, %v7380_v1  ;;  %vm1537_vm0 = vcmp.le.s32.totalorder %v1468_v7, %v7397_v13 }
 0x2c2   : > { %vm1676_vm15 = vcmp.ge.s32.totalorder %v1596_v44, %v7911_v43  ;;  %vm1741_vm5 = vcmp.le.s32.totalorder %v1596_v44, %v7913_v41  ;;  %vm7978_vm7 = vmand %vm1504_vm10, %vm1537_vm0  ;;  %v1474_v58 = vpop.permute.xlu0 %1473  ;;  %v11253_v44 = vld [vmem:[#allocation95_spill] sm:$0xff] }
 0x2c3   : > { %vm1708_vm11 = vmand %vm7514_vm2, %vm1676_vm15  ;;  %vm1506_vm0 = vcmp.ge.s32.totalorder %v1474_v58, %v7380_v1  ;;  %v11100_v1 = vmov 0 }
 0x2c4   : > { %vm7971_vm13 = vmand %vm1708_vm11, %vm1741_vm5 }
 0x2c5   : > { %v11081_v55 = vsel %vm7971_vm13, 4294967295, %v11080_v55  ;;  %vm7982_vm2 = vmand %vm1503_vm9, %vm1536_vm14  ;;  %vm1539_vm9 = vcmp.le.s32.totalorder %v1474_v58, %v7397_v13  ;;  %v11208_v58 = vmov 0 }
 0x2c6   : > { %11082 = vst [vmem:[#allocation164_spill] sm:$0xff] %v11081_v55  ;;  %v11088_v61 = vsel %vm7982_vm2, 4294967295, %v11087_v61  ;;  %vm11094_vm2 = vnez %v11023_v10  ;;  %v11190_v55 = vld [vmem:[#allocation154_spill] sm:$0xff] }
 0x2c8   : > { %v1575_v22 = vpop.permute.xlu1 %1574 }
 0x2c9   : > { %v1605_v15 = vpop.permute.xlu2 %1604  ;;  %vm1669_vm13 = vcmp.ge.s32.totalorder %v1575_v22, %v7911_v43  ;;  %vm1734_vm10 = vcmp.le.s32.totalorder %v1575_v22, %v7913_v41  ;;  %v11139_v22 = vld [vmem:[#allocation159_spill] sm:$0xff] }
 0x2ca   : > { %vm1679_vm15 = vcmp.ge.s32.totalorder %v1605_v15, %v7911_v43  ;;  %vm1744_vm5 = vcmp.le.s32.totalorder %v1605_v15, %v7913_v41  ;;  %vm1701_vm12 = vmand %vm11094_vm2, %vm1669_vm13  ;;  %v1581_v24 = vpop.permute.xlu0 %1580 }
 0x2cb   : > { %vm1711_vm11 = vmand %vm7552_vm4, %vm1679_vm15 }
 0x2cc   : > { %vm7994_vm14 = vmand %vm1711_vm11, %vm1744_vm5 }
 0x2cd   : > { %v11090_v8 = vsel %vm7994_vm14, 4294967295, %v11089_v8  ;;  %vm8003_vm4 = vmand %vm1701_vm12, %vm1734_vm10  ;;  %vm11102_vm12 = vnez %v10936_v48  ;;  %vm11108_vm14 = vnez %v11025_v18  ;;  %v11109_v48 = vmov 0 }
 0x2ce   : > { %11091 = vst [vmem:[#allocation165_spill] sm:$0xff] %v11090_v8  ;;  %v11096_v28 = vsel %vm8003_vm4, 4294967295, %v11095_v28  ;;  %vm8010_vm15 = vmand %vm1506_vm0, %vm1539_vm9  ;;  %vm1671_vm0 = vcmp.ge.s32.totalorder %v1581_v24, %v7911_v43  ;;  %vm1736_vm9 = vcmp.le.s32.totalorder %v1581_v24, %v7913_v41  ;;  %v11148_v8 = vmov 0  ;;  %v11257_v24 = vld [vmem:[#allocation100_spill] sm:$0xff] }
 0x2cf   : > { %11097 = vst [vmem:[#allocation166_spill] sm:$0xff] %v11096_v28  ;;  %v11101_v1 = vsel %vm8010_vm15, 4294967295, %v11100_v1 }
 0x2d0   : > { %v1584_v10 = vpop.permute.xlu1 %1583 }
 0x2d1   : > { %v1614_v13 = vpop.permute.xlu2 %1613  ;;  %vm1672_vm2 = vcmp.ge.s32.totalorder %v1584_v10, %v7911_v43  ;;  %vm1737_vm10 = vcmp.le.s32.totalorder %v1584_v10, %v7913_v41  ;;  %v11140_v10 = vmov %v11139_v22  ;;  %v11267_v22 = vld [vmem:[#allocation85_spill] sm:$0xff] }
 0x2d2   : > { %vm1682_vm5 = vcmp.ge.s32.totalorder %v1614_v13, %v7911_v43  ;;  %vm1747_vm11 = vcmp.le.s32.totalorder %v1614_v13, %v7913_v41  ;;  %vm1704_vm15 = vmand %vm11108_vm14, %vm1672_vm2  ;;  %v1590_v30 = vpop.permute.xlu0 %1589  ;;  %vm11120_vm2 = vnez %v11027_v33  ;;  %v11126_v33 = vmov 0  ;;  %v11157_v13 = vld [vmem:[#allocation49_spill] sm:$0xff] }
 0x2d3   : > { %vm1714_vm13 = vmand %vm11102_vm12, %vm1682_vm5 }
 0x2d4   : > { %vm8022_vm4 = vmand %vm1714_vm13, %vm1747_vm11  ;;  %vm11114_vm11 = vnez %v10914_v46  ;;  %v11121_v46 = vmov 0 }
 0x2d5   : > { %v11104_v56 = vsel %vm8022_vm4, 4294967295, %v11103_v56  ;;  %vm8031_vm5 = vmand %vm1704_vm15, %vm1737_vm10 }
 0x2d6   : > { %11105 = vst [vmem:[#allocation167_spill] sm:$0xff] %v11104_v56  ;;  %v11110_v48 = vsel %vm8031_vm5, 4294967295, %v11109_v48  ;;  %vm1703_vm12 = vmand %vm11114_vm11, %vm1671_vm0  ;;  %vm1674_vm11 = vcmp.ge.s32.totalorder %v1590_v30, %v7911_v43  ;;  %v11166_v56 = vmov 0 }
 0x2d7   : > { %11111 = vst [vmem:[#allocation168_spill] sm:$0xff] %v11110_v48  ;;  %vm8040_vm13 = vmand %vm1703_vm12, %vm1736_vm9  ;;  %vm1739_vm12 = vcmp.le.s32.totalorder %v1590_v30, %v7913_v41  ;;  %v11183_v30 = vmov 0 }
 0x2d8   : > { %v11116_v36 = vsel %vm8040_vm13, 4294967295, %v11115_v36  ;;  %v1593_v27 = vpop.permute.xlu1 %1592  ;;  %vm11125_vm13 = vnez %v11029_v54 }
 0x2d9   : > { %11117 = vst [vmem:[#allocation169_spill] sm:$0xff] %v11116_v36  ;;  %v1623_v21 = vpop.permute.xlu2 %1622  ;;  %vm1675_vm0 = vcmp.ge.s32.totalorder %v1593_v27, %v7911_v43  ;;  %vm1740_vm9 = vcmp.le.s32.totalorder %v1593_v27, %v7913_v41  ;;  %v11278_v27 = vld [vmem:[#allocation97_spill] sm:$0xff] }
 0x2da   : > { %vm1685_vm14 = vcmp.ge.s32.totalorder %v1623_v21, %v7911_v43  ;;  %vm1750_vm15 = vcmp.le.s32.totalorder %v1623_v21, %v7913_v41  ;;  %vm1707_vm4 = vmand %vm11125_vm13, %vm1675_vm0  ;;  %v1599_v15 = vpop.permute.xlu0 %1598  ;;  %v11174_v21 = vld [vmem:[#allocation156_spill] sm:$0xff] }
 0x2db   : > { %vm1717_vm10 = vmand %vm11120_vm2, %vm1685_vm14 }
 0x2dc   : > { %vm8056_vm5 = vmand %vm1717_vm10, %vm1750_vm15  ;;  %vm11131_vm15 = vnez %v10918_v31  ;;  %v11137_v31 = vmov 0 }
 0x2dd   : > { %v11122_v46 = vsel %vm8056_vm5, 4294967295, %v11121_v46  ;;  %vm8065_vm14 = vmand %vm1707_vm4, %vm1740_vm9 }
 0x2de   : > { %11123 = vst [vmem:[#allocation170_spill] sm:$0xff] %v11122_v46  ;;  %v11127_v33 = vsel %vm8065_vm14, 4294967295, %v11126_v33  ;;  %vm1706_vm2 = vmand %vm11131_vm15, %vm1674_vm11  ;;  %vm1742_vm15 = vcmp.le.s32.totalorder %v1599_v15, %v7913_v41  ;;  %v11303_v46 = vld [vmem:[#allocation117_spill] sm:$0xff] }
 0x2df   : > { %11128 = vst [vmem:[#allocation171_spill] sm:$0xff] %v11127_v33  ;;  %vm8074_vm10 = vmand %vm1706_vm2, %vm1739_vm12  ;;  %vm1677_vm12 = vcmp.ge.s32.totalorder %v1599_v15, %v7911_v43  ;;  %v11175_v33 = vmov %v11174_v21  ;;  %v11199_v15 = vmov 0 }
 0x2e0   : > { %v11133_v23 = vsel %vm8074_vm10, 4294967295, %v11132_v23  ;;  %v1602_v25 = vpop.permute.xlu1 %1601  ;;  %vm11141_vm10 = vnez %v11031_v16 }
 0x2e1   : > { %11134 = vst [vmem:[#allocation172_spill] sm:$0xff] %v11133_v23  ;;  %v1632_v54 = vpop.permute.xlu2 %1631  ;;  %vm1678_vm9 = vcmp.ge.s32.totalorder %v1602_v25, %v7911_v43  ;;  %vm1743_vm11 = vcmp.le.s32.totalorder %v1602_v25, %v7913_v41  ;;  %v11196_v25 = vld [vmem:[#allocation80_spill] sm:$0xff] }
 0x2e2   : > { %vm1688_vm4 = vcmp.ge.s32.totalorder %v1632_v54, %v7911_v43  ;;  %vm1753_vm13 = vcmp.le.s32.totalorder %v1632_v54, %v7913_v41  ;;  %vm1710_vm14 = vmand %vm11141_vm10, %vm1678_vm9  ;;  %v1608_v59 = vpop.permute.xlu0 %1607  ;;  %vm11153_vm9 = vnez %v10975_v50  ;;  %v11158_v54 = vmov %v11157_v13  ;;  %v11207_v13 = vld [vmem:[#allocation153_spill] sm:$0xff] }
 0x2e3   : > { %vm1720_vm0 = vmand %vm7897_vm8, %vm1688_vm4  ;;  %vm11147_vm4 = vnez %v10956_v39  ;;  %v11154_v39 = vmov 0  ;;  %v11160_v50 = vmov 0  ;;  %v11197_v34 = vmov %v11196_v25  ;;  %v11270_v25 = vld [vmem:[#allocation64_spill] sm:$0xff] }
 0x2e4   : > { %vm8089_vm2 = vmand %vm1720_vm0, %vm1753_vm13 }
 0x2e5   : > { %v11138_v31 = vsel %vm8089_vm2, 4294967295, %v11137_v31  ;;  %vm8098_vm8 = vmand %vm1710_vm14, %vm1743_vm11 }
 0x2e6   : > { %v11143_v45 = vsel %vm8098_vm8, 4294967295, %v11142_v45  ;;  %vm1709_vm13 = vmand %vm11147_vm4, %vm1677_vm12  ;;  %vm1680_vm4 = vcmp.ge.s32.totalorder %v1608_v59, %v7911_v43 }
 0x2e7   : > { %11144 = vst [vmem:[#allocation173_spill] sm:$0xff] %v11143_v45  ;;  %vm8107_vm0 = vmand %vm1709_vm13, %vm1742_vm15  ;;  %vm1745_vm13 = vcmp.le.s32.totalorder %v1608_v59, %v7913_v41 }
 0x2e8   : > { %v11149_v8 = vsel %vm8107_vm0, 4294967295, %v11148_v8  ;;  %v1611_v28 = vpop.permute.xlu1 %1610  ;;  %vm11159_vm0 = vnez %v10995_v20 }
 0x2e9   : > { %11150 = vst [vmem:[#allocation174_spill] sm:$0xff] %v11149_v8  ;;  %v1638_v16 = vpop.permute.xlu2 %1637  ;;  %vm1681_vm12 = vcmp.ge.s32.totalorder %v1611_v28, %v7911_v43  ;;  %vm1746_vm15 = vcmp.le.s32.totalorder %v1611_v28, %v7913_v41  ;;  %v11254_v28 = vld [vmem:[#allocation86_spill] sm:$0xff] }
 0x2ea   : > { %vm1690_vm14 = vcmp.ge.s32.totalorder %v1638_v16, %v7911_v43  ;;  %vm1755_vm10 = vcmp.le.s32.totalorder %v1638_v16, %v7913_v41  ;;  %vm1713_vm5 = vmand %vm11159_vm0, %vm1681_vm12  ;;  %v1617_v26 = vpop.permute.xlu0 %1616  ;;  %v11216_v16 = vld [vmem:[#allocation111_spill] sm:$0xff] }
 0x2eb   : > { %vm1722_vm11 = vmand %vm11153_vm9, %vm1690_vm14 }
 0x2ec   : > { %vm8122_vm8 = vmand %vm1722_vm11, %vm1755_vm10  ;;  %vm11165_vm10 = vnez %v11016_v37  ;;  %v11241_v37 = vld [vmem:[#allocation152_spill] sm:$0xff] }
 0x2ed   : > { %v11155_v39 = vsel %vm8122_vm8, 4294967295, %v11154_v39  ;;  %vm8131_vm14 = vmand %vm1713_vm5, %vm1746_vm15 }
 0x2ee   : > { %v11156_v36 = vmov %v11155_v39  ;;  %v11161_v50 = vsel %vm8131_vm14, 4294967295, %v11160_v50  ;;  %vm1712_vm9 = vmand %vm11165_vm10, %vm1680_vm4 }
 0x2ef   : > { %11162 = vst [vmem:[#allocation175_spill] sm:$0xff] %v11161_v50  ;;  %vm8140_vm11 = vmand %vm1712_vm9, %vm1745_vm13  ;;  %vm1748_vm13 = vcmp.le.s32.totalorder %v1617_v26, %v7913_v41  ;;  %vm1683_vm9 = vcmp.ge.s32.totalorder %v1617_v26, %v7911_v43  ;;  %v11227_v50 = vld [vmem:[#allocation150_spill] sm:$0xff]  ;;  %v11277_v26 = vld [vmem:[#allocation110_spill] sm:$0xff] }
 0x2f0   : > { %v11167_v56 = vsel %vm8140_vm11, 4294967295, %v11166_v56  ;;  %v1620_v48 = vpop.permute.xlu1 %1619  ;;  %vm11176_vm11 = vnez %v11021_v5 }
 0x2f1   : > { %11168 = vst [vmem:[#allocation176_spill] sm:$0xff] %v11167_v56  ;;  %v1644_v20 = vpop.permute.xlu2 %1643  ;;  %vm1684_vm15 = vcmp.ge.s32.totalorder %v1620_v48, %v7911_v43  ;;  %vm1749_vm4 = vcmp.le.s32.totalorder %v1620_v48, %v7913_v41 }
 0x2f2   : > { %vm1692_vm5 = vcmp.ge.s32.totalorder %v1644_v20, %v7911_v43  ;;  %vm1757_vm0 = vcmp.le.s32.totalorder %v1644_v20, %v7913_v41  ;;  %vm1716_vm14 = vmand %vm11176_vm11, %vm1684_vm15  ;;  %v1626_v23 = vpop.permute.xlu0 %1625  ;;  %v11191_v20 = vmov %v11190_v55  ;;  %v11252_v55 = vmov %v10988_v14 }
 0x2f3   : > { %vm1724_vm12 = vmand %vm7932_vm6, %vm1692_vm5  ;;  %vm11182_vm5 = vnez %v11035_v60 }
 0x2f4   : > { %vm8154_vm10 = vmand %vm1724_vm12, %vm1757_vm0 }
 0x2f5   : > { %vm8164_vm6 = vmand %vm1716_vm14, %vm1749_vm4 }
 0x2f6   : > { %v11178_v53 = vsel %vm8164_vm6, 4294967295, %v11177_v53  ;;  %vm1715_vm0 = vmand %vm11182_vm5, %vm1683_vm9  ;;  %vm1686_vm5 = vcmp.ge.s32.totalorder %v1626_v23, %v7911_v43  ;;  %vm1751_vm6 = vcmp.le.s32.totalorder %v1626_v23, %v7913_v41 }
 0x2f7   : > { %11179 = vst [vmem:[#allocation177_spill] sm:$0xff] %v11178_v53  ;;  %vm8173_vm12 = vmand %vm1715_vm0, %vm1748_vm13  ;;  %vm11192_vm0 = vnez %v11039_v4  ;;  %v11245_v53 = vld [vmem:[#allocation151_spill] sm:$0xff] }
 0x2f8   : > { %v11184_v30 = vsel %vm8173_vm12, 4294967295, %v11183_v30  ;;  %v1629_v7 = vpop.permute.xlu1 %1628 }
 0x2f9   : > { %11185 = vst [vmem:[#allocation178_spill] sm:$0xff] %v11184_v30  ;;  %v1650_v5 = vpop.permute.xlu2 %1649  ;;  %vm1687_vm4 = vcmp.ge.s32.totalorder %v1629_v7, %v7911_v43  ;;  %vm1752_vm13 = vcmp.le.s32.totalorder %v1629_v7, %v7913_v41  ;;  %v11255_v30 = vld [vmem:[#allocation98_spill] sm:$0xff]  ;;  %v11263_v7 = vld [vmem:[#allocation104_spill] sm:$0xff] }
 0x2fa   : > { %vm1694_vm14 = vcmp.ge.s32.totalorder %v1650_v5, %v7911_v43  ;;  %vm1759_vm11 = vcmp.le.s32.totalorder %v1650_v5, %v7913_v41  ;;  %vm1719_vm12 = vmand %vm11192_vm0, %vm1687_vm4  ;;  %v11217_v5 = vmov %v11216_v16 }
 0x2fb   : > { %vm1726_vm15 = vmand %vm7959_vm1, %vm1694_vm14  ;;  %vm11198_vm14 = vnez %v11042_v63 }
 0x2fc   : > { %vm8186_vm9 = vmand %vm1726_vm15, %vm1759_vm11 }
 0x2fd   : > { %vm8197_vm1 = vmand %vm1719_vm12, %vm1752_vm13  ;;  %vm11204_vm13 = vnez %v11046_v57  ;;  %v11211_v57 = vld [vmem:[#allocation158_spill] sm:$0xff] }
 0x2fe   : > { %v11194_v52 = vsel %vm8197_vm1, 4294967295, %v11193_v52  ;;  %vm1718_vm11 = vmand %vm11198_vm14, %vm1686_vm5  ;;  %v11212_v18 = vmov %v11211_v57  ;;  %v11333_v57 = vld [vmem:[#allocation173_spill] sm:$0xff] }
 0x2ff   : > { %v11195_v17 = vmov %v11194_v52  ;;  %vm8206_vm15 = vmand %vm1718_vm11, %vm1751_vm6  ;;  %v11285_v52 = vsel %vm8154_vm10, -inf, %v11175_v33   ;;  %vm11292_vm10 = vnez %v11138_v31  ;;  %v11320_v33 = vld [vmem:[#allocation81_spill] sm:$0xff] }
 0x300   : > { %v11200_v15 = vsel %vm8206_vm15, 4294967295, %v11199_v15  ;;  %v1635_v45 = vpop.permute.xlu1 %1634  ;;  %v11325_v31 = vld [vmem:[#allocation113_spill] sm:$0xff] }
 0x301   : > { %11201 = vst [vmem:[#allocation179_spill] sm:$0xff] %v11200_v15  ;;  %v1656_v4 = vpop.permute.xlu2 %1655  ;;  %vm1689_vm1 = vcmp.ge.s32.totalorder %v1635_v45, %v7911_v43  ;;  %vm1754_vm6 = vcmp.le.s32.totalorder %v1635_v45, %v7913_v41  ;;  %v11259_v45 = vld [vmem:[#allocation68_spill] sm:$0xff]  ;;  %v11272_v15 = vld [vmem:[#allocation99_spill] sm:$0xff] }
 0x302   : > { %vm1696_vm12 = vcmp.ge.s32.totalorder %v1656_v4, %v7911_v43  ;;  %vm1761_vm4 = vcmp.le.s32.totalorder %v1656_v4, %v7913_v41  ;;  %vm1721_vm14 = vmand %vm7901_vm3, %vm1689_vm1 }
 0x303   : > { %vm1728_vm0 = vmand %vm11204_vm13, %vm1696_vm12 }
 0x304   : > { %vm8219_vm5 = vmand %vm1728_vm0, %vm1761_vm4 }
 0x305   : > { %vm8228_vm11 = vmand %vm1721_vm14, %vm1754_vm6  ;;  %vm11218_vm6 = vnez %v11069_v49  ;;  %v11276_v49 = vld [vmem:[#allocation87_spill] sm:$0xff]  ;;  %v11281_v13 = vsel %vm8219_vm5, -inf, %v11207_v13  }
 0x306   : > { %v11209_v58 = vsel %vm8228_vm11, 4294967295, %v11208_v58 }
 0x307   : > { %v11210_v4 = vmov %v11209_v58  ;;  %v11273_v58 = vld [vmem:[#allocation56_spill] sm:$0xff] }
 0x308   : > { %v1641_v2 = vpop.permute.xlu1 %1640  ;;  %v11297_v51 = vld [vmem:[#allocation179_spill] sm:$0xff] }
 0x309   : > { %v1662_v8 = vpop.permute.xlu2 %1661  ;;  %vm1691_vm0 = vcmp.ge.s32.totalorder %v1641_v2, %v7911_v43  ;;  %vm1756_vm3 = vcmp.le.s32.totalorder %v1641_v2, %v7913_v41  ;;  %v11274_v2 = vld [vmem:[#allocation50_spill] sm:$0xff]  ;;  %vm11298_vm5 = vnez %v11297_v51  ;;  %v11338_v51 = vld [vmem:[#allocation174_spill] sm:$0xff] }
 0x30a   : > { %vm1698_vm12 = vcmp.ge.s32.totalorder %v1662_v8, %v7911_v43  ;;  %vm1763_vm4 = vcmp.le.s32.totalorder %v1662_v8, %v7913_v41  ;;  %vm1723_vm14 = vmand %vm11218_vm6, %vm1691_vm0  ;;  %vm11228_vm6 = vnez %v11050_v11  ;;  %v11237_v11 = vld [vmem:[#allocation55_spill] sm:$0xff] }
 0x30b   : > { %vm1730_vm13 = vmand %vm7978_vm7, %vm1698_vm12 }
 0x30c   : > { %vm8241_vm1 = vmand %vm1730_vm13, %vm1763_vm4  ;;  %vm11224_vm4 = vnez %v11101_v1  ;;  %v11232_v1 = vld [vmem:[#allocation155_spill] sm:$0xff] }
 0x30d   : > { %vm8250_vm15 = vmand %vm1723_vm14, %vm1756_vm3 }
 0x30e   : > { %v11286_v60 = vsel %vm8250_vm15, -inf, %v11223_v42   ;;  %vm11294_vm15 = vnez %v11195_v17  ;;  %v11310_v17 = vld [vmem:[#allocation178_spill] sm:$0xff]  ;;  %v11312_v42 = vld [vmem:[#allocation62_spill] sm:$0xff] }
 0x30f   : > { %v11295_v63 = vsel %vm11294_vm15, -inf, %v11197_v34   ;;  %v11314_v34 = vld [vmem:[#allocation167_spill] sm:$0xff] }
 0x310   : > { %11296 = vst [vmem:[#allocation80_spill] sm:$0xff] %v11295_v63  ;;  %v11328_v63 = vld [vmem:[#allocation165_spill] sm:$0xff] }
 0x311   : > { %v1668_v59 = vpop.permute.xlu2 %1667  ;;  %v1647_v39 = vpop.permute.xlu1 %1646 }
 0x312   : > { %vm1700_vm7 = vcmp.ge.s32.totalorder %v1668_v59, %v7911_v43  ;;  %vm1765_vm12 = vcmp.le.s32.totalorder %v1668_v59, %v7913_v41  ;;  %vm1693_vm2 = vcmp.ge.s32.totalorder %v1647_v39, %v7911_v43  ;;  %vm1758_vm0 = vcmp.le.s32.totalorder %v1647_v39, %v7913_v41  ;;  %v11269_v39 = vld [vmem:[#allocation105_spill] sm:$0xff] }
 0x313   : > { %vm1732_vm13 = vmand %vm11224_vm4, %vm1700_vm7  ;;  %vm11234_vm4 = vnez %v11077_v12  ;;  %v11251_v59 = vmov %v10992_v32 }
 0x314   : > { %vm8263_vm3 = vmand %vm1732_vm13, %vm1765_vm12 }
 0x315   : > { %v1861_v23 = vsel %vm8263_vm3, -inf, %v11227_v50   ;;  %vm1725_vm14 = vmand %vm11228_vm6, %vm1693_vm2  ;;  %vm11238_vm6 = vnez %v11088_v61  ;;  %v11247_v50 = vmov %v11012_v6  ;;  %v11256_v61 = vld [vmem:[#allocation45_spill] sm:$0xff] }
 0x316   : > { %vm8272_vm11 = vmand %vm1725_vm14, %vm1758_vm0 }
 0x317   : > { %v1854_v40 = vsel %vm8272_vm11, -inf, %v11232_v1   ;;  %v11279_v1 = vsel %vm8241_vm1, -inf, %v11217_v5  }
 0x318   : > { %11280 = vst [vmem:[#allocation111_spill] sm:$0xff] %v11279_v1  ;;  %v11283_v1 = vsel %vm8186_vm9, -inf, %v11191_v20   ;;  %v11284_v5 = vmov %v1854_v40  ;;  %vm11290_vm9 = vnez %v11210_v4  ;;  %v11293_v4 = vsel %vm11292_vm10, -inf, %v11140_v10   ;;  %v11299_v10 = vld [vmem:[#allocation69_spill] sm:$0xff]  ;;  %v11307_v20 = vld [vmem:[#allocation112_spill] sm:$0xff] }
 0x319   : > { %v1653_v56 = vpop.permute.xlu1 %1652  ;;  %v11300_v10 = vsel %vm11298_vm5, -inf, %v11299_v10   ;;  %v11301_v40 = vld [vmem:[#allocation170_spill] sm:$0xff] }
 0x31a   : > { %vm1695_vm7 = vcmp.ge.s32.totalorder %v1653_v56, %v7911_v43  ;;  %vm1760_vm12 = vcmp.le.s32.totalorder %v1653_v56, %v7913_v41  ;;  %v11258_v56 = vld [vmem:[#allocation109_spill] sm:$0xff]  ;;  %vm11302_vm11 = vnez %v11301_v40 }
 0x31b   : > { %vm1727_vm13 = vmand %vm11234_vm4, %vm1695_vm7  ;;  %vm11242_vm4 = vnez %v11056_v9  ;;  %v11271_v9 = vld [vmem:[#allocation61_spill] sm:$0xff]  ;;  %v11304_v46 = vsel %vm11302_vm11, -inf, %v11303_v46  }
 0x31c   : > { %vm8283_vm3 = vmand %vm1727_vm13, %vm1760_vm12 }
 0x31d   : > { %v1856_v62 = vsel %vm8283_vm3, -inf, %v11237_v11   ;;  %v11262_v11 = vld [vmem:[#allocation103_spill] sm:$0xff] }
 0x31e   : > { %11282 = vst [vmem:[#allocation55_spill] sm:$0xff] %v1856_v62  ;;  %v11318_v62 = vld [vmem:[#allocation175_spill] sm:$0xff] }
 0x323   : > { %v1659_v48 = vpop.permute.xlu1 %1658 }
 0x324   : > { %vm1697_vm2 = vcmp.ge.s32.totalorder %v1659_v48, %v7911_v43  ;;  %vm1762_vm0 = vcmp.le.s32.totalorder %v1659_v48, %v7913_v41  ;;  %v11250_v48 = vmov %v11000_v0 }
 0x325   : > { %vm1729_vm14 = vmand %vm11238_vm6, %vm1697_vm2  ;;  %v1864_v12 = vpop.xlane.xlu0 %1863  ;;  %vm11311_vm2 = vnez %v11310_v17  ;;  %vm11319_vm6 = vnez %v11318_v62  ;;  %v11345_v62 = vld [vmem:[#allocation108_spill] sm:$0xff]  ;;  %v11348_v17 = vld [vmem:[#allocation171_spill] sm:$0xff] }
 0x326   : > { %vm8294_vm8 = vmand %vm1729_vm14, %vm1762_vm0  ;;  %2119 = vpush %v1864_v12  ;;  %v11249_v12 = vmov %v11004_v47  ;;  %v11313_v42 = vsel %vm11311_vm2, -inf, %v11312_v42   ;;  %vm11315_vm0 = vnez %v11314_v34  ;;  %v11321_v33 = vsel %vm11319_vm6, -inf, %v11320_v33   ;;  %v11335_v34 = vld [vmem:[#allocation83_spill] sm:$0xff] }
 0x327   : > { %v1858_v8 = vsel %vm8294_vm8, -inf, %v11241_v37   ;;  %v11275_v37 = vld [vmem:[#allocation74_spill] sm:$0xff]  ;;  %vm11287_vm8 = vnez %v11156_v36  ;;  %v11291_v36 = vsel %vm11290_vm9, -inf, %v11212_v18   ;;  %11322 = vst [vmem:[#allocation81_spill] sm:$0xff] %v11321_v33  ;;  %v11323_v18 = vld [vmem:[#allocation176_spill] sm:$0xff] }
 0x328   : > { %v11288_v19 = vsel %vm11287_vm8, -inf, %v11158_v54   ;;  %v11316_v54 = vld [vmem:[#allocation51_spill] sm:$0xff]  ;;  %vm11324_vm14 = vnez %v11323_v18  ;;  %v11330_v18 = vld [vmem:[#allocation82_spill] sm:$0xff] }
 0x329   : > { %11289 = vst [vmem:[#allocation49_spill] sm:$0xff] %v11288_v19  ;;  %v11305_v19 = vld [vmem:[#allocation177_spill] sm:$0xff]  ;;  %v11317_v54 = vsel %vm11315_vm0, -inf, %v11316_v54   ;;  %v11340_v33 = vld [vmem:[#allocation78_spill] sm:$0xff] }
 0x32a   : > { %vm11306_vm1 = vnez %v11305_v19  ;;  %v11343_v19 = vld [vmem:[#allocation164_spill] sm:$0xff] }
 0x32b   : > { %v1665_v21 = vpop.permute.xlu1 %1664  ;;  %v11308_v20 = vsel %vm11306_vm1, -inf, %v11307_v20  }
 0x32c   : > { %vm1699_vm7 = vcmp.ge.s32.totalorder %v1665_v21, %v7911_v43  ;;  %vm1764_vm12 = vcmp.le.s32.totalorder %v1665_v21, %v7913_v41  ;;  %v11248_v41 = vmov %v11008_v35  ;;  %v11264_v21 = vld [vmem:[#allocation67_spill] sm:$0xff]  ;;  %11309 = vst [vmem:[#allocation112_spill] sm:$0xff] %v11308_v20  ;;  %v11326_v20 = vsel %vm11324_vm14, -inf, %v11325_v31   ;;  %v11360_v31 = vld [vmem:[#allocation57_spill] sm:$0xff] }
 0x32d   : > { %vm1731_vm13 = vmand %vm11242_vm4, %vm1699_vm7  ;;  %v11265_v43 = vld [vmem:[#allocation79_spill] sm:$0xff]  ;;  %11327 = vst [vmem:[#allocation113_spill] sm:$0xff] %v11326_v20  ;;  %vm11329_vm7 = vnez %v11328_v63  ;;  %vm11339_vm4 = vnez %v11338_v51 }
 0x32e   : > { %vm8305_vm3 = vmand %vm1731_vm13, %vm1764_vm12  ;;  %v11331_v18 = vsel %vm11329_vm7, -inf, %v11330_v18   ;;  %vm11334_vm12 = vnez %v11333_v57  ;;  %v11341_v40 = vsel %vm11339_vm4, -inf, %v11340_v33   ;;  %vm11344_vm13 = vnez %v11343_v19  ;;  %v11355_v51 = vld [vmem:[#allocation115_spill] sm:$0xff]  ;;  %v11373_v57 = vld [vmem:[#allocation70_spill] sm:$0xff] }
 0x32f   : > { %v1860_v16 = vsel %vm8305_vm3, -inf, %v11245_v53   ;;  %v11268_v53 = vld [vmem:[#allocation63_spill] sm:$0xff]  ;;  %11332 = vst [vmem:[#allocation82_spill] sm:$0xff] %v11331_v18  ;;  %v11336_v34 = vsel %vm11334_vm12, -inf, %v11335_v34   ;;  %v11346_v62 = vsel %vm11344_vm13, -inf, %v11345_v62   ;;  %vm11349_vm3 = vnez %v11348_v17  ;;  %v11370_v17 = vld [vmem:[#allocation84_spill] sm:$0xff] }
 0x330   : > { %11337 = vst [vmem:[#allocation83_spill] sm:$0xff] %v11336_v34  ;;  %v11353_v18 = vld [vmem:[#allocation172_spill] sm:$0xff]  ;;  %v11358_v34 = vld [vmem:[#allocation163_spill] sm:$0xff]  ;;  %vm11374_vm5 = vnez %v11373_v57  ;;  %v11380_v19 = vld [vmem:[#allocation116_spill] sm:$0xff] }
 0x331   : > { %11342 = vst [vmem:[#allocation78_spill] sm:$0xff] %v11341_v40  ;;  %v11350_v40 = vld [vmem:[#allocation101_spill] sm:$0xff]  ;;  %vm11354_vm8 = vnez %v11353_v18  ;;  %vm11359_vm9 = vnez %v11358_v34  ;;  %v11363_v63 = vld [vmem:[#allocation168_spill] sm:$0xff] }
 0x332   : > { %11347 = vst [vmem:[#allocation108_spill] sm:$0xff] %v11346_v62  ;;  %v11351_v40 = vsel %vm11349_vm3, -inf, %v11350_v40   ;;  %v11356_v51 = vsel %vm11354_vm8, -inf, %v11355_v51   ;;  %v11361_v20 = vsel %vm11359_vm9, -inf, %v11360_v31   ;;  %vm11364_vm10 = vnez %v11363_v63  ;;  %v11365_v31 = vld [vmem:[#allocation114_spill] sm:$0xff]  ;;  %v11368_v62 = vld [vmem:[#allocation169_spill] sm:$0xff] }
 0x333   : > { %11352 = vst [vmem:[#allocation101_spill] sm:$0xff] %v11351_v40  ;;  %v11366_v31 = vsel %vm11364_vm10, -inf, %v11365_v31   ;;  %vm11369_vm15 = vnez %v11368_v62  ;;  %v11378_v40 = vld [vmem:[#allocation166_spill] sm:$0xff] }
 0x334   : > { %11357 = vst [vmem:[#allocation115_spill] sm:$0xff] %v11356_v51  ;;  %v11371_v17 = vsel %vm11369_vm15, -inf, %v11370_v17   ;;  %v11375_v51 = vld [vmem:[#allocation96_spill] sm:$0xff]  ;;  %vm11379_vm11 = vnez %v11378_v40 }
 0x335   : > { %11362 = vst [vmem:[#allocation57_spill] sm:$0xff] %v11361_v20  ;;  %v11376_v33 = vsel %vm11374_vm5, -inf, %v11375_v51   ;;  %v11381_v18 = vsel %vm11379_vm11, -inf, %v11380_v19  }
 0x336   : > { %11367 = vst [vmem:[#allocation114_spill] sm:$0xff] %v11366_v31 }
 0x337   : > { %11372 = vst [vmem:[#allocation84_spill] sm:$0xff] %v11371_v17 }
 0x338   : > { %11377 = vst [vmem:[#allocation96_spill] sm:$0xff] %v11376_v33 }
 0x339   : > { %11382 = vst [vmem:[#allocation116_spill] sm:$0xff] %v11381_v18 }
 0x357   : > { %s2120_s29 = spop %2119 }
 0x358   : > { %p1866_p0 = scmp.gt.f32.partialorder %s2120_s29, 0.0 }
 0x35a   : > { %p8314_p2 = pnand %p1866_p0, %p1005_p1 }
 0x35b   :  { %v11384_v34 = vld [vmem:[#allocation97_spill] sm:$0xff] (%p8314_p2)  ;;  %v11385_v17 = vld [vmem:[#allocation110_spill] sm:$0xff] (%p8314_p2)  ;;  %v11386_v31 = vld [vmem:[#allocation87_spill] sm:$0xff] (%p8314_p2)  ;;  %s3231_s3 = smov (%p8314_p2), [#allocation2]   ;;  %s1906_s7 = sshll.u32 (%p8314_p2), %s8633_s2, 4  ;;  %1894 = vst [vmem:[#allocation2 + $0xd0] sm:$0xff] (%p8314_p2), %v10988_v14  ;;  %s1907_s7 = int_to_ptr.hbm [resolvable:$true] %s1906_s7 }
 0x35c   :  { %1009 = sbr.rel (!%p8314_p2) target bundleno = 415 (0x19f), region = 35  ;;  %1868 = vst [vmem:[#allocation2] sm:$0xff] (%p8314_p2), %v11384_v34  ;;  %v11387_v20 = vld [vmem:[#allocation74_spill] sm:$0xff] (%p8314_p2)  ;;  %v11389_v62 = vld [vmem:[#allocation56_spill] sm:$0xff] (%p8314_p2)  ;;  %v11390_v57 = vld [vmem:[#allocation99_spill] sm:$0xff] (%p8314_p2)  ;;  %s1904_s4 = sshll.u32 (%p8314_p2), %s3231_s3, 4  ;;  %s1905_s4 = int_to_ptr.vmem [resolvable:$true] %s1904_s4 }
 0x35d   :  { %1869 = vst [vmem:[#allocation2 + $0x8] sm:$0xff] (%p8314_p2), %v11385_v17  ;;  %v11388_v63 = vld [vmem:[#allocation50_spill] sm:$0xff] (%p8314_p2)  ;;  %v11391_v51 = vld [vmem:[#allocation61_spill] sm:$0xff] (%p8314_p2)  ;;  %v11392_v33 = vld [vmem:[#allocation64_spill] sm:$0xff] (%p8314_p2)  ;;  %s3232_s8 = smov (%p8314_p2), 128   ;;  %s3233_s9 = smov (%p8314_p2), 8  }
 0x35e   :  { %1870 = vst [vmem:[#allocation2 + $0x10] sm:$0xff] (%p8314_p2), %v11386_v31  ;;  %v11393_v40 = vld [vmem:[#allocation105_spill] sm:$0xff] (%p8314_p2)  ;;  %v11394_v9 = vld [vmem:[#allocation63_spill] sm:$0xff] (%p8314_p2)  ;;  %v11396_v41 = vld [vmem:[#allocation102_spill] sm:$0xff] (%p8314_p2) }
 0x35f   :  { %1871 = vst [vmem:[#allocation2 + $0x18] sm:$0xff] (%p8314_p2), %v11387_v20  ;;  %v11395_v43 = vld [vmem:[#allocation85_spill] sm:$0xff] (%p8314_p2)  ;;  %v11397_v46 = vld [vmem:[#allocation79_spill] sm:$0xff] (%p8314_p2)  ;;  %v11399_v10 = vld [vmem:[#allocation104_spill] sm:$0xff] (%p8314_p2) }
 0x360   :  { %1872 = vst [vmem:[#allocation2 + $0x20] sm:$0xff] (%p8314_p2), %v11388_v63  ;;  %v11398_v42 = vld [vmem:[#allocation67_spill] sm:$0xff] (%p8314_p2)  ;;  %v11401_v13 = vld [vmem:[#allocation106_spill] sm:$0xff] (%p8314_p2)  ;;  %v11403_v27 = vld [vmem:[#allocation68_spill] sm:$0xff] (%p8314_p2) }
 0x361   :  { %1873 = vst [vmem:[#allocation2 + $0x28] sm:$0xff] %v11389_v62  ;;  %v11400_v36 = vld [vmem:[#allocation103_spill] sm:$0xff]  ;;  %v11404_v30 = vld [vmem:[#allocation109_spill] sm:$0xff]  ;;  %v11405_v44 = vld [vmem:[#allocation100_spill] sm:$0xff] }
 0x362   :  { %1874 = vst [vmem:[#allocation2 + $0x30] sm:$0xff] %v11390_v57  ;;  %v11402_v54 = vld [vmem:[#allocation107_spill] sm:$0xff]  ;;  %v11406_v7 = vld [vmem:[#allocation45_spill] sm:$0xff]  ;;  %v11407_v23 = vld [vmem:[#allocation98_spill] sm:$0xff] }
 0x363   :  { %1875 = vst [vmem:[#allocation2 + $0x38] sm:$0xff] %v11391_v51  ;;  %v11408_v60 = vld [vmem:[#allocation86_spill] sm:$0xff]  ;;  %v11409_v55 = vld [vmem:[#allocation95_spill] sm:$0xff] }
 0x364   :  { %1876 = vst [vmem:[#allocation2 + $0x40] sm:$0xff] %v11392_v33 }
 0x365   :  { %1877 = vst [vmem:[#allocation2 + $0x48] sm:$0xff] %v11393_v40 }
 0x366   :  { %1878 = vst [vmem:[#allocation2 + $0x50] sm:$0xff] %v11394_v9 }
 0x367   :  { %1879 = vst [vmem:[#allocation2 + $0x58] sm:$0xff] %v11395_v43 }
 0x368   :  { %1880 = vst [vmem:[#allocation2 + $0x60] sm:$0xff] %v11396_v41 }
 0x369   :  { %1881 = vst [vmem:[#allocation2 + $0x68] sm:$0xff] %v11397_v46 }
 0x36a   :  { %1882 = vst [vmem:[#allocation2 + $0x70] sm:$0xff] %v11398_v42 }
 0x36b   :  { %1883 = vst [vmem:[#allocation2 + $0x78] sm:$0xff] %v11399_v10 }
 0x36c   :  { %1884 = vst [vmem:[#allocation2 + $0x80] sm:$0xff] %v11400_v36 }
 0x36d   :  { %1885 = vst [vmem:[#allocation2 + $0x88] sm:$0xff] %v11401_v13 }
 0x36e   :  { %1886 = vst [vmem:[#allocation2 + $0x90] sm:$0xff] %v11402_v54 }
 0x36f   :  { %1887 = vst [vmem:[#allocation2 + $0x98] sm:$0xff] %v11403_v27 }
 0x370   :  { %1888 = vst [vmem:[#allocation2 + $0xa0] sm:$0xff] %v11404_v30 }
 0x371   :  { %1889 = vst [vmem:[#allocation2 + $0xa8] sm:$0xff] %v11405_v44 }
 0x372   :  { %1890 = vst [vmem:[#allocation2 + $0xb0] sm:$0xff] %v11406_v7 }
 0x373   :  { %1891 = vst [vmem:[#allocation2 + $0xb8] sm:$0xff] %v11407_v23 }
 0x374   :  { %1892 = vst [vmem:[#allocation2 + $0xc0] sm:$0xff] %v11408_v60 }
 0x375   :  { %1893 = vst [vmem:[#allocation2 + $0xc8] sm:$0xff] %v11409_v55 }
 0x376   :  { %1895 = vst [vmem:[#allocation2 + $0xd8] sm:$0xff] %v10992_v32 }
 0x377   :  { %1896 = vst [vmem:[#allocation2 + $0xe0] sm:$0xff] %v11000_v0 }
 0x378   :  { %1897 = vst [vmem:[#allocation2 + $0xe8] sm:$0xff] %v11004_v47 }
 0x379   :  { %1898 = vst [vmem:[#allocation2 + $0xf0] sm:$0xff] %v11008_v35 }
 0x37a   :  { %1899 = vst [vmem:[#allocation2 + $0xf8] sm:$0xff] %v11012_v6 }
 0x37b   :  { %1912 = dma.vmem_to_hbm [thread:$0]  %s1905_s4, 4096, %s1907_s7, [#allocation3], %s3232_s8, %s3232_s8, %s3233_s9  }
 0x37c   :  { %2966 = dma.done.wait [#allocation3], 4096  }
 0x37d   :  { %2967 = vsyncadd [#allocation3], 4294963200 }
 0x37e   :  { %1917 = vsyncpa [#allocation3], 1 }

</bundles_post_ra>
